<compile_context>
chip_gen: v5e
topology: v5e:2x2
jax: 0.10.0
libtpu: 0.0.40
codegen_flags: <defaults>
</compile_context>

<pallas_src>
import math
import functools

import jax
import jax.numpy as jnp
from jax.experimental import pallas as pl
from jax.experimental.pallas import tpu as pltpu

LN_EPS = 1e-12  # BERT LayerNorm eps
BF16 = jnp.bfloat16
F32 = jnp.float32


# ----------------------------- in-kernel helpers -----------------------------

def _layer_norm(x, gamma, beta):
    mean = jnp.mean(x, axis=-1, keepdims=True)
    var = jnp.mean((x - mean) ** 2, axis=-1, keepdims=True)
    return (x - mean) * jax.lax.rsqrt(var + LN_EPS) * gamma + beta


def _gelu(x):
    # TODO(synk): HF BERT uses exact erf-GELU; tanh approximation used for robust TPU lowering.
    return 0.5 * x * (1.0 + jnp.tanh(0.7978845608028654 * (x + 0.044715 * x * x * x)))


# --------------------------- fully fused forward kernel ---------------------------
# grid = (row_tiles, num_layers); l (layers) innermost / "arbitrary", bt "parallel".

def _fused_kernel(x_ref, tsin_ref, pos_ref,
                  tw1_ref, tb1_ref, tw2_ref, uw1_ref, uw2_ref, evec_ref,
                  wq_ref, wk_ref, wv_ref, wo_ref, wi_ref, wf_ref,
                  pvec_ref, bi_ref,
                  dw1_ref, db1_ref, dw2_ref, db2_ref,
                  o_ref, h_scr,
                  *, num_heads, seqs_per_tile, seq_len):
    l = pl.program_id(1)
    G, S = seqs_per_tile, seq_len
    R = G * S
    H = h_scr.shape[-1]
    hd = H // num_heads

    # -------- prologue (l == 0): time-MLP + input_up_proj + pos add + LayerNorm --------
    @pl.when(l == 0)
    def _():
        ev = evec_ref[...]                                  # (5, H): [tb2, ub1, ub2, ln_g, ln_b]
        # time_embed: Linear -> SiLU -> Linear, all G sequences of this tile at once
        t = tsin_ref[...].reshape(G, -1).astype(BF16)        # (G, Td)
        ht = jnp.dot(t, tw1_ref[...], preferred_element_type=F32) + tb1_ref[...]
        ht = ht * jax.nn.sigmoid(ht)                         # SiLU (f32)
        emb_t = jnp.dot(ht.astype(BF16), tw2_ref[...],
                        preferred_element_type=F32) + ev[0:1]            # (G, H)

        # input_up_proj: Linear -> Tanh -> Linear, batch flattened into matmul rows
        x = x_ref[...].reshape(R, x_ref.shape[-1]).astype(BF16)          # (R, Din)
        h1 = jnp.tanh(jnp.dot(x, uw1_ref[...], preferred_element_type=F32) + ev[1:2])
        emb_x = jnp.dot(h1.astype(BF16), uw2_ref[...],
                        preferred_element_type=F32) + ev[2:3]            # (R, H)

        emb = emb_x.reshape(G, S, H) + pos_ref[...] + emb_t[:, None, :]  # broadcasts in VMEM
        h0 = _layer_norm(emb, ev[3:4], ev[4:5])
        h_scr[...] = h0.reshape(R, H).astype(BF16)           # bf16 carry, VMEM resident

    # --------------------------------- BERT layer l ---------------------------------
    xb = h_scr[...]                                          # (R, H) bf16
    xf = xb.astype(F32)                                      # residual in f32
    pv = pvec_ref[0]                                         # (9, H) f32:
    # rows: 0=bq(*scale) 1=bk 2=bv 3=bo 4=ln1_g 5=ln1_b 6=bf 7=ln2_g 8=ln2_b

    q = jnp.dot(xb, wq_ref[0], preferred_element_type=F32) + pv[0:1]   # scale pre-folded
    k = jnp.dot(xb, wk_ref[0], preferred_element_type=F32) + pv[1:2]
    v = jnp.dot(xb, wv_ref[0], preferred_element_type=F32) + pv[2:3]

    q4 = q.reshape(G, S, num_heads, hd)
    k4 = k.reshape(G, S, num_heads, hd)
    v4 = v.reshape(G, S, num_heads, hd)
    wo = wo_ref[0]                                           # (H, H) bf16

    # Heads: static loop with single-batch-dim einsums (documented Mosaic path); head
    # outputs contracted directly against the matching W_O rows (no lane concat).
    attn = jnp.zeros((R, H), F32)
    for h in range(num_heads):
        lo = h * hd
        qh = q4[:, :, h, :].astype(BF16)                     # (G, S, hd)
        kh = k4[:, :, h, :].astype(BF16)
        vh = v4[:, :, h, :].astype(BF16)
        s = jnp.einsum('gqd,gkd->gqk', qh, kh, preferred_element_type=F32)   # (G,S,S)
        s = s - jnp.max(s, axis=-1, keepdims=True)
        p = jnp.exp(s)
        p = p * pl.reciprocal(jnp.sum(p, axis=-1, keepdims=True), approx=True)
        ch = jnp.einsum('gqk,gkd->gqd', p.astype(BF16), vh,
                        preferred_element_type=F32)                          # (G,S,hd)
        attn = attn + jnp.dot(ch.reshape(R, hd).astype(BF16), wo[lo:lo + hd, :],
                              preferred_element_type=F32)
    attn = attn + pv[3:4]

    h1 = _layer_norm(attn + xf, pv[4:5], pv[5:6])            # post-LN (f32)
    inter = _gelu(jnp.dot(h1.astype(BF16), wi_ref[0],
                          preferred_element_type=F32) + bi_ref[0])
    ffn = jnp.dot(inter.astype(BF16), wf_ref[0], preferred_element_type=F32) + pv[6:7]
    h2 = _layer_norm(ffn + h1, pv[7:8], pv[8:9])
    h_scr[...] = h2.astype(BF16)                             # carry to next layer

    # -------- epilogue (l == last): output_down_proj, lane-dense 128-padded store --------
    @pl.when(l == pl.num_programs(1) - 1)
    def _():
        t = jnp.tanh(jnp.dot(h2.astype(BF16), dw1_ref[...],
                             preferred_element_type=F32) + db1_ref[...])
        y = jnp.dot(t.astype(BF16), dw2_ref[...],
                    preferred_element_type=F32) + db2_ref[...]
        o_ref[...] = y.reshape(o_ref.shape)


def _fused_forward(x, t_sin, params, cfg):
    B, S, Din = x.shape
    H, I, L = cfg["hidden_size"], cfg["intermediate_size"], cfg["num_layers"]
    nh, Td = cfg["num_heads"], cfg["hidden_t_dim"]
    T4 = 4 * Td
    down = params["down"]
    Dpad = down["w2p"].shape[1]
    assert H % nh == 0

    # --- row-tile selection: ~512 rows/tile (fills MXU, minimizes weight re-streaming,
    #     since the full stacked weight set is re-read from HBM once per row tile).
    #     Pad batch so G never degenerates to 1 for odd/prime B.
    target_rows = 512
    G = max(1, min(B, target_rows // max(S, 1)))
    Bp = ((B + G - 1) // G) * G
    NBT = Bp // G
    if Bp != B:
        x = jnp.pad(x, ((0, Bp - B), (0, 0), (0, 0)))
        t_sin = jnp.pad(t_sin, ((0, Bp - B), (0, 0)))
    t_sin3 = t_sin.reshape(Bp, 1, Td)

    # --- fold the 1/sqrt(head_dim) attention scale into W_Q / b_Q (zero kernel cost) ---
    enc = params["enc"]
    scale = 1.0 / math.sqrt(H // nh)
    wq = (enc["wq"] * scale).astype(BF16)
    bq = enc["bq"] * scale

    # --- pack the 9 per-layer H-wide bias / LayerNorm vectors into one (L, 9, H) block ---
    pvec = jnp.concatenate([bq, enc["bk"], enc["bv"], enc["bo"], enc["g1"], enc["be1"],
                            enc["bf"], enc["g2"], enc["be2"]], axis=1)      # (L, 9, H) f32
    tp, up, ln = params["time"], params["up"], params["emb_ln"]
    evec = jnp.concatenate([tp["b2"], up["b1"], up["b2"], ln["gamma"], ln["beta"]],
                           axis=0)                                           # (5, H) f32
    pos = params["pos_table"][:S]                                            # (S, H) f32

    # --- explicit VMEM budget (feedback): 2x double-buffered layer weights + carry +
    #     io blocks + embed/down weights + f32 temporaries. ---
    layer_w = (4 * H * H + 2 * H * I) * 2 + (9 * H + I) * 4
    io = (G * S * Din + G * Td + G * S * Dpad) * 4
    fixed_w = (Td * T4 + T4 * H + Din * H + 2 * H * H + H * Dpad) * 2 \
        + (T4 + 5 * H + H + Dpad + S * H) * 4
    scratch = G * S * H * 2
    act = G * S * (6 * H + 2 * I) * 4 + G * S * S * 8
    vmem_est = 2 * layer_w + 2 * io + fixed_w + scratch + act
    # NOTE: for bert-base-sized configs re-derive G per generation (v7x has 64 MiB VMEM).
    vmem_limit = int(min(max(int(vmem_est * 1.4), 32 * 2**20), 100 * 2**20))

    def full(arr):
        nd = arr.ndim
        return pl.BlockSpec(arr.shape, lambda bt, l, nd=nd: (0,) * nd)

    def per_layer(arr):
        return pl.BlockSpec((1,) + arr.shape[1:], lambda bt, l: (l, 0, 0))

    def per_tile(arr):
        return pl.BlockSpec((G,) + arr.shape[1:], lambda bt, l: (bt, 0, 0))

    kernel = functools.partial(_fused_kernel, num_heads=nh, seqs_per_tile=G, seq_len=S)

    out = pl.pallas_call(
        kernel,
        out_shape=jax.ShapeDtypeStruct((Bp, S, Dpad), F32),
        grid=(NBT, L),
        in_specs=[per_tile(x), per_tile(t_sin3), full(pos),
                  full(tp["w1"]), full(tp["b1"]), full(tp["w2"]),
                  full(up["w1"]), full(up["w2"]), full(evec),
                  per_layer(wq), per_layer(enc["wk"]), per_layer(enc["wv"]),
                  per_layer(enc["wo"]), per_layer(enc["wi"]), per_layer(enc["wf"]),
                  per_layer(pvec), per_layer(enc["bi"]),
                  full(down["w1"]), full(down["b1"]), full(down["w2p"]), full(down["b2p"])],
        out_specs=pl.BlockSpec((G, S, Dpad), lambda bt, l: (bt, 0, 0)),
        scratch_shapes=[pltpu.VMEM((G * S, H), BF16)],
        compiler_params=pltpu.CompilerParams(
            dimension_semantics=("parallel", "arbitrary"),
            vmem_limit_bytes=vmem_limit),
    )(x, t_sin3, pos,
      tp["w1"], tp["b1"], tp["w2"], up["w1"], up["w2"], evec,
      wq, enc["wk"], enc["wv"], enc["wo"], enc["wi"], enc["wf"],
      pvec, enc["bi"],
      down["w1"], down["b1"], down["w2p"], down["b2p"])
    return out[:B]


# ------------------------------------ glue ---------------------------------------

def timestep_embedding(timesteps, dim, max_period=10000):
    half = dim // 2
    freqs = jnp.exp(-math.log(max_period) * jnp.arange(half, dtype=F32) / half)
    args = timesteps.astype(F32)[:, None] * freqs[None, :]
    emb = jnp.concatenate([jnp.cos(args), jnp.sin(args)], axis=-1)
    if dim % 2:
        emb = jnp.concatenate([emb, jnp.zeros_like(emb[:, :1])], axis=-1)
    return emb


def init_params(key, cfg):
    H, Din, Dout = cfg["hidden_size"], cfg["input_dims"], cfg["output_dims"]
    Td, I, L = cfg["hidden_t_dim"], cfg["intermediate_size"], cfg["num_layers"]
    Dpad = 128 * ((Dout + 127) // 128)
    keys = iter(jax.random.split(key, 32))

    def w(shape, dtype=BF16):
        return (0.02 * jax.random.normal(next(keys), shape, F32)).astype(dtype)

    def zeros(shape):
        return jnp.zeros(shape, F32)

    return {
        "time": {"w1": w((Td, 4 * Td)), "b1": zeros((1, 4 * Td)),
                 "w2": w((4 * Td, H)), "b2": zeros((1, H))},
        "up": {"w1": w((Din, H)), "b1": zeros((1, H)),
               "w2": w((H, H)), "b2": zeros((1, H))},
        "pos_table": w((cfg["max_position_embeddings"], H), F32),
        "emb_ln": {"gamma": jnp.ones((1, H), F32), "beta": zeros((1, H))},
        # per-layer weights stacked along a leading L axis (single fused encoder kernel)
        "enc": {
            "wq": w((L, H, H)), "bq": zeros((L, 1, H)),
            "wk": w((L, H, H)), "bk": zeros((L, 1, H)),
            "wv": w((L, H, H)), "bv": zeros((L, 1, H)),
            "wo": w((L, H, H)), "bo": zeros((L, 1, H)),
            "g1": jnp.ones((L, 1, H), F32), "be1": zeros((L, 1, H)),
            "wi": w((L, H, I)), "bi": zeros((L, 1, I)),
            "wf": w((L, I, H)), "bf": zeros((L, 1, H)),
            "g2": jnp.ones((L, 1, H), F32), "be2": zeros((L, 1, H)),
        },
        # down-proj second matmul padded to a lane-dense (multiple-of-128) output width
        "down": {"w1": w((H, H)), "b1": zeros((1, H)),
                 "w2p": jnp.zeros((H, Dpad), BF16).at[:, :Dout].set(w((H, Dout))),
                 "b2p": zeros((1, Dpad))},
    }


def transformer_net_forward(params, x, timesteps, cfg):
    # sinusoidal timestep embedding: tiny transcendental glue, left to XLA
    t_sin = timestep_embedding(timesteps, cfg["hidden_t_dim"])          # (B, Td)
    out_pad = _fused_forward(x, t_sin, params, cfg)                     # (B, S, Dpad)
    # dropout is identity at inference
    return out_pad[..., :cfg["output_dims"]].astype(x.dtype)


if __name__ == "__main__":
    cfg = dict(
        input_dims=32, output_dims=32, hidden_t_dim=32,
        hidden_size=128, num_layers=2, num_heads=4, intermediate_size=512,
        max_position_embeddings=64,
    )
    key = jax.random.PRNGKey(0)
    kp, kx, kt = jax.random.split(key, 3)
    params = init_params(kp, cfg)

    B, S = 2, 16
    x = jax.random.normal(kx, (B, S, cfg["input_dims"]), F32)
    timesteps = jax.random.randint(kt, (B,), 0, 1000).astype(F32)

    fwd = jax.jit(functools.partial(transformer_net_forward, cfg=cfg))
    out = jax.block_until_ready(fwd(params, x, timesteps))

    assert out.shape == (B, S, cfg["output_dims"]), out.shape
    assert bool(jnp.all(jnp.isfinite(out)))
    print("KERNEL_OK")
</pallas_src>

<mosaic_0001>
module attributes {stable_mosaic.version = 11 : i64} {
  func.func @_fused_kernel(%arg0: i32, %arg1: i32, %arg2: memref<2x16x32xf32, #tpu.memory_space<vmem>>, %arg3: memref<2x1x32xf32, #tpu.memory_space<vmem>>, %arg4: memref<16x128xf32, #tpu.memory_space<vmem>>, %arg5: memref<32x128xbf16, #tpu.memory_space<vmem>>, %arg6: memref<1x128xf32, #tpu.memory_space<vmem>>, %arg7: memref<128x128xbf16, #tpu.memory_space<vmem>>, %arg8: memref<32x128xbf16, #tpu.memory_space<vmem>>, %arg9: memref<128x128xbf16, #tpu.memory_space<vmem>>, %arg10: memref<5x128xf32, #tpu.memory_space<vmem>>, %arg11: memref<1x128x128xbf16, #tpu.memory_space<vmem>>, %arg12: memref<1x128x128xbf16, #tpu.memory_space<vmem>>, %arg13: memref<1x128x128xbf16, #tpu.memory_space<vmem>>, %arg14: memref<1x128x128xbf16, #tpu.memory_space<vmem>>, %arg15: memref<1x128x512xbf16, #tpu.memory_space<vmem>>, %arg16: memref<1x512x128xbf16, #tpu.memory_space<vmem>>, %arg17: memref<1x9x128xf32, #tpu.memory_space<vmem>>, %arg18: memref<1x1x512xf32, #tpu.memory_space<vmem>>, %arg19: memref<128x128xbf16, #tpu.memory_space<vmem>>, %arg20: memref<1x128xf32, #tpu.memory_space<vmem>>, %arg21: memref<128x128xbf16, #tpu.memory_space<vmem>>, %arg22: memref<1x128xf32, #tpu.memory_space<vmem>>, %arg23: memref<2x16x128xf32, #tpu.memory_space<vmem>>, %arg24: memref<32x128xbf16, #tpu.memory_space<vmem>>) attributes {dimension_semantics = [#tpu.dimension_semantics<parallel>, #tpu.dimension_semantics<arbitrary>], iteration_bounds = array<i64: 1, 2>, scalar_prefetch = 0 : i64, scratch_operands = 1 : i64, tpu.core_type = #tpu.core_type<tc>, window_params = [{transform_indices = @transform_0, window_bounds = array<i64: 2, 16, 32>}, {transform_indices = @transform_1, window_bounds = array<i64: 2, 1, 32>}, {pipeline_mode = #tpu.pipeline_mode<synchronous>, transform_indices = @transform_2, window_bounds = array<i64: 16, 128>}, {pipeline_mode = #tpu.pipeline_mode<synchronous>, transform_indices = @transform_3, window_bounds = array<i64: 32, 128>}, {pipeline_mode = #tpu.pipeline_mode<synchronous>, transform_indices = @transform_4, window_bounds = array<i64: 1, 128>}, {pipeline_mode = #tpu.pipeline_mode<synchronous>, transform_indices = @transform_5, window_bounds = array<i64: 128, 128>}, {pipeline_mode = #tpu.pipeline_mode<synchronous>, transform_indices = @transform_6, window_bounds = array<i64: 32, 128>}, {pipeline_mode = #tpu.pipeline_mode<synchronous>, transform_indices = @transform_7, window_bounds = array<i64: 128, 128>}, {pipeline_mode = #tpu.pipeline_mode<synchronous>, transform_indices = @transform_8, window_bounds = array<i64: 5, 128>}, {transform_indices = @transform_9, window_bounds = array<i64: 1, 128, 128>}, {transform_indices = @transform_10, window_bounds = array<i64: 1, 128, 128>}, {transform_indices = @transform_11, window_bounds = array<i64: 1, 128, 128>}, {transform_indices = @transform_12, window_bounds = array<i64: 1, 128, 128>}, {transform_indices = @transform_13, window_bounds = array<i64: 1, 128, 512>}, {transform_indices = @transform_14, window_bounds = array<i64: 1, 512, 128>}, {transform_indices = @transform_15, window_bounds = array<i64: 1, 9, 128>}, {transform_indices = @transform_16, window_bounds = array<i64: 1, 1, 512>}, {pipeline_mode = #tpu.pipeline_mode<synchronous>, transform_indices = @transform_17, window_bounds = array<i64: 128, 128>}, {pipeline_mode = #tpu.pipeline_mode<synchronous>, transform_indices = @transform_18, window_bounds = array<i64: 1, 128>}, {pipeline_mode = #tpu.pipeline_mode<synchronous>, transform_indices = @transform_19, window_bounds = array<i64: 128, 128>}, {pipeline_mode = #tpu.pipeline_mode<synchronous>, transform_indices = @transform_20, window_bounds = array<i64: 1, 128>}, {transform_indices = @transform_21, window_bounds = array<i64: 2, 16, 128>}]} {
    %c0_i32 = arith.constant 0 : i32
    %0 = arith.cmpi eq, %arg1, %c0_i32 : i32
    %1 = arith.extui %0 : i1 to i32
    %c0_i32_0 = arith.constant 0 : i32
    %2 = arith.cmpi ne, %1, %c0_i32_0 : i32
    scf.if %2 {
      %c0_68 = arith.constant 0 : index
      %c0_69 = arith.constant 0 : index
      %225 = vector.load %arg10[%c0_68, %c0_69] : memref<5x128xf32, #tpu.memory_space<vmem>>, vector<5x128xf32>
      %c0_70 = arith.constant 0 : index
      %c0_71 = arith.constant 0 : index
      %c0_72 = arith.constant 0 : index
      %226 = vector.load %arg3[%c0_70, %c0_71, %c0_72] : memref<2x1x32xf32, #tpu.memory_space<vmem>>, vector<2x1x32xf32>
      %227 = vector.shape_cast %226 : vector<2x1x32xf32> to vector<2x32xf32>
      %228 = arith.truncf %227 : vector<2x32xf32> to vector<2x32xbf16>
      %c0_73 = arith.constant 0 : index
      %c0_74 = arith.constant 0 : index
      %229 = vector.load %arg5[%c0_73, %c0_74] : memref<32x128xbf16, #tpu.memory_space<vmem>>, vector<32x128xbf16>
      %cst_75 = arith.constant dense<0.000000e+00> : vector<2x128xf32>
      %230 = tpu.matmul %228, %229, %cst_75 {dimension_numbers = #tpu.dot_dimension_numbers<[1], [0], [0], [1], [0, 0, 1, 1], [], []>} : vector<2x32xbf16>, vector<32x128xbf16>, vector<2x128xf32> -> vector<2x128xf32>
      %c0_76 = arith.constant 0 : index
      %c0_77 = arith.constant 0 : index
      %231 = vector.load %arg6[%c0_76, %c0_77] : memref<1x128xf32, #tpu.memory_space<vmem>>, vector<1x128xf32>
      %232 = vector.broadcast %231 : vector<1x128xf32> to vector<2x128xf32>
      %233 = arith.addf %230, %232 : vector<2x128xf32>
      %234 = arith.negf %233 : vector<2x128xf32>
      %235 = math.exp %234 : vector<2x128xf32>
      %cst_78 = arith.constant 1.000000e+00 : f32
      %236 = vector.broadcast %cst_78 : f32 to vector<2x128xf32>
      %237 = arith.addf %236, %235 : vector<2x128xf32>
      %238 = arith.divf %236, %237 : vector<2x128xf32>
      %239 = arith.mulf %233, %238 : vector<2x128xf32>
      %240 = arith.truncf %239 : vector<2x128xf32> to vector<2x128xbf16>
      %c0_79 = arith.constant 0 : index
      %c0_80 = arith.constant 0 : index
      %241 = vector.load %arg7[%c0_79, %c0_80] : memref<128x128xbf16, #tpu.memory_space<vmem>>, vector<128x128xbf16>
      %cst_81 = arith.constant dense<0.000000e+00> : vector<2x128xf32>
      %242 = tpu.matmul %240, %241, %cst_81 {dimension_numbers = #tpu.dot_dimension_numbers<[1], [0], [0], [1], [0, 0, 1, 1], [], []>} : vector<2x128xbf16>, vector<128x128xbf16>, vector<2x128xf32> -> vector<2x128xf32>
      %243 = vector.extract_strided_slice %225 {offsets = [0, 0], sizes = [1, 128], strides = [1, 1]} : vector<5x128xf32> to vector<1x128xf32>
      %244 = vector.broadcast %243 : vector<1x128xf32> to vector<2x128xf32>
      %245 = arith.addf %242, %244 : vector<2x128xf32>
      %c0_82 = arith.constant 0 : index
      %c0_83 = arith.constant 0 : index
      %c0_84 = arith.constant 0 : index
      %246 = vector.load %arg2[%c0_82, %c0_83, %c0_84] : memref<2x16x32xf32, #tpu.memory_space<vmem>>, vector<2x16x32xf32>
      %247 = vector.shape_cast %246 : vector<2x16x32xf32> to vector<32x32xf32>
      %248 = arith.truncf %247 : vector<32x32xf32> to vector<32x32xbf16>
      %c0_85 = arith.constant 0 : index
      %c0_86 = arith.constant 0 : index
      %249 = vector.load %arg8[%c0_85, %c0_86] : memref<32x128xbf16, #tpu.memory_space<vmem>>, vector<32x128xbf16>
      %cst_87 = arith.constant dense<0.000000e+00> : vector<32x128xf32>
      %250 = tpu.matmul %248, %249, %cst_87 {dimension_numbers = #tpu.dot_dimension_numbers<[1], [0], [0], [1], [0, 0, 1, 1], [], []>} : vector<32x32xbf16>, vector<32x128xbf16>, vector<32x128xf32> -> vector<32x128xf32>
      %251 = vector.extract_strided_slice %225 {offsets = [1, 0], sizes = [1, 128], strides = [1, 1]} : vector<5x128xf32> to vector<1x128xf32>
      %252 = vector.broadcast %251 : vector<1x128xf32> to vector<32x128xf32>
      %253 = arith.addf %250, %252 : vector<32x128xf32>
      %254 = math.tanh %253 : vector<32x128xf32>
      %255 = arith.truncf %254 : vector<32x128xf32> to vector<32x128xbf16>
      %c0_88 = arith.constant 0 : index
      %c0_89 = arith.constant 0 : index
      %256 = vector.load %arg9[%c0_88, %c0_89] : memref<128x128xbf16, #tpu.memory_space<vmem>>, vector<128x128xbf16>
      %cst_90 = arith.constant dense<0.000000e+00> : vector<32x128xf32>
      %257 = tpu.matmul %255, %256, %cst_90 {dimension_numbers = #tpu.dot_dimension_numbers<[1], [0], [0], [1], [0, 0, 1, 1], [], []>} : vector<32x128xbf16>, vector<128x128xbf16>, vector<32x128xf32> -> vector<32x128xf32>
      %258 = vector.extract_strided_slice %225 {offsets = [2, 0], sizes = [1, 128], strides = [1, 1]} : vector<5x128xf32> to vector<1x128xf32>
      %259 = vector.broadcast %258 : vector<1x128xf32> to vector<32x128xf32>
      %260 = arith.addf %257, %259 : vector<32x128xf32>
      %261 = vector.shape_cast %260 : vector<32x128xf32> to vector<2x16x128xf32>
      %c0_91 = arith.constant 0 : index
      %c0_92 = arith.constant 0 : index
      %262 = vector.load %arg4[%c0_91, %c0_92] : memref<16x128xf32, #tpu.memory_space<vmem>>, vector<16x128xf32>
      %263 = vector.shape_cast %262 : vector<16x128xf32> to vector<1x16x128xf32>
      %264 = vector.broadcast %263 : vector<1x16x128xf32> to vector<2x16x128xf32>
      %265 = arith.addf %261, %264 : vector<2x16x128xf32>
      %266 = vector.shape_cast %245 : vector<2x128xf32> to vector<2x1x128xf32>
      %267 = vector.broadcast %266 : vector<2x1x128xf32> to vector<2x16x128xf32>
      %268 = arith.addf %265, %267 : vector<2x16x128xf32>
      %269 = vector.extract_strided_slice %225 {offsets = [3, 0], sizes = [1, 128], strides = [1, 1]} : vector<5x128xf32> to vector<1x128xf32>
      %270 = vector.extract_strided_slice %225 {offsets = [4, 0], sizes = [1, 128], strides = [1, 1]} : vector<5x128xf32> to vector<1x128xf32>
      %cst_93 = arith.constant dense<0.000000e+00> : vector<2x16xf32>
      %271 = vector.multi_reduction <add>, %268, %cst_93 [2] : vector<2x16x128xf32> to vector<2x16xf32>
      %272 = vector.shape_cast %271 : vector<2x16xf32> to vector<2x16x1xf32>
      %cst_94 = arith.constant 1.280000e+02 : f32
      %273 = vector.broadcast %cst_94 : f32 to vector<2x16x1xf32>
      %274 = arith.divf %272, %273 : vector<2x16x1xf32>
      %275 = vector.broadcast %274 : vector<2x16x1xf32> to vector<2x16x128xf32>
      %276 = arith.subf %268, %275 : vector<2x16x128xf32>
      %277 = arith.mulf %276, %276 : vector<2x16x128xf32>
      %cst_95 = arith.constant dense<0.000000e+00> : vector<2x16xf32>
      %278 = vector.multi_reduction <add>, %277, %cst_95 [2] : vector<2x16x128xf32> to vector<2x16xf32>
      %279 = vector.shape_cast %278 : vector<2x16xf32> to vector<2x16x1xf32>
      %cst_96 = arith.constant 1.280000e+02 : f32
      %280 = vector.broadcast %cst_96 : f32 to vector<2x16x1xf32>
      %281 = arith.divf %279, %280 : vector<2x16x1xf32>
      %282 = vector.broadcast %274 : vector<2x16x1xf32> to vector<2x16x128xf32>
      %283 = arith.subf %268, %282 : vector<2x16x128xf32>
      %cst_97 = arith.constant 9.99999996E-13 : f32
      %284 = vector.broadcast %cst_97 : f32 to vector<2x16x1xf32>
      %285 = arith.addf %281, %284 : vector<2x16x1xf32>
      %286 = math.rsqrt %285 : vector<2x16x1xf32>
      %287 = vector.broadcast %286 : vector<2x16x1xf32> to vector<2x16x128xf32>
      %288 = arith.mulf %283, %287 : vector<2x16x128xf32>
      %289 = vector.shape_cast %269 : vector<1x128xf32> to vector<1x1x128xf32>
      %290 = vector.broadcast %289 : vector<1x1x128xf32> to vector<2x16x128xf32>
      %291 = arith.mulf %288, %290 : vector<2x16x128xf32>
      %292 = vector.shape_cast %270 : vector<1x128xf32> to vector<1x1x128xf32>
      %293 = vector.broadcast %292 : vector<1x1x128xf32> to vector<2x16x128xf32>
      %294 = arith.addf %291, %293 : vector<2x16x128xf32>
      %295 = vector.shape_cast %294 : vector<2x16x128xf32> to vector<32x128xf32>
      %296 = arith.truncf %295 : vector<32x128xf32> to vector<32x128xbf16>
      %c0_98 = arith.constant 0 : index
      %c0_99 = arith.constant 0 : index
      %297 = vector.load %arg24[%c0_98, %c0_99] : memref<32x128xbf16, #tpu.memory_space<vmem>>, vector<32x128xbf16>
      tpu.vector_store %arg24[%c0_98, %c0_99], %296 {strides = array<i32>} : memref<32x128xbf16, #tpu.memory_space<vmem>>, vector<32x128xbf16>,
    } else {
    }
    %c0 = arith.constant 0 : index
    %c0_1 = arith.constant 0 : index
    %3 = vector.load %arg24[%c0, %c0_1] : memref<32x128xbf16, #tpu.memory_space<vmem>>, vector<32x128xbf16>
    %4 = arith.extf %3 : vector<32x128xbf16> to vector<32x128xf32>
    %c0_2 = arith.constant 0 : index
    %c0_3 = arith.constant 0 : index
    %c0_4 = arith.constant 0 : index
    %5 = vector.load %arg17[%c0_2, %c0_3, %c0_4] : memref<1x9x128xf32, #tpu.memory_space<vmem>>, vector<1x9x128xf32>
    %6 = vector.shape_cast %5 : vector<1x9x128xf32> to vector<9x128xf32>
    %c0_5 = arith.constant 0 : index
    %c0_6 = arith.constant 0 : index
    %c0_7 = arith.constant 0 : index
    %7 = vector.load %arg11[%c0_5, %c0_6, %c0_7] : memref<1x128x128xbf16, #tpu.memory_space<vmem>>, vector<1x128x128xbf16>
    %8 = vector.shape_cast %7 : vector<1x128x128xbf16> to vector<128x128xbf16>
    %cst = arith.constant dense<0.000000e+00> : vector<32x128xf32>
    %9 = tpu.matmul %3, %8, %cst {dimension_numbers = #tpu.dot_dimension_numbers<[1], [0], [0], [1], [0, 0, 1, 1], [], []>} : vector<32x128xbf16>, vector<128x128xbf16>, vector<32x128xf32> -> vector<32x128xf32>
    %10 = vector.extract_strided_slice %6 {offsets = [0, 0], sizes = [1, 128], strides = [1, 1]} : vector<9x128xf32> to vector<1x128xf32>
    %11 = vector.broadcast %10 : vector<1x128xf32> to vector<32x128xf32>
    %12 = arith.addf %9, %11 : vector<32x128xf32>
    %c0_8 = arith.constant 0 : index
    %c0_9 = arith.constant 0 : index
    %c0_10 = arith.constant 0 : index
    %13 = vector.load %arg12[%c0_8, %c0_9, %c0_10] : memref<1x128x128xbf16, #tpu.memory_space<vmem>>, vector<1x128x128xbf16>
    %14 = vector.shape_cast %13 : vector<1x128x128xbf16> to vector<128x128xbf16>
    %cst_11 = arith.constant dense<0.000000e+00> : vector<32x128xf32>
    %15 = tpu.matmul %3, %14, %cst_11 {dimension_numbers = #tpu.dot_dimension_numbers<[1], [0], [0], [1], [0, 0, 1, 1], [], []>} : vector<32x128xbf16>, vector<128x128xbf16>, vector<32x128xf32> -> vector<32x128xf32>
    %16 = vector.extract_strided_slice %6 {offsets = [1, 0], sizes = [1, 128], strides = [1, 1]} : vector<9x128xf32> to vector<1x128xf32>
    %17 = vector.broadcast %16 : vector<1x128xf32> to vector<32x128xf32>
    %18 = arith.addf %15, %17 : vector<32x128xf32>
    %c0_12 = arith.constant 0 : index
    %c0_13 = arith.constant 0 : index
    %c0_14 = arith.constant 0 : index
    %19 = vector.load %arg13[%c0_12, %c0_13, %c0_14] : memref<1x128x128xbf16, #tpu.memory_space<vmem>>, vector<1x128x128xbf16>
    %20 = vector.shape_cast %19 : vector<1x128x128xbf16> to vector<128x128xbf16>
    %cst_15 = arith.constant dense<0.000000e+00> : vector<32x128xf32>
    %21 = tpu.matmul %3, %20, %cst_15 {dimension_numbers = #tpu.dot_dimension_numbers<[1], [0], [0], [1], [0, 0, 1, 1], [], []>} : vector<32x128xbf16>, vector<128x128xbf16>, vector<32x128xf32> -> vector<32x128xf32>
    %22 = vector.extract_strided_slice %6 {offsets = [2, 0], sizes = [1, 128], strides = [1, 1]} : vector<9x128xf32> to vector<1x128xf32>
    %23 = vector.broadcast %22 : vector<1x128xf32> to vector<32x128xf32>
    %24 = arith.addf %21, %23 : vector<32x128xf32>
    %25 = vector.shape_cast %12 : vector<32x128xf32> to vector<2x16x4x32xf32>
    %26 = vector.shape_cast %18 : vector<32x128xf32> to vector<2x16x4x32xf32>
    %27 = vector.shape_cast %24 : vector<32x128xf32> to vector<2x16x4x32xf32>
    %c0_16 = arith.constant 0 : index
    %c0_17 = arith.constant 0 : index
    %c0_18 = arith.constant 0 : index
    %28 = vector.load %arg14[%c0_16, %c0_17, %c0_18] : memref<1x128x128xbf16, #tpu.memory_space<vmem>>, vector<1x128x128xbf16>
    %29 = vector.shape_cast %28 : vector<1x128x128xbf16> to vector<128x128xbf16>
    %cst_19 = arith.constant 0.000000e+00 : f32
    %30 = vector.broadcast %cst_19 : f32 to vector<32x128xf32>
    %31 = vector.extract_strided_slice %25 {offsets = [0, 0, 0, 0], sizes = [2, 16, 1, 32], strides = [1, 1, 1, 1]} : vector<2x16x4x32xf32> to vector<2x16x1x32xf32>
    %32 = vector.shape_cast %31 : vector<2x16x1x32xf32> to vector<2x16x32xf32>
    %33 = arith.truncf %32 : vector<2x16x32xf32> to vector<2x16x32xbf16>
    %34 = vector.extract_strided_slice %26 {offsets = [0, 0, 0, 0], sizes = [2, 16, 1, 32], strides = [1, 1, 1, 1]} : vector<2x16x4x32xf32> to vector<2x16x1x32xf32>
    %35 = vector.shape_cast %34 : vector<2x16x1x32xf32> to vector<2x16x32xf32>
    %36 = arith.truncf %35 : vector<2x16x32xf32> to vector<2x16x32xbf16>
    %37 = vector.extract_strided_slice %27 {offsets = [0, 0, 0, 0], sizes = [2, 16, 1, 32], strides = [1, 1, 1, 1]} : vector<2x16x4x32xf32> to vector<2x16x1x32xf32>
    %38 = vector.shape_cast %37 : vector<2x16x1x32xf32> to vector<2x16x32xf32>
    %39 = arith.truncf %38 : vector<2x16x32xf32> to vector<2x16x32xbf16>
    "tpu.trace_start"() <{level = 10 : i32, message = "gqd,gkd->gqk"}> : () -> ()
    %cst_20 = arith.constant dense<0.000000e+00> : vector<2x16x16xf32>
    %40 = tpu.matmul %33, %36, %cst_20 {dimension_numbers = #tpu.dot_dimension_numbers<[2], [2], [1], [1], [0, 0, 0, 1, 1, 1], [0], [0]>} : vector<2x16x32xbf16>, vector<2x16x32xbf16>, vector<2x16x16xf32> -> vector<2x16x16xf32>
    "tpu.trace_stop"() : () -> ()
    %cst_21 = arith.constant dense<0xFF800000> : vector<2x16xf32>
    %41 = vector.multi_reduction <maximumf>, %40, %cst_21 [2] : vector<2x16x16xf32> to vector<2x16xf32>
    %42 = vector.shape_cast %41 : vector<2x16xf32> to vector<2x16x1xf32>
    %43 = vector.broadcast %42 : vector<2x16x1xf32> to vector<2x16x16xf32>
    %44 = arith.subf %40, %43 : vector<2x16x16xf32>
    %45 = math.exp %44 : vector<2x16x16xf32>
    %cst_22 = arith.constant dense<0.000000e+00> : vector<2x16xf32>
    %46 = vector.multi_reduction <add>, %45, %cst_22 [2] : vector<2x16x16xf32> to vector<2x16xf32>
    %47 = vector.shape_cast %46 : vector<2x16xf32> to vector<2x16x1xf32>
    %48 = tpu.reciprocal %47 {approx = true} : vector<2x16x1xf32> -> vector<2x16x1xf32>
    %49 = vector.broadcast %48 : vector<2x16x1xf32> to vector<2x16x16xf32>
    %50 = arith.mulf %45, %49 : vector<2x16x16xf32>
    %51 = arith.truncf %50 : vector<2x16x16xf32> to vector<2x16x16xbf16>
    "tpu.trace_start"() <{level = 10 : i32, message = "gqk,gkd->gqd"}> : () -> ()
    %cst_23 = arith.constant dense<0.000000e+00> : vector<2x16x32xf32>
    %52 = tpu.matmul %51, %39, %cst_23 {dimension_numbers = #tpu.dot_dimension_numbers<[2], [1], [1], [2], [0, 0, 0, 1, 1, 2], [0], [0]>} : vector<2x16x16xbf16>, vector<2x16x32xbf16>, vector<2x16x32xf32> -> vector<2x16x32xf32>
    "tpu.trace_stop"() : () -> ()
    %53 = vector.shape_cast %52 : vector<2x16x32xf32> to vector<32x32xf32>
    %54 = arith.truncf %53 : vector<32x32xf32> to vector<32x32xbf16>
    %55 = vector.extract_strided_slice %29 {offsets = [0, 0], sizes = [32, 128], strides = [1, 1]} : vector<128x128xbf16> to vector<32x128xbf16>
    %cst_24 = arith.constant dense<0.000000e+00> : vector<32x128xf32>
    %56 = tpu.matmul %54, %55, %cst_24 {dimension_numbers = #tpu.dot_dimension_numbers<[1], [0], [0], [1], [0, 0, 1, 1], [], []>} : vector<32x32xbf16>, vector<32x128xbf16>, vector<32x128xf32> -> vector<32x128xf32>
    %57 = arith.addf %30, %56 : vector<32x128xf32>
    %58 = vector.extract_strided_slice %25 {offsets = [0, 0, 1, 0], sizes = [2, 16, 1, 32], strides = [1, 1, 1, 1]} : vector<2x16x4x32xf32> to vector<2x16x1x32xf32>
    %59 = vector.shape_cast %58 : vector<2x16x1x32xf32> to vector<2x16x32xf32>
    %60 = arith.truncf %59 : vector<2x16x32xf32> to vector<2x16x32xbf16>
    %61 = vector.extract_strided_slice %26 {offsets = [0, 0, 1, 0], sizes = [2, 16, 1, 32], strides = [1, 1, 1, 1]} : vector<2x16x4x32xf32> to vector<2x16x1x32xf32>
    %62 = vector.shape_cast %61 : vector<2x16x1x32xf32> to vector<2x16x32xf32>
    %63 = arith.truncf %62 : vector<2x16x32xf32> to vector<2x16x32xbf16>
    %64 = vector.extract_strided_slice %27 {offsets = [0, 0, 1, 0], sizes = [2, 16, 1, 32], strides = [1, 1, 1, 1]} : vector<2x16x4x32xf32> to vector<2x16x1x32xf32>
    %65 = vector.shape_cast %64 : vector<2x16x1x32xf32> to vector<2x16x32xf32>
    %66 = arith.truncf %65 : vector<2x16x32xf32> to vector<2x16x32xbf16>
    "tpu.trace_start"() <{level = 10 : i32, message = "gqd,gkd->gqk"}> : () -> ()
    %cst_25 = arith.constant dense<0.000000e+00> : vector<2x16x16xf32>
    %67 = tpu.matmul %60, %63, %cst_25 {dimension_numbers = #tpu.dot_dimension_numbers<[2], [2], [1], [1], [0, 0, 0, 1, 1, 1], [0], [0]>} : vector<2x16x32xbf16>, vector<2x16x32xbf16>, vector<2x16x16xf32> -> vector<2x16x16xf32>
    "tpu.trace_stop"() : () -> ()
    %cst_26 = arith.constant dense<0xFF800000> : vector<2x16xf32>
    %68 = vector.multi_reduction <maximumf>, %67, %cst_26 [2] : vector<2x16x16xf32> to vector<2x16xf32>
    %69 = vector.shape_cast %68 : vector<2x16xf32> to vector<2x16x1xf32>
    %70 = vector.broadcast %69 : vector<2x16x1xf32> to vector<2x16x16xf32>
    %71 = arith.subf %67, %70 : vector<2x16x16xf32>
    %72 = math.exp %71 : vector<2x16x16xf32>
    %cst_27 = arith.constant dense<0.000000e+00> : vector<2x16xf32>
    %73 = vector.multi_reduction <add>, %72, %cst_27 [2] : vector<2x16x16xf32> to vector<2x16xf32>
    %74 = vector.shape_cast %73 : vector<2x16xf32> to vector<2x16x1xf32>
    %75 = tpu.reciprocal %74 {approx = true} : vector<2x16x1xf32> -> vector<2x16x1xf32>
    %76 = vector.broadcast %75 : vector<2x16x1xf32> to vector<2x16x16xf32>
    %77 = arith.mulf %72, %76 : vector<2x16x16xf32>
    %78 = arith.truncf %77 : vector<2x16x16xf32> to vector<2x16x16xbf16>
    "tpu.trace_start"() <{level = 10 : i32, message = "gqk,gkd->gqd"}> : () -> ()
    %cst_28 = arith.constant dense<0.000000e+00> : vector<2x16x32xf32>
    %79 = tpu.matmul %78, %66, %cst_28 {dimension_numbers = #tpu.dot_dimension_numbers<[2], [1], [1], [2], [0, 0, 0, 1, 1, 2], [0], [0]>} : vector<2x16x16xbf16>, vector<2x16x32xbf16>, vector<2x16x32xf32> -> vector<2x16x32xf32>
    "tpu.trace_stop"() : () -> ()
    %80 = vector.shape_cast %79 : vector<2x16x32xf32> to vector<32x32xf32>
    %81 = arith.truncf %80 : vector<32x32xf32> to vector<32x32xbf16>
    %82 = vector.extract_strided_slice %29 {offsets = [32, 0], sizes = [32, 128], strides = [1, 1]} : vector<128x128xbf16> to vector<32x128xbf16>
    %cst_29 = arith.constant dense<0.000000e+00> : vector<32x128xf32>
    %83 = tpu.matmul %81, %82, %cst_29 {dimension_numbers = #tpu.dot_dimension_numbers<[1], [0], [0], [1], [0, 0, 1, 1], [], []>} : vector<32x32xbf16>, vector<32x128xbf16>, vector<32x128xf32> -> vector<32x128xf32>
    %84 = arith.addf %57, %83 : vector<32x128xf32>
    %85 = vector.extract_strided_slice %25 {offsets = [0, 0, 2, 0], sizes = [2, 16, 1, 32], strides = [1, 1, 1, 1]} : vector<2x16x4x32xf32> to vector<2x16x1x32xf32>
    %86 = vector.shape_cast %85 : vector<2x16x1x32xf32> to vector<2x16x32xf32>
    %87 = arith.truncf %86 : vector<2x16x32xf32> to vector<2x16x32xbf16>
    %88 = vector.extract_strided_slice %26 {offsets = [0, 0, 2, 0], sizes = [2, 16, 1, 32], strides = [1, 1, 1, 1]} : vector<2x16x4x32xf32> to vector<2x16x1x32xf32>
    %89 = vector.shape_cast %88 : vector<2x16x1x32xf32> to vector<2x16x32xf32>
    %90 = arith.truncf %89 : vector<2x16x32xf32> to vector<2x16x32xbf16>
    %91 = vector.extract_strided_slice %27 {offsets = [0, 0, 2, 0], sizes = [2, 16, 1, 32], strides = [1, 1, 1, 1]} : vector<2x16x4x32xf32> to vector<2x16x1x32xf32>
    %92 = vector.shape_cast %91 : vector<2x16x1x32xf32> to vector<2x16x32xf32>
    %93 = arith.truncf %92 : vector<2x16x32xf32> to vector<2x16x32xbf16>
    "tpu.trace_start"() <{level = 10 : i32, message = "gqd,gkd->gqk"}> : () -> ()
    %cst_30 = arith.constant dense<0.000000e+00> : vector<2x16x16xf32>
    %94 = tpu.matmul %87, %90, %cst_30 {dimension_numbers = #tpu.dot_dimension_numbers<[2], [2], [1], [1], [0, 0, 0, 1, 1, 1], [0], [0]>} : vector<2x16x32xbf16>, vector<2x16x32xbf16>, vector<2x16x16xf32> -> vector<2x16x16xf32>
    "tpu.trace_stop"() : () -> ()
    %cst_31 = arith.constant dense<0xFF800000> : vector<2x16xf32>
    %95 = vector.multi_reduction <maximumf>, %94, %cst_31 [2] : vector<2x16x16xf32> to vector<2x16xf32>
    %96 = vector.shape_cast %95 : vector<2x16xf32> to vector<2x16x1xf32>
    %97 = vector.broadcast %96 : vector<2x16x1xf32> to vector<2x16x16xf32>
    %98 = arith.subf %94, %97 : vector<2x16x16xf32>
    %99 = math.exp %98 : vector<2x16x16xf32>
    %cst_32 = arith.constant dense<0.000000e+00> : vector<2x16xf32>
    %100 = vector.multi_reduction <add>, %99, %cst_32 [2] : vector<2x16x16xf32> to vector<2x16xf32>
    %101 = vector.shape_cast %100 : vector<2x16xf32> to vector<2x16x1xf32>
    %102 = tpu.reciprocal %101 {approx = true} : vector<2x16x1xf32> -> vector<2x16x1xf32>
    %103 = vector.broadcast %102 : vector<2x16x1xf32> to vector<2x16x16xf32>
    %104 = arith.mulf %99, %103 : vector<2x16x16xf32>
    %105 = arith.truncf %104 : vector<2x16x16xf32> to vector<2x16x16xbf16>
    "tpu.trace_start"() <{level = 10 : i32, message = "gqk,gkd->gqd"}> : () -> ()
    %cst_33 = arith.constant dense<0.000000e+00> : vector<2x16x32xf32>
    %106 = tpu.matmul %105, %93, %cst_33 {dimension_numbers = #tpu.dot_dimension_numbers<[2], [1], [1], [2], [0, 0, 0, 1, 1, 2], [0], [0]>} : vector<2x16x16xbf16>, vector<2x16x32xbf16>, vector<2x16x32xf32> -> vector<2x16x32xf32>
    "tpu.trace_stop"() : () -> ()
    %107 = vector.shape_cast %106 : vector<2x16x32xf32> to vector<32x32xf32>
    %108 = arith.truncf %107 : vector<32x32xf32> to vector<32x32xbf16>
    %109 = vector.extract_strided_slice %29 {offsets = [64, 0], sizes = [32, 128], strides = [1, 1]} : vector<128x128xbf16> to vector<32x128xbf16>
    %cst_34 = arith.constant dense<0.000000e+00> : vector<32x128xf32>
    %110 = tpu.matmul %108, %109, %cst_34 {dimension_numbers = #tpu.dot_dimension_numbers<[1], [0], [0], [1], [0, 0, 1, 1], [], []>} : vector<32x32xbf16>, vector<32x128xbf16>, vector<32x128xf32> -> vector<32x128xf32>
    %111 = arith.addf %84, %110 : vector<32x128xf32>
    %112 = vector.extract_strided_slice %25 {offsets = [0, 0, 3, 0], sizes = [2, 16, 1, 32], strides = [1, 1, 1, 1]} : vector<2x16x4x32xf32> to vector<2x16x1x32xf32>
    %113 = vector.shape_cast %112 : vector<2x16x1x32xf32> to vector<2x16x32xf32>
    %114 = arith.truncf %113 : vector<2x16x32xf32> to vector<2x16x32xbf16>
    %115 = vector.extract_strided_slice %26 {offsets = [0, 0, 3, 0], sizes = [2, 16, 1, 32], strides = [1, 1, 1, 1]} : vector<2x16x4x32xf32> to vector<2x16x1x32xf32>
    %116 = vector.shape_cast %115 : vector<2x16x1x32xf32> to vector<2x16x32xf32>
    %117 = arith.truncf %116 : vector<2x16x32xf32> to vector<2x16x32xbf16>
    %118 = vector.extract_strided_slice %27 {offsets = [0, 0, 3, 0], sizes = [2, 16, 1, 32], strides = [1, 1, 1, 1]} : vector<2x16x4x32xf32> to vector<2x16x1x32xf32>
    %119 = vector.shape_cast %118 : vector<2x16x1x32xf32> to vector<2x16x32xf32>
    %120 = arith.truncf %119 : vector<2x16x32xf32> to vector<2x16x32xbf16>
    "tpu.trace_start"() <{level = 10 : i32, message = "gqd,gkd->gqk"}> : () -> ()
    %cst_35 = arith.constant dense<0.000000e+00> : vector<2x16x16xf32>
    %121 = tpu.matmul %114, %117, %cst_35 {dimension_numbers = #tpu.dot_dimension_numbers<[2], [2], [1], [1], [0, 0, 0, 1, 1, 1], [0], [0]>} : vector<2x16x32xbf16>, vector<2x16x32xbf16>, vector<2x16x16xf32> -> vector<2x16x16xf32>
    "tpu.trace_stop"() : () -> ()
    %cst_36 = arith.constant dense<0xFF800000> : vector<2x16xf32>
    %122 = vector.multi_reduction <maximumf>, %121, %cst_36 [2] : vector<2x16x16xf32> to vector<2x16xf32>
    %123 = vector.shape_cast %122 : vector<2x16xf32> to vector<2x16x1xf32>
    %124 = vector.broadcast %123 : vector<2x16x1xf32> to vector<2x16x16xf32>
    %125 = arith.subf %121, %124 : vector<2x16x16xf32>
    %126 = math.exp %125 : vector<2x16x16xf32>
    %cst_37 = arith.constant dense<0.000000e+00> : vector<2x16xf32>
    %127 = vector.multi_reduction <add>, %126, %cst_37 [2] : vector<2x16x16xf32> to vector<2x16xf32>
    %128 = vector.shape_cast %127 : vector<2x16xf32> to vector<2x16x1xf32>
    %129 = tpu.reciprocal %128 {approx = true} : vector<2x16x1xf32> -> vector<2x16x1xf32>
    %130 = vector.broadcast %129 : vector<2x16x1xf32> to vector<2x16x16xf32>
    %131 = arith.mulf %126, %130 : vector<2x16x16xf32>
    %132 = arith.truncf %131 : vector<2x16x16xf32> to vector<2x16x16xbf16>
    "tpu.trace_start"() <{level = 10 : i32, message = "gqk,gkd->gqd"}> : () -> ()
    %cst_38 = arith.constant dense<0.000000e+00> : vector<2x16x32xf32>
    %133 = tpu.matmul %132, %120, %cst_38 {dimension_numbers = #tpu.dot_dimension_numbers<[2], [1], [1], [2], [0, 0, 0, 1, 1, 2], [0], [0]>} : vector<2x16x16xbf16>, vector<2x16x32xbf16>, vector<2x16x32xf32> -> vector<2x16x32xf32>
    "tpu.trace_stop"() : () -> ()
    %134 = vector.shape_cast %133 : vector<2x16x32xf32> to vector<32x32xf32>
    %135 = arith.truncf %134 : vector<32x32xf32> to vector<32x32xbf16>
    %136 = vector.extract_strided_slice %29 {offsets = [96, 0], sizes = [32, 128], strides = [1, 1]} : vector<128x128xbf16> to vector<32x128xbf16>
    %cst_39 = arith.constant dense<0.000000e+00> : vector<32x128xf32>
    %137 = tpu.matmul %135, %136, %cst_39 {dimension_numbers = #tpu.dot_dimension_numbers<[1], [0], [0], [1], [0, 0, 1, 1], [], []>} : vector<32x32xbf16>, vector<32x128xbf16>, vector<32x128xf32> -> vector<32x128xf32>
    %138 = arith.addf %111, %137 : vector<32x128xf32>
    %139 = vector.extract_strided_slice %6 {offsets = [3, 0], sizes = [1, 128], strides = [1, 1]} : vector<9x128xf32> to vector<1x128xf32>
    %140 = vector.broadcast %139 : vector<1x128xf32> to vector<32x128xf32>
    %141 = arith.addf %138, %140 : vector<32x128xf32>
    %142 = arith.addf %141, %4 : vector<32x128xf32>
    %143 = vector.extract_strided_slice %6 {offsets = [4, 0], sizes = [1, 128], strides = [1, 1]} : vector<9x128xf32> to vector<1x128xf32>
    %144 = vector.extract_strided_slice %6 {offsets = [5, 0], sizes = [1, 128], strides = [1, 1]} : vector<9x128xf32> to vector<1x128xf32>
    %cst_40 = arith.constant dense<0.000000e+00> : vector<32xf32>
    %145 = vector.multi_reduction <add>, %142, %cst_40 [1] : vector<32x128xf32> to vector<32xf32>
    %146 = vector.shape_cast %145 : vector<32xf32> to vector<32x1xf32>
    %cst_41 = arith.constant 1.280000e+02 : f32
    %147 = vector.broadcast %cst_41 : f32 to vector<32x1xf32>
    %148 = arith.divf %146, %147 : vector<32x1xf32>
    %149 = vector.broadcast %148 : vector<32x1xf32> to vector<32x128xf32>
    %150 = arith.subf %142, %149 : vector<32x128xf32>
    %151 = arith.mulf %150, %150 : vector<32x128xf32>
    %cst_42 = arith.constant dense<0.000000e+00> : vector<32xf32>
    %152 = vector.multi_reduction <add>, %151, %cst_42 [1] : vector<32x128xf32> to vector<32xf32>
    %153 = vector.shape_cast %152 : vector<32xf32> to vector<32x1xf32>
    %cst_43 = arith.constant 1.280000e+02 : f32
    %154 = vector.broadcast %cst_43 : f32 to vector<32x1xf32>
    %155 = arith.divf %153, %154 : vector<32x1xf32>
    %156 = vector.broadcast %148 : vector<32x1xf32> to vector<32x128xf32>
    %157 = arith.subf %142, %156 : vector<32x128xf32>
    %cst_44 = arith.constant 9.99999996E-13 : f32
    %158 = vector.broadcast %cst_44 : f32 to vector<32x1xf32>
    %159 = arith.addf %155, %158 : vector<32x1xf32>
    %160 = math.rsqrt %159 : vector<32x1xf32>
    %161 = vector.broadcast %160 : vector<32x1xf32> to vector<32x128xf32>
    %162 = arith.mulf %157, %161 : vector<32x128xf32>
    %163 = vector.broadcast %143 : vector<1x128xf32> to vector<32x128xf32>
    %164 = arith.mulf %162, %163 : vector<32x128xf32>
    %165 = vector.broadcast %144 : vector<1x128xf32> to vector<32x128xf32>
    %166 = arith.addf %164, %165 : vector<32x128xf32>
    %167 = arith.truncf %166 : vector<32x128xf32> to vector<32x128xbf16>
    %c0_45 = arith.constant 0 : index
    %c0_46 = arith.constant 0 : index
    %c0_47 = arith.constant 0 : index
    %168 = vector.load %arg15[%c0_45, %c0_46, %c0_47] : memref<1x128x512xbf16, #tpu.memory_space<vmem>>, vector<1x128x512xbf16>
    %169 = vector.shape_cast %168 : vector<1x128x512xbf16> to vector<128x512xbf16>
    %cst_48 = arith.constant dense<0.000000e+00> : vector<32x512xf32>
    %170 = tpu.matmul %167, %169, %cst_48 {dimension_numbers = #tpu.dot_dimension_numbers<[1], [0], [0], [1], [0, 0, 1, 1], [], []>} : vector<32x128xbf16>, vector<128x512xbf16>, vector<32x512xf32> -> vector<32x512xf32>
    %c0_49 = arith.constant 0 : index
    %c0_50 = arith.constant 0 : index
    %c0_51 = arith.constant 0 : index
    %171 = vector.load %arg18[%c0_49, %c0_50, %c0_51] : memref<1x1x512xf32, #tpu.memory_space<vmem>>, vector<1x1x512xf32>
    %172 = vector.shape_cast %171 : vector<1x1x512xf32> to vector<1x512xf32>
    %173 = vector.broadcast %172 : vector<1x512xf32> to vector<32x512xf32>
    %174 = arith.addf %170, %173 : vector<32x512xf32>
    %cst_52 = arith.constant 5.000000e-01 : f32
    %175 = vector.broadcast %cst_52 : f32 to vector<32x512xf32>
    %176 = arith.mulf %175, %174 : vector<32x512xf32>
    %cst_53 = arith.constant 4.471500e-02 : f32
    %177 = vector.broadcast %cst_53 : f32 to vector<32x512xf32>
    %178 = arith.mulf %177, %174 : vector<32x512xf32>
    %179 = arith.mulf %178, %174 : vector<32x512xf32>
    %180 = arith.mulf %179, %174 : vector<32x512xf32>
    %181 = arith.addf %174, %180 : vector<32x512xf32>
    %cst_54 = arith.constant 0.797884583 : f32
    %182 = vector.broadcast %cst_54 : f32 to vector<32x512xf32>
    %183 = arith.mulf %182, %181 : vector<32x512xf32>
    %184 = math.tanh %183 : vector<32x512xf32>
    %cst_55 = arith.constant 1.000000e+00 : f32
    %185 = vector.broadcast %cst_55 : f32 to vector<32x512xf32>
    %186 = arith.addf %185, %184 : vector<32x512xf32>
    %187 = arith.mulf %176, %186 : vector<32x512xf32>
    %188 = arith.truncf %187 : vector<32x512xf32> to vector<32x512xbf16>
    %c0_56 = arith.constant 0 : index
    %c0_57 = arith.constant 0 : index
    %c0_58 = arith.constant 0 : index
    %189 = vector.load %arg16[%c0_56, %c0_57, %c0_58] : memref<1x512x128xbf16, #tpu.memory_space<vmem>>, vector<1x512x128xbf16>
    %190 = vector.shape_cast %189 : vector<1x512x128xbf16> to vector<512x128xbf16>
    %cst_59 = arith.constant dense<0.000000e+00> : vector<32x128xf32>
    %191 = tpu.matmul %188, %190, %cst_59 {dimension_numbers = #tpu.dot_dimension_numbers<[1], [0], [0], [1], [0, 0, 1, 1], [], []>} : vector<32x512xbf16>, vector<512x128xbf16>, vector<32x128xf32> -> vector<32x128xf32>
    %192 = vector.extract_strided_slice %6 {offsets = [6, 0], sizes = [1, 128], strides = [1, 1]} : vector<9x128xf32> to vector<1x128xf32>
    %193 = vector.broadcast %192 : vector<1x128xf32> to vector<32x128xf32>
    %194 = arith.addf %191, %193 : vector<32x128xf32>
    %195 = arith.addf %194, %166 : vector<32x128xf32>
    %196 = vector.extract_strided_slice %6 {offsets = [7, 0], sizes = [1, 128], strides = [1, 1]} : vector<9x128xf32> to vector<1x128xf32>
    %197 = vector.extract_strided_slice %6 {offsets = [8, 0], sizes = [1, 128], strides = [1, 1]} : vector<9x128xf32> to vector<1x128xf32>
    %cst_60 = arith.constant dense<0.000000e+00> : vector<32xf32>
    %198 = vector.multi_reduction <add>, %195, %cst_60 [1] : vector<32x128xf32> to vector<32xf32>
    %199 = vector.shape_cast %198 : vector<32xf32> to vector<32x1xf32>
    %cst_61 = arith.constant 1.280000e+02 : f32
    %200 = vector.broadcast %cst_61 : f32 to vector<32x1xf32>
    %201 = arith.divf %199, %200 : vector<32x1xf32>
    %202 = vector.broadcast %201 : vector<32x1xf32> to vector<32x128xf32>
    %203 = arith.subf %195, %202 : vector<32x128xf32>
    %204 = arith.mulf %203, %203 : vector<32x128xf32>
    %cst_62 = arith.constant dense<0.000000e+00> : vector<32xf32>
    %205 = vector.multi_reduction <add>, %204, %cst_62 [1] : vector<32x128xf32> to vector<32xf32>
    %206 = vector.shape_cast %205 : vector<32xf32> to vector<32x1xf32>
    %cst_63 = arith.constant 1.280000e+02 : f32
    %207 = vector.broadcast %cst_63 : f32 to vector<32x1xf32>
    %208 = arith.divf %206, %207 : vector<32x1xf32>
    %209 = vector.broadcast %201 : vector<32x1xf32> to vector<32x128xf32>
    %210 = arith.subf %195, %209 : vector<32x128xf32>
    %cst_64 = arith.constant 9.99999996E-13 : f32
    %211 = vector.broadcast %cst_64 : f32 to vector<32x1xf32>
    %212 = arith.addf %208, %211 : vector<32x1xf32>
    %213 = math.rsqrt %212 : vector<32x1xf32>
    %214 = vector.broadcast %213 : vector<32x1xf32> to vector<32x128xf32>
    %215 = arith.mulf %210, %214 : vector<32x128xf32>
    %216 = vector.broadcast %196 : vector<1x128xf32> to vector<32x128xf32>
    %217 = arith.mulf %215, %216 : vector<32x128xf32>
    %218 = vector.broadcast %197 : vector<1x128xf32> to vector<32x128xf32>
    %219 = arith.addf %217, %218 : vector<32x128xf32>
    %220 = arith.truncf %219 : vector<32x128xf32> to vector<32x128xbf16>
    %c0_65 = arith.constant 0 : index
    %c0_66 = arith.constant 0 : index
    %221 = vector.load %arg24[%c0_65, %c0_66] : memref<32x128xbf16, #tpu.memory_space<vmem>>, vector<32x128xbf16>
    tpu.vector_store %arg24[%c0_65, %c0_66], %220 {strides = array<i32>} : memref<32x128xbf16, #tpu.memory_space<vmem>>, vector<32x128xbf16>,
    %c1_i32 = arith.constant 1 : i32
    %222 = arith.cmpi eq, %arg1, %c1_i32 : i32
    %223 = arith.extui %222 : i1 to i32
    %c0_i32_67 = arith.constant 0 : i32
    %224 = arith.cmpi ne, %223, %c0_i32_67 : i32
    scf.if %224 {
      %225 = arith.truncf %219 : vector<32x128xf32> to vector<32x128xbf16>
      %c0_68 = arith.constant 0 : index
      %c0_69 = arith.constant 0 : index
      %226 = vector.load %arg19[%c0_68, %c0_69] : memref<128x128xbf16, #tpu.memory_space<vmem>>, vector<128x128xbf16>
      %cst_70 = arith.constant dense<0.000000e+00> : vector<32x128xf32>
      %227 = tpu.matmul %225, %226, %cst_70 {dimension_numbers = #tpu.dot_dimension_numbers<[1], [0], [0], [1], [0, 0, 1, 1], [], []>} : vector<32x128xbf16>, vector<128x128xbf16>, vector<32x128xf32> -> vector<32x128xf32>
      %c0_71 = arith.constant 0 : index
      %c0_72 = arith.constant 0 : index
      %228 = vector.load %arg20[%c0_71, %c0_72] : memref<1x128xf32, #tpu.memory_space<vmem>>, vector<1x128xf32>
      %229 = vector.broadcast %228 : vector<1x128xf32> to vector<32x128xf32>
      %230 = arith.addf %227, %229 : vector<32x128xf32>
      %231 = math.tanh %230 : vector<32x128xf32>
      %232 = arith.truncf %231 : vector<32x128xf32> to vector<32x128xbf16>
      %c0_73 = arith.constant 0 : index
      %c0_74 = arith.constant 0 : index
      %233 = vector.load %arg21[%c0_73, %c0_74] : memref<128x128xbf16, #tpu.memory_space<vmem>>, vector<128x128xbf16>
      %cst_75 = arith.constant dense<0.000000e+00> : vector<32x128xf32>
      %234 = tpu.matmul %232, %233, %cst_75 {dimension_numbers = #tpu.dot_dimension_numbers<[1], [0], [0], [1], [0, 0, 1, 1], [], []>} : vector<32x128xbf16>, vector<128x128xbf16>, vector<32x128xf32> -> vector<32x128xf32>
      %c0_76 = arith.constant 0 : index
      %c0_77 = arith.constant 0 : index
      %235 = vector.load %arg22[%c0_76, %c0_77] : memref<1x128xf32, #tpu.memory_space<vmem>>, vector<1x128xf32>
      %236 = vector.broadcast %235 : vector<1x128xf32> to vector<32x128xf32>
      %237 = arith.addf %234, %236 : vector<32x128xf32>
      %238 = vector.shape_cast %237 : vector<32x128xf32> to vector<2x16x128xf32>
      %c0_78 = arith.constant 0 : index
      %c0_79 = arith.constant 0 : index
      %c0_80 = arith.constant 0 : index
      %239 = vector.load %arg23[%c0_78, %c0_79, %c0_80] : memref<2x16x128xf32, #tpu.memory_space<vmem>>, vector<2x16x128xf32>
      tpu.vector_store %arg23[%c0_78, %c0_79, %c0_80], %238 {strides = array<i32>} : memref<2x16x128xf32, #tpu.memory_space<vmem>>, vector<2x16x128xf32>,
    } else {
    }
    return
  }
  func.func @transform_0(%arg0: i32, %arg1: i32) -> (i32, i32, i32) {
    %c0_i32 = arith.constant 0 : i32
    %c0_i32_0 = arith.constant 0 : i32
    %c0_i32_1 = arith.constant 0 : i32
    return %arg0, %c0_i32, %c0_i32_0 : i32, i32, i32
  }
  func.func @transform_1(%arg0: i32, %arg1: i32) -> (i32, i32, i32) {
    %c0_i32 = arith.constant 0 : i32
    %c0_i32_0 = arith.constant 0 : i32
    %c0_i32_1 = arith.constant 0 : i32
    return %arg0, %c0_i32, %c0_i32_0 : i32, i32, i32
  }
  func.func @transform_2(%arg0: i32, %arg1: i32) -> (i32, i32) {
    %c0_i32 = arith.constant 0 : i32
    %c0_i32_0 = arith.constant 0 : i32
    %c0_i32_1 = arith.constant 0 : i32
    return %c0_i32, %c0_i32_0 : i32, i32
  }
  func.func @transform_3(%arg0: i32, %arg1: i32) -> (i32, i32) {
    %c0_i32 = arith.constant 0 : i32
    %c0_i32_0 = arith.constant 0 : i32
    %c0_i32_1 = arith.constant 0 : i32
    return %c0_i32, %c0_i32_0 : i32, i32
  }
  func.func @transform_4(%arg0: i32, %arg1: i32) -> (i32, i32) {
    %c0_i32 = arith.constant 0 : i32
    %c0_i32_0 = arith.constant 0 : i32
    %c0_i32_1 = arith.constant 0 : i32
    return %c0_i32, %c0_i32_0 : i32, i32
  }
  func.func @transform_5(%arg0: i32, %arg1: i32) -> (i32, i32) {
    %c0_i32 = arith.constant 0 : i32
    %c0_i32_0 = arith.constant 0 : i32
    %c0_i32_1 = arith.constant 0 : i32
    return %c0_i32, %c0_i32_0 : i32, i32
  }
  func.func @transform_6(%arg0: i32, %arg1: i32) -> (i32, i32) {
    %c0_i32 = arith.constant 0 : i32
    %c0_i32_0 = arith.constant 0 : i32
    %c0_i32_1 = arith.constant 0 : i32
    return %c0_i32, %c0_i32_0 : i32, i32
  }
  func.func @transform_7(%arg0: i32, %arg1: i32) -> (i32, i32) {
    %c0_i32 = arith.constant 0 : i32
    %c0_i32_0 = arith.constant 0 : i32
    %c0_i32_1 = arith.constant 0 : i32
    return %c0_i32, %c0_i32_0 : i32, i32
  }
  func.func @transform_8(%arg0: i32, %arg1: i32) -> (i32, i32) {
    %c0_i32 = arith.constant 0 : i32
    %c0_i32_0 = arith.constant 0 : i32
    %c0_i32_1 = arith.constant 0 : i32
    return %c0_i32, %c0_i32_0 : i32, i32
  }
  func.func @transform_9(%arg0: i32, %arg1: i32) -> (i32, i32, i32) {
    %c0_i32 = arith.constant 0 : i32
    %c0_i32_0 = arith.constant 0 : i32
    %c0_i32_1 = arith.constant 0 : i32
    return %arg1, %c0_i32, %c0_i32_0 : i32, i32, i32
  }
  func.func @transform_10(%arg0: i32, %arg1: i32) -> (i32, i32, i32) {
    %c0_i32 = arith.constant 0 : i32
    %c0_i32_0 = arith.constant 0 : i32
    %c0_i32_1 = arith.constant 0 : i32
    return %arg1, %c0_i32, %c0_i32_0 : i32, i32, i32
  }
  func.func @transform_11(%arg0: i32, %arg1: i32) -> (i32, i32, i32) {
    %c0_i32 = arith.constant 0 : i32
    %c0_i32_0 = arith.constant 0 : i32
    %c0_i32_1 = arith.constant 0 : i32
    return %arg1, %c0_i32, %c0_i32_0 : i32, i32, i32
  }
  func.func @transform_12(%arg0: i32, %arg1: i32) -> (i32, i32, i32) {
    %c0_i32 = arith.constant 0 : i32
    %c0_i32_0 = arith.constant 0 : i32
    %c0_i32_1 = arith.constant 0 : i32
    return %arg1, %c0_i32, %c0_i32_0 : i32, i32, i32
  }
  func.func @transform_13(%arg0: i32, %arg1: i32) -> (i32, i32, i32) {
    %c0_i32 = arith.constant 0 : i32
    %c0_i32_0 = arith.constant 0 : i32
    %c0_i32_1 = arith.constant 0 : i32
    return %arg1, %c0_i32, %c0_i32_0 : i32, i32, i32
  }
  func.func @transform_14(%arg0: i32, %arg1: i32) -> (i32, i32, i32) {
    %c0_i32 = arith.constant 0 : i32
    %c0_i32_0 = arith.constant 0 : i32
    %c0_i32_1 = arith.constant 0 : i32
    return %arg1, %c0_i32, %c0_i32_0 : i32, i32, i32
  }
  func.func @transform_15(%arg0: i32, %arg1: i32) -> (i32, i32, i32) {
    %c0_i32 = arith.constant 0 : i32
    %c0_i32_0 = arith.constant 0 : i32
    %c0_i32_1 = arith.constant 0 : i32
    return %arg1, %c0_i32, %c0_i32_0 : i32, i32, i32
  }
  func.func @transform_16(%arg0: i32, %arg1: i32) -> (i32, i32, i32) {
    %c0_i32 = arith.constant 0 : i32
    %c0_i32_0 = arith.constant 0 : i32
    %c0_i32_1 = arith.constant 0 : i32
    return %arg1, %c0_i32, %c0_i32_0 : i32, i32, i32
  }
  func.func @transform_17(%arg0: i32, %arg1: i32) -> (i32, i32) {
    %c0_i32 = arith.constant 0 : i32
    %c0_i32_0 = arith.constant 0 : i32
    %c0_i32_1 = arith.constant 0 : i32
    return %c0_i32, %c0_i32_0 : i32, i32
  }
  func.func @transform_18(%arg0: i32, %arg1: i32) -> (i32, i32) {
    %c0_i32 = arith.constant 0 : i32
    %c0_i32_0 = arith.constant 0 : i32
    %c0_i32_1 = arith.constant 0 : i32
    return %c0_i32, %c0_i32_0 : i32, i32
  }
  func.func @transform_19(%arg0: i32, %arg1: i32) -> (i32, i32) {
    %c0_i32 = arith.constant 0 : i32
    %c0_i32_0 = arith.constant 0 : i32
    %c0_i32_1 = arith.constant 0 : i32
    return %c0_i32, %c0_i32_0 : i32, i32
  }
  func.func @transform_20(%arg0: i32, %arg1: i32) -> (i32, i32) {
    %c0_i32 = arith.constant 0 : i32
    %c0_i32_0 = arith.constant 0 : i32
    %c0_i32_1 = arith.constant 0 : i32
    return %c0_i32, %c0_i32_0 : i32, i32
  }
  func.func @transform_21(%arg0: i32, %arg1: i32) -> (i32, i32, i32) {
    %c0_i32 = arith.constant 0 : i32
    %c0_i32_0 = arith.constant 0 : i32
    %c0_i32_1 = arith.constant 0 : i32
    return %arg0, %c0_i32, %c0_i32_0 : i32, i32, i32
  }
}

</mosaic_0001>

<bundles_post_ra>
// kernel: transformer_net_forward.1
= control target key start
LH: loop header
LB: loop body
LE: loop exit
PB: predicated region body
PF: predicated region fallthrough
CT: control target
= control target key end

     0   :  { %s9951_s0 = inlined_call_operand.vmem [shape: f32[2,16,32], index: 0, kind: input, shape index: {}]   ;;  %s9952_s1 = inlined_call_operand.vmem [shape: f32[2,1,32], index: 1, kind: input, shape index: {}]   ;;  %s9953_s2 = inlined_call_operand.vmem [shape: f32[16,128], index: 2, kind: input, shape index: {}]   ;;  %s9954_s3 = inlined_call_operand.vmem [shape: bf16[32,128], index: 3, kind: input, shape index: {}]   ;;  %s9955_s4 = inlined_call_operand.vmem [shape: f32[1,128], index: 4, kind: input, shape index: {}]   ;;  %s9956_s5 = inlined_call_operand.vmem [shape: bf16[128,128], index: 5, kind: input, shape index: {}]   ;;  %s9957_s6 = inlined_call_operand.hbm [shape: bf16[32,128], index: 6, kind: input, shape index: {}]   ;;  %s9958_s7 = inlined_call_operand.hbm [shape: bf16[128,128], index: 7, kind: input, shape index: {}]   ;;  %s9959_s8 = inlined_call_operand.vmem [shape: f32[5,128], index: 8, kind: input, shape index: {}]   ;;  %s9960_s9 = inlined_call_operand.vmem [shape: bf16[2,128,128], index: 9, kind: input, shape index: {}]   ;;  %s9961_s10 = inlined_call_operand.vmem [shape: bf16[2,128,128], index: 10, kind: input, shape index: {}]   ;;  %s9962_s11 = inlined_call_operand.hbm [shape: bf16[2,128,128], index: 11, kind: input, shape index: {}]   ;;  %s9963_s12 = inlined_call_operand.hbm [shape: bf16[2,128,128], index: 12, kind: input, shape index: {}]   ;;  %s9964_s13 = inlined_call_operand.hbm [shape: bf16[2,128,512], index: 13, kind: input, shape index: {}]   ;;  %s9965_s14 = inlined_call_operand.hbm [shape: bf16[2,512,128], index: 14, kind: input, shape index: {}]   ;;  %s9966_s15 = inlined_call_operand.vmem [shape: f32[2,9,128], index: 15, kind: input, shape index: {}]   ;;  %s9967_s16 = inlined_call_operand.hbm [shape: f32[2,1,512], index: 16, kind: input, shape index: {}]   ;;  %s9968_s17 = inlined_call_operand.hbm [shape: bf16[128,128], index: 17, kind: input, shape index: {}]   ;;  %s9969_s18 = inlined_call_operand.vmem [shape: f32[1,128], index: 18, kind: input, shape index: {}]   ;;  %s9970_s19 = inlined_call_operand.hbm [shape: bf16[128,128], index: 19, kind: input, shape index: {}]   ;;  %s9971_s20 = inlined_call_operand.vmem [shape: f32[1,128], index: 20, kind: input, shape index: {}]   ;;  %s9972_s21 = inlined_call_operand.hbm [shape: f32[2,16,128], index: 21, kind: output, shape index: {}]  }
   0x1   :  { %10102 = sst [smem:[#allocation88_spill]] %s9951_s0 }
   0x2   :  { %10103 = sst [smem:[#allocation89_spill]] %s9952_s1 }
   0x3   :  { %10104 = sst [smem:[#allocation90_spill]] %s9953_s2 }
   0x4   :  { %10105 = sst [smem:[#allocation91_spill]] %s9954_s3 }
   0x5   :  { %10106 = sst [smem:[#allocation92_spill]] %s9955_s4 }
   0x6   :  { %10107 = sst [smem:[#allocation93_spill]] %s9956_s5 }
   0x7   :  { %10108 = sst [smem:[#allocation94_spill]] %s9957_s6 }
   0x8   :  { %10109 = sst [smem:[#allocation95_spill]] %s9958_s7 }
   0x9   :  { %10110 = sst [smem:[#allocation96_spill]] %s9959_s8 }
   0xa   :  { %10111 = sst [smem:[#allocation97_spill]] %s9960_s9 }
   0xb   :  { %10112 = sst [smem:[#allocation98_spill]] %s9961_s10 }
   0xc   :  { %10113 = sst [smem:[#allocation99_spill]] %s9962_s11 }
   0xd   :  { %10114 = sst [smem:[#allocation100_spill]] %s9963_s12 }
   0xe   :  { %10115 = sst [smem:[#allocation101_spill]] %s9966_s15 }
   0xf   :  { %10116 = sst [smem:[#allocation102_spill]] %s9969_s18 }
  0x10   :  { %10117 = sst [smem:[#allocation103_spill]] %s9971_s20 }
  0x11   :  { %10118 = sst [smem:[#allocation104_spill]] %s9972_s21 }
  0x12   :  { %26 = vsyncpa [#allocation4], 0 }
  0x13   :  { %27 = vsyncpa [#allocation7], 0 }
  0x14   :  { %28 = vsyncpa [#allocation15], 0 }
  0x15   :  { %29 = vsyncpa [#allocation5], 0  ;;  %s7581_s2 = smov 0   ;;  %s7583_s25 = smov 0  }
  0x16   :  { %s7585_s26 = smov 0   ;;  %s7587_s27 = smov 0  }
  0x17   :  { %s7589_s3 = smov 0   ;;  %s7591_s28 = smov 0  }
  0x18 LB: > { %10119 = sst [smem:[#allocation23_spill]] %s7439_s26  ;;  %s7610_s29 = sadd.s32 4294967295, %s7451_s28   ;;  %s7451_s28 = sphi %s7591_s28, %s35_s28   ;;  %s7447_s3 = sphi %s7589_s3, %s10373_s3   ;;  %s7443_s27 = sphi %s7587_s27, %s10372_s27   ;;  %s7439_s26 = sphi %s7585_s26, %s10368_s26   ;;  %s7435_s25 = sphi %s7583_s25, %s10371_s25   ;;  %s7431_s2 = sphi %s7581_s2, %s10370_s2  }
  0x19   : > { %10120 = sst [smem:[#allocation24_spill]] %s7443_s27  ;;  %p318_p0 = scmp.ne.s32.totalorder %s7435_s25, %s7431_s2 }
  0x1a   : > { %10121 = sst [smem:[#allocation25_spill]] %s7451_s28  ;;  %p319_p1 = scmp.eq.s32.totalorder %s7610_s29, 0 }
  0x1b   : > { %p5816_p2 = scmp.ge.s32.totalorder %s7451_s28, 1  ;;  %p569_p3 = scmp.lt.s32.totalorder %s7451_s28, 3 }
  0x1c   : > { %p7618_p4 = por %p319_p1, %p318_p0  ;;  %s10124_s6 = sld [smem:[#allocation94_spill]] }
  0x1d   : > { %p7625_p5 = pnand %p5816_p2, %p569_p3  ;;  %s7453_s23 = smov [#allocation3]  }
  0x1e   : > { %s10122_s0 = scalar_select %p7618_p4, 1, 0 }
  0x1f   : > { %p6737_p6 = pneg %p7625_p5  ;;  %s612_s1 = sshll.u32 %s7453_s23, 4  ;;  %s613_s1 = int_to_ptr.vmem [resolvable:$true] %s612_s1 }
  0x20   : > { %10123 = sst [smem:[#allocation26_spill]] %s10122_s0  ;;  %s9978_s2 = smov 64  }
  0x21   : > { %p7633_p7 = pnand %p6737_p6, %p319_p1  ;;  %s9980_s4 = smov 4  }
  0x22   : > { %s610_s5 = sshll.u32 %s10124_s6, 4  ;;  %s44_s30 = sadd.s32 1, %s7447_s3  ;;  %s611_s5 = int_to_ptr.hbm [resolvable:$true] %s610_s5 }
  0x23   : > { %6740 = dma.hbm_to_vmem [thread:$0]  (!%p7633_p7), %s611_s5, 256, %s613_s1, [#allocation4], %s9978_s2, %s9978_s2, %s9980_s4  }
  0x24   : > { %p45_p8 = scmp.ge.s32.totalorder %s44_s30, 2  ;;  %s305_s23 = sadd.s32 1, %s7439_s26 }
  0x25   : > { %p312_p9 = scmp.ne.s32.totalorder %s7439_s26, %s7435_s25  ;;  %p313_p10 = scmp.eq.s32.totalorder %s7451_s28, 0 }
  0x26   : > { %s10375_s30 = smov (%p45_p8, %s44_s30), 0  ;;  %p6770_p12 = scmp.lt.s32.totalorder %s7451_s28, 2 }
  0x27   : > { %10127 = sst [smem:[#allocation27_spill]] %s10375_s30  ;;  %p7649_p11 = por %p313_p10, %p312_p9 }
  0x28   : > { %s302_s21 = ssub.s32 %s7447_s3, %s10375_s30  ;;  %s693_s20 = sand.u32 1, %s7451_s28  }
  0x29   : > { %p303_p13 = scmp.eq.s32.totalorder %s302_s21, 0  ;;  %s7658_s18 = sand.u32 1, %s7439_s26  }
  0x2a   : > { %s6520_s5 = sshll.u32 %s7447_s3, 6  ;;  %s5824_s2 = sshll.u32 %s7658_s18, 6 }
  0x2b   : > { %s7662_s1 = scalar_select %p303_p13, %s7439_s26, %s305_s23  }
  0x2c   : > { %s10130_s11 = sld [smem:[#allocation99_spill]]  ;;  %s697_s9 = scalar_lea.vmem [#allocation8], %s5824_s2 }
  0x2d   : > { %10129 = sst [smem:[#allocation28_spill]] %s7662_s1  ;;  %s705_s27 = sshll.u32 %s697_s9, 4  ;;  %s706_s27 = int_to_ptr.vmem [resolvable:$true] %s705_s27 }
  0x2e   : > { %p7672_p0 = pnand %p6770_p12, %p7649_p11  ;;  %s10132_s12 = sld [smem:[#allocation100_spill]] }
  0x2f   : > { %s10134_s1 = smov 64   ;;  %s719_s6 = scalar_lea.vmem [#allocation9], %s5824_s2 }
  0x30   : > { %s727_s9 = sshll.u32 %s719_s6, 4  ;;  %s5830_s30 = sshll.u32 %s7658_s18, 8  ;;  %s728_s9 = int_to_ptr.vmem [resolvable:$true] %s727_s9 }
  0x31   : > { %s10135_s7 = sld [smem:[#allocation95_spill]]  ;;  %s7456_s28 = smov 256  }
  0x32   : > { %s702_s15 = scalar_lea.hbm %s10130_s11, %s6520_s5  ;;  %s7679_s11 = scalar_lea.sflag [#allocation4], %s693_s20 }
  0x33   : > { %s703_s10 = sshll.u32 %s702_s15, 4  ;;  %s10133_s15 = smov 4   ;;  %s704_s10 = int_to_ptr.hbm [resolvable:$true] %s703_s10 }
  0x34   : > { %s724_s8 = scalar_lea.hbm %s10132_s12, %s6520_s5  ;;  %s6522_s20 = sshll.u32 %s7447_s3, 8 }
  0x35   : > { %s725_s4 = sshll.u32 %s724_s8, 4  ;;  %s746_s8 = scalar_lea.hbm %s9964_s13, %s6522_s20  ;;  %s726_s4 = int_to_ptr.hbm [resolvable:$true] %s725_s4 }
  0x36   : > { %6753 = dma.hbm_to_vmem [thread:$0]  (!%p7672_p0), %s704_s10, 1024, %s706_s27, %s7679_s11, %s10134_s1, %s10134_s1, %s10133_s15  }
  0x37   : > { %6756 = dma.hbm_to_vmem [thread:$0]  (!%p7672_p0), %s726_s4, 1024, %s728_s9, %s7679_s11, %s10134_s1, %s10134_s1, %s10133_s15  }
  0x38   : > { %s741_s12 = scalar_lea.vmem [#allocation10], %s5830_s30  ;;  %s747_s27 = sshll.u32 %s746_s8, 4  ;;  %s748_s27 = int_to_ptr.hbm [resolvable:$true] %s747_s27 }
  0x39   : > { %s749_s10 = sshll.u32 %s741_s12, 4  ;;  %s624_s26 = sshll.u32 %s10135_s7, 4  ;;  %s750_s10 = int_to_ptr.vmem [resolvable:$true] %s749_s10  ;;  %s625_s26 = int_to_ptr.hbm [resolvable:$true] %s624_s26 }
  0x3a   : > { %s7457_s0 = smov 16   ;;  %s7458_s4 = smov [#allocation6]  }
  0x3b   : > { %6759 = dma.hbm_to_vmem [thread:$0]  (!%p7672_p0), %s748_s27, 4096, %s750_s10, %s7679_s11, %s7456_s28, %s7456_s28, %s7457_s0  }
  0x3c   : > { %s626_s9 = sshll.u32 %s7458_s4, 4  ;;  %s768_s23 = scalar_lea.hbm %s9965_s14, %s6522_s20  ;;  %s627_s9 = int_to_ptr.vmem [resolvable:$true] %s626_s9 }
  0x3d   : > { %6743 = dma.hbm_to_vmem [thread:$0]  (!%p7633_p7), %s625_s26, 1024, %s627_s9, [#allocation7], %s10134_s1, %s10134_s1, %s10133_s15  }
  0x3e   : > { %s769_s8 = sshll.u32 %s768_s23, 4  ;;  %s763_s2 = scalar_lea.vmem [#allocation11], %s5830_s30  ;;  %s770_s8 = int_to_ptr.hbm [resolvable:$true] %s769_s8 }
  0x3f   : > { %s771_s6 = sshll.u32 %s763_s2, 4  ;;  %s641_s20 = sshll.u32 %s9968_s17, 4  ;;  %s772_s6 = int_to_ptr.vmem [resolvable:$true] %s771_s6  ;;  %s642_s20 = int_to_ptr.hbm [resolvable:$true] %s641_s20 }
  0x40   : > { %6762 = dma.hbm_to_vmem [thread:$0]  (!%p7672_p0), %s770_s8, 4096, %s772_s6, %s7679_s11, %s10134_s1, %s10134_s1, %s10133_s15  }
  0x41   : > { %s7459_s10 = smov [#allocation13]   ;;  %s658_s4 = sshll.u32 %s9970_s19, 4  ;;  %s659_s4 = int_to_ptr.hbm [resolvable:$true] %s658_s4 }
  0x42   : > { %s643_s26 = sshll.u32 %s7459_s10, 4  ;;  %s7460_s9 = smov [#allocation14]   ;;  %s644_s26 = int_to_ptr.vmem [resolvable:$true] %s643_s26 }
  0x43   : > { %6746 = dma.hbm_to_vmem [thread:$0]  (!%p7633_p7), %s642_s20, 1024, %s644_s26, [#allocation7], %s10134_s1, %s10134_s1, %s10133_s15  }
  0x44   : > { %s660_s5 = sshll.u32 %s7460_s9, 4  ;;  %s5836_s12 = sshll.u32 %s7658_s18, 2  ;;  %s661_s5 = int_to_ptr.vmem [resolvable:$true] %s660_s5 }
  0x45   : > { %6749 = dma.hbm_to_vmem [thread:$0]  (!%p7633_p7), %s659_s4, 1024, %s661_s5, [#allocation15], %s10134_s1, %s10134_s1, %s10133_s15  }
  0x46   : > { %s5837_s23 = sshll.u32 %s7447_s3, 2  ;;  %s793_s8 = scalar_lea.vmem [#allocation12], %s5836_s12 }
  0x47   : > { %s801_s2 = sshll.u32 %s793_s8, 4  ;;  %s797_s0 = scalar_lea.hbm %s9967_s16, %s5837_s23  ;;  %s802_s2 = int_to_ptr.vmem [resolvable:$true] %s801_s2 }
  0x48   : > { %s799_s10 = sshll.u32 %s797_s0, 4  ;;  %810 = sbr.rel (%p7625_p5) target bundleno = 3834 (0xefa), region = 104  ;;  %s800_s10 = int_to_ptr.hbm [resolvable:$true] %s799_s10 }
  0x49   : > { %6765 = dma.hbm_to_vmem [thread:$0]  (!%p7672_p0), %s800_s10, 64, %s802_s2, %s7679_s11  }
  0x4d   : > { %7406 = dma.done.wait (%p319_p1), [#allocation4], 256  }
  0x4e   : > { %7408 = vsyncadd (%p319_p1), [#allocation4], 4294967040 }
  0x4f   : > { %7410 = dma.done.wait (%p319_p1), [#allocation7], 1024  }
  0x50   : > { %7412 = vsyncadd (%p319_p1), [#allocation7], 4294966272  ;;  %s822_s24 = sand.u32 1, %s7610_s29   ;;  %s824_s11 = sand.u32 1, %s7435_s25  }
  0x51   : > { %s5841_s1 = sshll.u32 %s824_s11, 6  ;;  %s823_s22 = scalar_lea.sflag [#allocation4], %s822_s24 }
  0x52   : > { %s7754_s21 = scalar_lea.vmem [#allocation8], %s5841_s1 }
  0x53   : > { %7414 = dma.done.wait (%p7618_p4), %s823_s22, 10304  }
  0x54   : > { %7416 = vsyncadd (%p7618_p4), %s823_s22, 4294956992  ;;  %s5843_s15 = sshll.u32 %s824_s11, 8  ;;  %s5845_s20 = sshll.u32 %s824_s11, 2 }
  0x55   : > { %s7760_s26 = scalar_lea.vmem [#allocation9], %s5841_s1  ;;  %s7762_s27 = scalar_lea.vmem [#allocation10], %s5843_s15 }
  0x56   : > { %s7764_s30 = scalar_lea.vmem [#allocation11], %s5843_s15  ;;  %s7766_s4 = scalar_lea.vmem [#allocation12], %s5845_s20 }
  0x57   : > { %7418 = dma.done.wait (%p319_p1), [#allocation7], 1024  }
  0x58   : > { %7420 = vsyncadd (%p319_p1), [#allocation7], 4294966272 }
  0x59   : > { %7422 = dma.done.wait (%p319_p1), [#allocation15], 1024  }
  0x5a   : > { %7424 = vsyncadd (%p319_p1), [#allocation15], 4294966272  ;;  %s10137_s9 = sld [smem:[#allocation24_spill]] }
  0x5b   : > { %s10138_s6 = sld [smem:[#allocation97_spill]] }
  0x5c   : > { %s10139_s18 = sld [smem:[#allocation98_spill]] }
  0x5d   : > { %s10140_s22 = sld [smem:[#allocation101_spill]] }
  0x60   : > { %p988_p2 = scmp.lt.s32.totalorder %s10137_s9, 1  ;;  %p5854_p1 = scmp.ne.s32.totalorder %s10137_s9, 0 }
  0x61   : > { %s10141_s7 = sld [smem:[#allocation91_spill]] (!%p5854_p1) }
  0x62   : > { %s989_s5 = scalar_select %p988_p2, %s10137_s9, 1 }
  0x63   : > { %1008 = sbr.rel (%p5854_p1) target bundleno = 694 (0x2b6), region = 144  ;;  %s10142_s0 = sld [smem:[#allocation89_spill]] (!%p5854_p1) }
  0x64   : > { %s6524_s12 = sshll.u32 %s989_s5, 6  ;;  %s6526_s23 = sshll.u32 %s989_s5, 4 }
  0x65   : > { %s7781_s28 = scalar_lea.vmem %s10138_s6, %s6524_s12  ;;  %s7786_s24 = scalar_lea.vmem %s10139_s18, %s6524_s12 }
  0x66   : > { %s7791_s15 = scalar_lea.vmem %s10140_s22, %s6526_s23  ;;  %s10143_s11 = sld [smem:[#allocation88_spill]] (!%p5854_p1) }
  0x67   : > { %s10144_s10 = sld [smem:[#allocation93_spill]] (!%p5854_p1) }
  0x68   : > { %v6528_v0 = vld [vmem:[%s10141_s7 + $0x8] sm:$0xff]  ;;  %v6538_v1 = vld [vmem:[#allocation3 + $0x8] sm:$0xff]  ;;  %v6527_v2 = vld [vmem:[%s10141_s7] sm:$0xff]  ;;  %vm1027_vm0 = vcmask 1041409   ;;  %vm1042_vm1 = vcmask 261120   ;;  %s10145_s1 = sld [smem:[#allocation92_spill]] }
  0x69   : > { %v1010_v3 = vld [vmem:[%s10142_s0] sm:$0x1]  ;;  %v1011_v4 = vld [vmem:[%s10142_s0 + $0x1] sm:$0x1]  ;;  %1052 = vmatpush.bf16.msra.mxu0 %v6528_v0  ;;  %1193 = vmatpush.bf16.msra.mxu2 %v6538_v1  ;;  %v6537_v5 = vld [vmem:[#allocation3] sm:$0xff]  ;;  %s10146_s2 = sld [smem:[#allocation96_spill]] }
  0x6a   : > { %v1012_v6 = vpack.c.bf16 %v1010_v3, %v1010_v3  ;;  %v1013_v7 = vpack.c.bf16 %v1011_v4, %v1011_v4  ;;  %v6546_v10 = vld [vmem:[#allocation6 + $0x38] sm:$0xff]  ;;  %v6545_v15 = vld [vmem:[#allocation6 + $0x30] sm:$0xff]  ;;  %v6544_v21 = vld [vmem:[#allocation6 + $0x28] sm:$0xff]  ;;  %s10147_s18 = sld [smem:[#allocation90_spill]] }
  0x6b   : > { %6683 = vmatpush.bf16.msra.mxu3 %v6546_v10  ;;  %v6543_v23 = vld [vmem:[#allocation6 + $0x20] sm:$0xff]  ;;  %v6542_v25 = vld [vmem:[#allocation6 + $0x18] sm:$0xff]  ;;  %v6541_v27 = vld [vmem:[#allocation6 + $0x10] sm:$0xff] }
  0x6c   : > { %v1158_v8 = vld [vmem:[%s10143_s11] sm:$0xff]  ;;  %v1159_v9 = vld [vmem:[%s10143_s11 + $0x8] sm:$0xff]  ;;  %v1024_v11 = vunpack.c.l.b16 %v1012_v6  ;;  %v1025_v12 = vunpack.c.l.b16 %v1013_v7  ;;  %v1160_v18 = vld [vmem:[%s10143_s11 + $0x10] sm:$0xff] }
  0x6d   : > { %v1162_v13 = vpack.c.bf16 %v1159_v9, %v1158_v8  ;;  %1053 = vmatpush.bf16.msra.mxu0 %v6527_v2  ;;  %1194 = vmatpush.bf16.msra.mxu2 %v6537_v5  ;;  %v1161_v19 = vld [vmem:[%s10143_s11 + $0x18] sm:$0xff]  ;;  %v6535_v24 = vld [vmem:[%s10144_s10 + $0x30] sm:$0xff]  ;;  %v6534_v26 = vld [vmem:[%s10144_s10 + $0x28] sm:$0xff] }
  0x6e   : > { %v1026_v14 = vrot.slane %v1025_v12, 7  ;;  %v1163_v20 = vpack.c.bf16 %v1161_v19, %v1160_v18  ;;  %v6536_v22 = vld [vmem:[%s10144_s10 + $0x38] sm:$0xff]  ;;  %v6533_v28 = vld [vmem:[%s10144_s10 + $0x20] sm:$0xff]  ;;  %v6540_v29 = vld [vmem:[#allocation6 + $0x8] sm:$0xff] }
  0x6f   : > { %6684 = vmatpush.bf16.msra.mxu3 %v6545_v15  ;;  %1145 = vmatpush.bf16.msra.mxu1 %v6536_v22  ;;  %v6532_v30 = vld [vmem:[%s10144_s10 + $0x18] sm:$0xff]  ;;  %v6539_v31 = vld [vmem:[#allocation6] sm:$0xff]  ;;  %v6531_v32 = vld [vmem:[%s10144_s10 + $0x10] sm:$0xff] }
  0x70   : > { %v1028_v16 = vsel %vm1027_vm0, %v1026_v14, %v1024_v11  ;;  %5905 = vmatmul.msk.bf16.vlgmr.msra.gmra.mxu2 %vm1042_vm1, %v1162_v13  ;;  %v6530_v33 = vld [vmem:[%s10144_s10 + $0x8] sm:$0xff]  ;;  %v6843_v34 = vld [vmem:[%s10145_s1] ss:$0 sm:$0xff] }
  0x71   : > { %1277 = vmatpush.bf16.msrb.mxu0 %v6546_v10  ;;  %v1029_v17 = vpack.c.b16 %v1028_v16, %v1028_v16  ;;  %v6529_v35 = vld [vmem:[%s10144_s10] sm:$0xff]  ;;  %v1297_v18 = vld [vmem:[%s10147_s18 + $0x8] sm:$0xff] }
  0x72   : > { %v7848_v38 = vld [vmem:[%s10146_s2] sm:$0x1f] }
  0x73   : > { %5863 = vmatmul.msk.bf16.vlgmr.msra.gmra.mxu0 %vm1042_vm1, %v1029_v17  ;;  %6685 = vmatpush.bf16.msra.mxu3 %v6544_v21  ;;  %v1168_v41 = vperm.slane %v7848_v38, 1  ;;  %v1228_v7 = vperm.slane %v7848_v38, 2  ;;  %v1096_v8 = vperm.slane %v7848_v38, 0  ;;  %v1296_v10 = vld [vmem:[%s10147_s18] sm:$0xff] }
  0x74   : > { %1146 = vmatpush.bf16.msra.mxu1 %v6535_v24 }
  0x75   : > { %1278 = vmatpush.bf16.msrb.mxu0 %v6545_v15 }
  0x77   : > { %6686 = vmatpush.bf16.msra.mxu3 %v6543_v23 }
  0x78   : > { %1147 = vmatpush.bf16.msra.mxu1 %v6534_v26 }
  0x79   : > { %1279 = vmatpush.bf16.msrb.mxu0 %v6544_v21 }
  0x7b   : > { %6687 = vmatpush.bf16.msra.mxu3 %v6542_v25 }
  0x7c   : > { %1148 = vmatpush.bf16.msra.mxu1 %v6533_v28 }
  0x7d   : > { %1280 = vmatpush.bf16.msrb.mxu0 %v6543_v23 }
  0x7f   : > { %6688 = vmatpush.bf16.msra.mxu3 %v6541_v27 }
  0x80   : > { %5906 = vmatmul.msk.bf16.gmra.mxu2 %vm1042_vm1, %v1163_v20  ;;  %1149 = vmatpush.bf16.msra.mxu1 %v6532_v30 }
  0x81   : > { %1281 = vmatpush.bf16.msrb.mxu0 %v6542_v25 }
  0x83   : > { %6689 = vmatpush.bf16.msra.mxu3 %v6540_v29 }
  0x84   : > { %1150 = vmatpush.bf16.msra.mxu1 %v6531_v32  ;;  %v7461_v32 = vmov 128.0  }
  0x85   : > { %1282 = vmatpush.bf16.msrb.mxu0 %v6541_v27 }
  0x87   : > { %6690 = vmatpush.bf16.msra.mxu3 %v6539_v31 }
  0x88   : > { %1151 = vmatpush.bf16.msra.mxu1 %v6530_v33 }
  0x89   : > { %1283 = vmatpush.bf16.msrb.mxu0 %v6540_v29 }
  0x8c   : > { %1152 = vmatpush.bf16.msra.mxu1 %v6529_v35 }
  0x8d   : > { %1284 = vmatpush.bf16.msrb.mxu0 %v6539_v31 }
  0xf0   : > { %v1055_v36 = vpop.f32.mrf.mxu0 }
  0xf1   : > { %v1056_v37 = vadd.f32 %v6843_v34, %v1055_v36 }
  0xf3   : > { %v5864_v39 = vmul.f32 -1.442695, %v1056_v37  ;;  %v1196_v40 = vpop.f32.mrf.mxu2 }
  0xf4   : > { %v1197_v43 = vadd.f32 %v1196_v40, %v1168_v41 }
  0xf5   : > { %6844 = vpow2.f32 %v5864_v39 }
  0xf6   : > { %6846 = vtanh.f32 %v1197_v43 }
  0xf8   : > { %v1057_v42 = vpop.f32.mrf.mxu0 }
  0xfb   : > { %v6845_v44 = vpop.eup %6844  ;;  %v1198_v46 = vpop.f32.mrf.mxu2 }
  0xfc   : > { %v1062_v45 = vadd.f32 1.0, %v6845_v44  ;;  %v1199_v47 = vadd.f32 %v1198_v46, %v1168_v41  ;;  %v6847_v48 = vpop.eup %6846 }
  0xfe   : > { %6848 = vrcp.f32 %v1062_v45  ;;  %v1074_v55 = vand.u32 2147483648, %v1062_v45  ;;  %vm1068_vm2 = vweird.f32 %v1062_v45  ;;  %v1072_v57 = vand.u32 2147483647, %v1062_v45 }
  0xff   : > { %6850 = vtanh.f32 %v1199_v47 }
 0x100   : > { %v1075_v61 = vor.u32 1.1754944e-38, %v1074_v55  ;;  %vm1073_vm5 = vcmp.eq.f32.partialorder %v1072_v57, 8.507059e+37 }
 0x103   : > { %v1201_v50 = vpop.f32.mrf.mxu2 }
 0x104   : > { %v6849_v49 = vpop.eup %6848  ;;  %v1202_v58 = vadd.f32 %v1201_v50, %v1168_v41 }
 0x105   : > { %v6851_v51 = vpop.eup %6850  ;;  %v1064_v52 = vmul.f32 %v6849_v49, %v1062_v45  ;;  %vm1069_vm3 = vweird.f32 %v6849_v49 }
 0x106   : > { %v1210_v53 = vpack.c.bf16 %v6851_v51, %v6847_v48  ;;  %vm1070_vm4 = vmor %vm1068_vm2, %vm1069_vm3  ;;  %6852 = vtanh.f32 %v1202_v58 }
 0x107   : > { %v1065_v54 = vsub.f32 1.0, %v1064_v52 }
 0x108   : > { %1285 = vmatmul.bf16.vlgmr.msrb.gmra.mxu0 %v1210_v53 }
 0x109   : > { %v1066_v56 = vmul.f32 %v6849_v49, %v1065_v54 }
 0x10b   : > { %v1067_v59 = vadd.f32 %v6849_v49, %v1066_v56  ;;  %v1203_v60 = vpop.f32.mrf.mxu2 }
 0x10c   : > { %v1204_v62 = vadd.f32 %v1203_v60, %v1168_v41  ;;  %v6853_v3 = vpop.eup %6852 }
 0x10d   : > { %v1071_v63 = vsel %vm1070_vm4, %v6849_v49, %v1067_v59 }
 0x10e   : > { %v1076_v0 = vsel %vm1073_vm5, %v1075_v61, %v1071_v63  ;;  %6854 = vtanh.f32 %v1204_v62 }
 0x10f   : > { %v1078_v1 = vmul.f32 %v1076_v0, %v1056_v37  ;;  %6856 = vrcp.f32 %v7461_v32 }
 0x111   : > { %v1079_v2 = vpack.c.bf16 %v1078_v1, %v1078_v1 }
 0x113   : > { %1153 = vmatmul.bf16.vlgmr.msra.gmra.mxu1 %v1079_v2 }
 0x114   : > { %v6855_v4 = vpop.eup %6854 }
 0x115   : > { %v1211_v5 = vpack.c.bf16 %v6855_v4, %v6853_v3  ;;  %v6857_v33 = vpop.eup %6856 }
 0x116   : > { %v1321_v34 = vmul.f32 128.0, %v6857_v33  ;;  %vm1325_vm6 = vweird.f32 %v6857_v33 }
 0x117   : > { %1290 = vmatmul.bf16.vlgmr.msra.gmra.mxu3 %v1211_v5 }
 0x118   : > { %v1322_v35 = vsub.f32 1.0, %v1321_v34 }
 0x11a   : > { %v1323_v36 = vmul.f32 %v6857_v33, %v1322_v35 }
 0x11c   : > { %v1324_v37 = vadd.f32 %v6857_v33, %v1323_v36 }
 0x11e   : > { %v1326_v39 = vsel %vm1325_vm6, %v6857_v33, %v1324_v37 }
 0x185   : > { %v1286_v6 = vpop.f32.mrf.mxu0 }
 0x186   : > { %v1287_v9 = vadd.f32 %v1286_v6, %v1228_v7 }
 0x188   : > { %v1298_v13 = vadd.f32 %v1296_v10, %v1287_v9 }
 0x18d   : > { %v1288_v15 = vpop.f32.mrf.mxu0 }
 0x18e   : > { %v1289_v17 = vadd.f32 %v1288_v15, %v1228_v7 }
 0x190   : > { %v1154_v11 = vpop.f32.mrf.mxu1  ;;  %v1299_v21 = vadd.f32 %v1297_v18, %v1289_v17 }
 0x191   : > { %v1155_v12 = vadd.f32 %v1154_v11, %v1096_v8 }
 0x193   : > { %v1304_v14 = vperm.slane %v1155_v12, 0  ;;  %v1303_v20 = vrot.slane %v1155_v12, 1 }
 0x195   : > { %v1308_v16 = vadd.f32 %v1304_v14, %v1298_v13  ;;  %v1309_v24 = vadd.f32 %v1304_v14, %v1299_v21  ;;  %v1305_v25 = vperm.slane %v1303_v20, 0 }
 0x197   : > { %1312 = vadd.xlane.f32.xlu0 %v1308_v16 }
 0x198   : > { %v1156_v19 = vpop.f32.mrf.mxu1 }
 0x199   : > { %v1399_v19 = vperm.slane %v7848_v38, 3 }
 0x19a   : > { %v1291_v22 = vpop.f32.mrf.mxu3 }
 0x19b   : > { %v1292_v23 = vadd.f32 %v1291_v22, %v1228_v7 }
 0x19d   : > { %v1300_v26 = vadd.f32 %v1296_v10, %v1292_v23 }
 0x19f   : > { %1314 = vadd.xlane.f32.xlu0 %v1309_v24  ;;  %v1310_v27 = vadd.f32 %v1305_v25, %v1300_v26 }
 0x1a1   : > { %1316 = vadd.xlane.f32.xlu1 %v1310_v27 }
 0x1a2   : > { %v1293_v28 = vpop.f32.mrf.mxu3 }
 0x1a3   : > { %v1294_v29 = vadd.f32 %v1293_v28, %v1228_v7 }
 0x1a5   : > { %v1301_v30 = vadd.f32 %v1297_v18, %v1294_v29 }
 0x1a7   : > { %v1311_v31 = vadd.f32 %v1305_v25, %v1301_v30  ;;  %v1404_v25 = vperm.slane %v7848_v38, 4 }
 0x1a9   : > { %1318 = vadd.xlane.f32.xlu1 %v1311_v31 }
 0x20a   : > { %v1313_v40 = vpop.xlane.xlu0 %1312 }
 0x20b   : > { %v1327_v41 = vmul.f32 %v1326_v39, %v1313_v40 }
 0x20d   : > { %v1331_v42 = vsub.f32 %v1308_v16, %v1327_v41 }
 0x20f   : > { %v1335_v43 = vmul.f32 %v1331_v42, %v1331_v42 }
 0x211   : > { %1339 = vadd.xlane.f32.xlu2 %v1335_v43 }
 0x212   : > { %v1315_v44 = vpop.xlane.xlu0 %1314 }
 0x213   : > { %v1328_v45 = vmul.f32 %v1326_v39, %v1315_v44 }
 0x214   : > { %v1317_v47 = vpop.xlane.xlu1 %1316 }
 0x215   : > { %v1332_v46 = vsub.f32 %v1309_v24, %v1328_v45  ;;  %v1329_v48 = vmul.f32 %v1326_v39, %v1317_v47 }
 0x217   : > { %v1336_v49 = vmul.f32 %v1332_v46, %v1332_v46  ;;  %v7859_v50 = vsub.f32 %v1310_v27, %v1329_v48 }
 0x219   : > { %1341 = vadd.xlane.f32.xlu2 %v1336_v49  ;;  %v1337_v51 = vmul.f32 %v7859_v50, %v7859_v50 }
 0x21b   : > { %1343 = vadd.xlane.f32.xlu0 %v1337_v51 }
 0x21c   : > { %v1319_v52 = vpop.xlane.xlu1 %1318 }
 0x21d   : > { %v1330_v53 = vmul.f32 %v1326_v39, %v1319_v52 }
 0x21f   : > { %v7863_v54 = vsub.f32 %v1311_v31, %v1330_v53 }
 0x221   : > { %v1338_v55 = vmul.f32 %v7863_v54, %v7863_v54 }
 0x223   : > { %1345 = vadd.xlane.f32.xlu1 %v1338_v55 }
 0x284   : > { %v1340_v56 = vpop.xlane.xlu2 %1339 }
 0x285   : > { %v1347_v57 = vmul.f32 %v1340_v56, %v1326_v39 }
 0x287   : > { %v1351_v58 = vadd.f32 1e-12, %v1347_v57 }
 0x289   : > { %6858 = vrsqrt.f32 %v1351_v58  ;;  %vm1361_vm8 = vweird.f32 %v1351_v58 }
 0x28c   : > { %v1342_v59 = vpop.xlane.xlu2 %1341 }
 0x28d   : > { %v1348_v60 = vmul.f32 %v1342_v59, %v1326_v39 }
 0x28e   : > { %v1344_v63 = vpop.xlane.xlu0 %1343 }
 0x28f   : > { %v6859_v61 = vpop.eup %6858  ;;  %v1352_v62 = vadd.f32 1e-12, %v1348_v60  ;;  %v1349_v1 = vmul.f32 %v1344_v63, %v1326_v39 }
 0x290   : > { %v1356_v0 = vmul.f32 %v6859_v61, %v1351_v58  ;;  %vm1362_vm7 = vweird.f32 %v6859_v61 }
 0x291   : > { %6860 = vrsqrt.f32 %v1352_v62  ;;  %v1353_v3 = vadd.f32 1e-12, %v1349_v1  ;;  %vm1363_vm9 = vmor %vm1361_vm8, %vm1362_vm7  ;;  %vm1371_vm11 = vweird.f32 %v1352_v62 }
 0x292   : > { %v1357_v2 = vmul.f32 %v6859_v61, %v1356_v0 }
 0x293   : > { %6862 = vrsqrt.f32 %v1353_v3  ;;  %vm1381_vm14 = vweird.f32 %v1353_v3 }
 0x294   : > { %v1358_v4 = vmul.f32 0.5, %v1357_v2 }
 0x296   : > { %v1359_v5 = vsub.f32 1.5, %v1358_v4  ;;  %v1346_v7 = vpop.xlane.xlu1 %1345 }
 0x297   : > { %v6861_v6 = vpop.eup %6860  ;;  %v1350_v10 = vmul.f32 %v1346_v7, %v1326_v39 }
 0x298   : > { %v1360_v8 = vmul.f32 %v6859_v61, %v1359_v5  ;;  %v1366_v9 = vmul.f32 %v6861_v6, %v1352_v62  ;;  %vm1372_vm10 = vweird.f32 %v6861_v6 }
 0x299   : > { %v6863_v11 = vpop.eup %6862  ;;  %v1354_v13 = vadd.f32 1e-12, %v1350_v10  ;;  %vm1373_vm12 = vmor %vm1371_vm11, %vm1372_vm10 }
 0x29a   : > { %v1367_v12 = vmul.f32 %v6861_v6, %v1366_v9  ;;  %v1376_v14 = vmul.f32 %v6863_v11, %v1353_v3  ;;  %v1364_v15 = vsel %vm1363_vm9, %v6859_v61, %v1360_v8  ;;  %vm1382_vm13 = vweird.f32 %v6863_v11 }
 0x29b   : > { %6864 = vrsqrt.f32 %v1354_v13  ;;  %v1395_v20 = vmul.f32 %v1364_v15, %v1331_v42  ;;  %vm1383_vm15 = vmor %vm1381_vm14, %vm1382_vm13  ;;  %vm1391_vm1 = vweird.f32 %v1354_v13 }
 0x29c   : > { %v1368_v16 = vmul.f32 0.5, %v1367_v12  ;;  %v1377_v17 = vmul.f32 %v6863_v11, %v1376_v14 }
 0x29d   : > { %v1400_v27 = vmul.f32 %v1399_v19, %v1395_v20 }
 0x29e   : > { %v1369_v18 = vsub.f32 1.5, %v1368_v16  ;;  %v1378_v21 = vmul.f32 0.5, %v1377_v17 }
 0x29f   : > { %v1405_v33 = vadd.f32 %v1404_v25, %v1400_v27 }
 0x2a0   : > { %v1370_v22 = vmul.f32 %v6861_v6, %v1369_v18  ;;  %v1379_v23 = vsub.f32 1.5, %v1378_v21 }
 0x2a1   : > { %v6865_v24 = vpop.eup %6864 }
 0x2a2   : > { %v1374_v26 = vsel %vm1373_vm12, %v6861_v6, %v1370_v22  ;;  %v1380_v29 = vmul.f32 %v6863_v11, %v1379_v23  ;;  %v1386_v30 = vmul.f32 %v6865_v24, %v1354_v13  ;;  %vm1392_vm0 = vweird.f32 %v6865_v24 }
 0x2a3   : > { %v1396_v28 = vmul.f32 %v1374_v26, %v1332_v46  ;;  %vm1393_vm2 = vmor %vm1391_vm1, %vm1392_vm0 }
 0x2a4   : > { %v1387_v32 = vmul.f32 %v6865_v24, %v1386_v30  ;;  %v1384_v35 = vsel %vm1383_vm15, %v6863_v11, %v1380_v29 }
 0x2a5   : > { %v1401_v31 = vmul.f32 %v1399_v19, %v1396_v28  ;;  %v1397_v40 = vmul.f32 %v1384_v35, %v7859_v50 }
 0x2a6   : > { %v1388_v36 = vmul.f32 0.5, %v1387_v32 }
 0x2a7   : > { %v1406_v34 = vadd.f32 %v1404_v25, %v1401_v31  ;;  %v1402_v42 = vmul.f32 %v1399_v19, %v1397_v40 }
 0x2a8   : > { %v1389_v39 = vsub.f32 1.5, %v1388_v36 }
 0x2a9   : > { %v6664_v37 = vpack.c.bf16 %v1406_v34, %v1405_v33  ;;  %v1407_v45 = vadd.f32 %v1404_v25, %v1402_v42 }
 0x2aa   : > { %v1390_v38 = vmul.f32 %v6865_v24, %v1389_v39 }
 0x2ab   : > { %6665 = vst [vmem:[#allocation2] sm:$0xff] %v6664_v37  }
 0x2ac   : > { %v1394_v41 = vsel %vm1393_vm2, %v6865_v24, %v1390_v38 }
 0x2ad   : > { %v1398_v43 = vmul.f32 %v1394_v41, %v7863_v54 }
 0x2af   : > { %v1403_v44 = vmul.f32 %v1399_v19, %v1398_v43 }
 0x2b1   : > { %v1408_v46 = vadd.f32 %v1404_v25, %v1403_v44 }
 0x2b3   : > { %v6669_v47 = vpack.c.bf16 %v1408_v46, %v1407_v45 }
 0x2b5   : > { %6681 = vst [vmem:[#allocation2 + $0x8] sm:$0xff] %v6669_v47  }
 0x2b6 PF: > { %v6556_v48 = vld [vmem:[%s7781_s28 + $0x38] sm:$0xff]  ;;  %v6555_v50 = vld [vmem:[%s7781_s28 + $0x30] sm:$0xff]  ;;  %v6554_v53 = vld [vmem:[%s7781_s28 + $0x28] sm:$0xff]  ;;  %v7465_v42 = vmov 1983009808   ;;  %vm1732_vm3 = vcmask 1047556  }
 0x2b7   : > { %v6564_v49 = vld [vmem:[%s7786_s24 + $0x38] sm:$0xff]  ;;  %1504 = vmatpush.bf16.msra.mxu0 %v6556_v48  ;;  %v6563_v51 = vld [vmem:[%s7786_s24 + $0x30] sm:$0xff]  ;;  %v6562_v54 = vld [vmem:[%s7786_s24 + $0x28] sm:$0xff]  ;;  %v1737_v43 = vunpack.c.l.s4 %v7465_v42  ;;  %vm2661_vm4 = vcmask 1041409   ;;  %vm2667_vm5 = vcmask 1043459   ;;  %vm2664_vm6 = vcmask 1042434  }
 0x2b8   : > { %1588 = vmatpush.bf16.msra.mxu1 %v6564_v49  ;;  %v6572_v52 = vld [vmem:[%s7754_s21 + $0x38] sm:$0xff]  ;;  %v6571_v55 = vld [vmem:[%s7754_s21 + $0x30] sm:$0xff]  ;;  %v6553_v56 = vld [vmem:[%s7781_s28 + $0x20] sm:$0xff]  ;;  %vm2670_vm7 = vcmask 1044484   ;;  %vm2673_vm8 = vcmask 1045509   ;;  %vm2676_vm9 = vcmask 1046534  }
 0x2b9   : > { %1672 = vmatpush.bf16.msra.mxu2 %v6572_v52  ;;  %v6561_v57 = vld [vmem:[%s7786_s24 + $0x20] sm:$0xff]  ;;  %v6570_v58 = vld [vmem:[%s7754_s21 + $0x28] sm:$0xff]  ;;  %v6552_v59 = vld [vmem:[%s7781_s28 + $0x18] sm:$0xff]  ;;  %v7945_v49 = vunpack.c.0.s8 %v1737_v43  ;;  %vm2679_vm10 = vcmask 1047559   ;;  %vm2789_vm11 = vcmask 261120   ;;  %vm3016_vm12 = vcmask 130048  }
 0x2ba   : > { %v6560_v60 = vld [vmem:[%s7786_s24 + $0x18] sm:$0xff]  ;;  %v6569_v61 = vld [vmem:[%s7754_s21 + $0x20] sm:$0xff]  ;;  %v6551_v62 = vld [vmem:[%s7781_s28 + $0x10] sm:$0xff] }
 0x2bb   : > { %1505 = vmatpush.bf16.msra.mxu0 %v6555_v50  ;;  %v6559_v63 = vld [vmem:[%s7786_s24 + $0x10] sm:$0xff]  ;;  %v6568_v0 = vld [vmem:[%s7754_s21 + $0x18] sm:$0xff]  ;;  %v6550_v1 = vld [vmem:[%s7781_s28 + $0x8] sm:$0xff]  ;;  %10149 = vst [vmem:[#allocation30_spill] sm:$0xff] %v7945_v49 }
 0x2bc   : > { %1589 = vmatpush.bf16.msra.mxu1 %v6563_v51  ;;  %v6558_v2 = vld [vmem:[%s7786_s24 + $0x8] sm:$0xff]  ;;  %v6567_v3 = vld [vmem:[%s7754_s21 + $0x10] sm:$0xff]  ;;  %v6549_v4 = vld [vmem:[%s7781_s28] sm:$0xff]  ;;  %s7463_s28 = smov 64  }
 0x2bd   : > { %1673 = vmatpush.bf16.msra.mxu2 %v6571_v55  ;;  %v6557_v5 = vld [vmem:[%s7786_s24] sm:$0xff]  ;;  %v6566_v6 = vld [vmem:[%s7754_s21 + $0x8] sm:$0xff]  ;;  %s7464_s24 = smov 32  }
 0x2be   : > { %v6547_v7 = vld [vmem:[#allocation2] sm:$0xff]  ;;  %v6548_v9 = vld [vmem:[#allocation2 + $0x8] sm:$0xff] }
 0x2bf   : > { %1506 = vmatpush.bf16.msra.mxu0 %v6554_v53  ;;  %v6565_v8 = vld [vmem:[%s7754_s21] sm:$0xff]  ;;  %s7462_s21 = smov 96  }
 0x2c0   : > { %1590 = vmatpush.bf16.msra.mxu1 %v6562_v54  ;;  %v1425_v12 = vld [vmem:[%s7791_s15] sm:$0xff] }
 0x2c1   : > { %1674 = vmatpush.bf16.msra.mxu2 %v6570_v58  ;;  %v1443_v13 = vperm.slane %v1425_v12, 0  ;;  %v1539_v14 = vperm.slane %v1425_v12, 1  ;;  %v7929_v34 = vperm.slane %v1425_v12, 2 }
 0x2c3   : > { %1507 = vmatpush.bf16.msra.mxu0 %v6553_v56  ;;  %10148 = vst [vmem:[#allocation29_spill] sm:$0xff] %v7929_v34 }
 0x2c4   : > { %1591 = vmatpush.bf16.msra.mxu1 %v6561_v57  ;;  %v7466_v57 = vmov 1934713408  }
 0x2c5   : > { %1675 = vmatpush.bf16.msra.mxu2 %v6569_v61  ;;  %v1761_v58 = vunpack.c.l.s4 %v7466_v57 }
 0x2c7   : > { %1508 = vmatpush.bf16.msra.mxu0 %v6552_v59 }
 0x2c8   : > { %1592 = vmatpush.bf16.msra.mxu1 %v6560_v60 }
 0x2c9   : > { %1676 = vmatpush.bf16.msra.mxu2 %v6568_v0 }
 0x2cb   : > { %1509 = vmatpush.bf16.msra.mxu0 %v6551_v62 }
 0x2cc   : > { %1593 = vmatpush.bf16.msra.mxu1 %v6559_v63 }
 0x2cd   : > { %1677 = vmatpush.bf16.msra.mxu2 %v6567_v3 }
 0x2cf   : > { %1510 = vmatpush.bf16.msra.mxu0 %v6550_v1 }
 0x2d0   : > { %1594 = vmatpush.bf16.msra.mxu1 %v6558_v2 }
 0x2d1   : > { %1678 = vmatpush.bf16.msra.mxu2 %v6566_v6 }
 0x2d3   : > { %1511 = vmatpush.bf16.msra.mxu0 %v6549_v4 }
 0x2d4   : > { %1595 = vmatpush.bf16.msra.mxu1 %v6557_v5 }
 0x2d5   : > { %1679 = vmatpush.bf16.msra.mxu2 %v6565_v8 }
 0x2d6   : > { %1512 = vmatmul.bf16.vlgmr.msra.gmra.mxu0 %v6547_v7 }
 0x2d7   : > { %1596 = vmatmul.bf16.vlgmr.msra.gmra.mxu1 %v6547_v7 }
 0x2d8   : > { %1680 = vmatmul.bf16.vlgmr.msra.gmra.mxu2 %v6547_v7 }
 0x2e6   : > { %1517 = vmatmul.bf16.gmra.mxu0 %v6548_v9 }
 0x2e7   : > { %1601 = vmatmul.bf16.gmra.mxu1 %v6548_v9 }
 0x2e8   : > { %1685 = vmatmul.bf16.gmra.mxu2 %v6548_v9 }
 0x353   : > { %v1513_v10 = vpop.f32.mrf.mxu0 }
 0x354   : > { %v1597_v11 = vpop.f32.mrf.mxu1  ;;  %v7896_v15 = vadd.f32 %v1513_v10, %v1443_v13 }
 0x355   : > { %v7898_v18 = vadd.f32 %v1597_v11, %v1539_v14  ;;  %v7962_v11 = vunpack.c.0.s8 %v1761_v58 }
 0x356   : > { %v1734_v63 = vrot.slane %v7896_v15, 4 }
 0x357   : > { %v1998_v56 = vrot.slane %v7898_v18, 4  ;;  %10150 = vst [vmem:[#allocation31_spill] sm:$0xff] %v7962_v11 }
 0x35b   : > { %v1515_v16 = vpop.f32.mrf.mxu0  ;;  %v1681_v28 = vpop.f32.mrf.mxu2 }
 0x35c   : > { %v1599_v17 = vpop.f32.mrf.mxu1  ;;  %v7900_v19 = vadd.f32 %v1515_v16, %v1443_v13  ;;  %v7934_v36 = vadd.f32 %v1681_v28, %v7929_v34 }
 0x35d   : > { %v7902_v20 = vadd.f32 %v1599_v17, %v1539_v14 }
 0x35e   : > { %v6886_v22 = vpack.i.bf16 %v7900_v19, %v7896_v15  ;;  %v1790_v62 = vrot.slane %v7900_v19, 4 }
 0x35f   : > { %v6876_v21 = vpack.i.bf16 %v7902_v20, %v7898_v18  ;;  %v2054_v55 = vrot.slane %v7902_v20, 4 }
 0x360   : > { %6887 = vrot.lane.b32.xlu2 %v6886_v22, %s7464_s24 }
 0x361   : > { %6877 = vrot.lane.b32.xlu1 %v6876_v21, %s7462_s21  ;;  %6867 = vrot.lane.b32.xlu0 %v6876_v21, %s7463_s28 }
 0x363   : > { %v1518_v24 = vpop.f32.mrf.mxu0  ;;  %v1683_v35 = vpop.f32.mrf.mxu2 }
 0x364   : > { %v1602_v23 = vpop.f32.mrf.mxu1  ;;  %v7920_v31 = vadd.f32 %v1518_v24, %v1443_v13  ;;  %v7938_v37 = vadd.f32 %v1683_v35, %v7929_v34 }
 0x365   : > { %v7914_v25 = vadd.f32 %v1602_v23, %v1539_v14 }
 0x366   : > { %v6926_v39 = vpack.i.bf16 %v7938_v37, %v7934_v36  ;;  %v1846_v3 = vrot.slane %v7920_v31, 4 }
 0x367   : > { %v2110_v60 = vrot.slane %v7914_v25, 4 }
 0x368   : > { %6892 = vrot.lane.b32.xlu2 %v6886_v22, %s7462_s21 }
 0x369   : > { %6872 = vrot.lane.b32.xlu0 %v6876_v21, %s7464_s24  ;;  %6882 = vrot.lane.b32.xlu1 %v6886_v22, %s7463_s28 }
 0x36b   : > { %v1520_v29 = vpop.f32.mrf.mxu0 }
 0x36c   : > { %v1604_v26 = vpop.f32.mrf.mxu1  ;;  %v7924_v32 = vadd.f32 %v1520_v29, %v1443_v13 }
 0x36d   : > { %v7916_v27 = vadd.f32 %v1604_v26, %v1539_v14 }
 0x36e   : > { %v6911_v33 = vpack.i.bf16 %v7924_v32, %v7920_v31  ;;  %v1902_v10 = vrot.slane %v7924_v32, 4 }
 0x36f   : > { %v6896_v30 = vpack.i.bf16 %v7916_v27, %v7914_v25  ;;  %v2166_v2 = vrot.slane %v7916_v27, 4 }
 0x371   : > { %6897 = vrot.lane.b32.xlu0 %v6896_v30, %s7464_s24  ;;  %6902 = vrot.lane.b32.xlu1 %v6896_v30, %s7462_s21 }
 0x372   : > { %6907 = vrot.lane.b32.xlu2 %v6896_v30, %s7463_s28 }
 0x379   : > { %6912 = vrot.lane.b32.xlu0 %v6911_v33, %s7464_s24  ;;  %6917 = vrot.lane.b32.xlu1 %v6911_v33, %s7462_s21 }
 0x37a   : > { %6922 = vrot.lane.b32.xlu2 %v6911_v33, %s7463_s28 }
 0x382   : > { %6927 = vrot.lane.b32.xlu2 %v6926_v39, %s7463_s28 }
 0x38a   : > { %6932 = vrot.lane.b32.xlu2 %v6926_v39, %s7464_s24 }
 0x392   : > { %6937 = vrot.lane.b32.xlu2 %v6926_v39, %s7462_s21 }
 0x3ba   : > { %v6888_v40 = vpop.permute.xlu2 %6887 }
 0x3bb   : > { %v6889_v38 = vunpack.i.l.bf16 %v6888_v40  ;;  %v6890_v44 = vunpack.i.h.bf16 %v6888_v40 }
 0x3bd   : > { %v1744_v45 = vrot.slane %v6889_v38, 4  ;;  %v1800_v50 = vrot.slane %v6890_v44, 4 }
 0x3c2   : > { %v6893_v41 = vpop.permute.xlu2 %6892 }
 0x3c3   : > { %v6894_v46 = vunpack.i.l.bf16 %v6893_v41  ;;  %v6895_v47 = vunpack.i.h.bf16 %v6893_v41 }
 0x3c5   : > { %v1745_v51 = vsel %vm1732_vm3, %v1744_v45, %v6894_v46  ;;  %v1746_v52 = vrot.slane %v6894_v46, 4  ;;  %v1802_v53 = vrot.slane %v6895_v47, 4  ;;  %v1801_v1 = vsel %vm1732_vm3, %v1800_v50, %v6895_v47 }
 0x3c6   : > { %v7951_v59 = vperm.slane %v1745_v51, %v7945_v49  ;;  %v7969_v16 = vperm.slane %v1801_v1, %v7945_v49 }
 0x3c7   : > { %v1747_v0 = vsel %vm1732_vm3, %v6889_v38, %v1746_v52  ;;  %v1803_v4 = vsel %vm1732_vm3, %v6890_v44, %v1802_v53 }
 0x3c8   : > { %v7965_v13 = vperm.slane %v1747_v0, %v7945_v49  ;;  %v1756_v14 = vrot.slane %v7951_v59, 4  ;;  %v7972_v21 = vperm.slane %v1803_v4, %v7945_v49  ;;  %v1812_v38 = vrot.slane %v7969_v16, 4 }
 0x3cc   : > { %v6908_v61 = vpop.permute.xlu2 %6907 }
 0x3cd   : > { %v6910_v5 = vunpack.i.h.bf16 %v6908_v61  ;;  %v6909_v8 = vunpack.i.l.bf16 %v6908_v61 }
 0x3cf   : > { %v2167_v22 = vsel %vm1732_vm3, %v6910_v5, %v2166_v2  ;;  %v2164_v26 = vrot.slane %v6910_v5, 4  ;;  %v2111_v28 = vsel %vm1732_vm3, %v6909_v8, %v2110_v60  ;;  %v2108_v33 = vrot.slane %v6909_v8, 4 }
 0x3d0   : > { %v7978_v41 = vperm.slane %v2167_v22, %v7945_v49  ;;  %v7982_v44 = vperm.slane %v2111_v28, %v7945_v49  ;;  %v1824_v2 = vrot.slane %v7972_v21, 4 }
 0x3d3   : > { %v6868_v48 = vpop.permute.xlu0 %6867  ;;  %v6878_v54 = vpop.permute.xlu1 %6877 }
 0x3d4   : > { %v6879_v6 = vunpack.i.l.bf16 %v6878_v54  ;;  %v6869_v7 = vunpack.i.l.bf16 %v6868_v48  ;;  %v6870_v9 = vunpack.i.h.bf16 %v6868_v48  ;;  %v6880_v17 = vunpack.i.h.bf16 %v6878_v54  ;;  %v6923_v52 = vpop.permute.xlu2 %6922 }
 0x3d5   : > { %v2165_v48 = vsel %vm1732_vm3, %v2164_v26, %v7916_v27  ;;  %v2109_v54 = vsel %vm1732_vm3, %v2108_v33, %v7914_v25  ;;  %v6925_v60 = vunpack.i.h.bf16 %v6923_v52 }
 0x3d6   : > { %v2010_v29 = vrot.slane %v6879_v6, 4  ;;  %v1996_v30 = vrot.slane %v6869_v7, 4  ;;  %v2052_v35 = vrot.slane %v6870_v9, 4  ;;  %v2066_v42 = vrot.slane %v6880_v17, 4 }
 0x3d7   : > { %v1999_v45 = vsel %vm1732_vm3, %v6869_v7, %v1998_v56  ;;  %v2055_v50 = vsel %vm1732_vm3, %v6870_v9, %v2054_v55  ;;  %v6924_v55 = vunpack.i.l.bf16 %v6923_v52  ;;  %v1903_v33 = vsel %vm1732_vm3, %v6925_v60, %v1902_v10 }
 0x3d8   : > { %v1997_v51 = vsel %vm1732_vm3, %v1996_v30, %v7898_v18  ;;  %v2053_v56 = vsel %vm1732_vm3, %v2052_v35, %v7902_v20  ;;  %v2007_v27 = vperm.slane %v1999_v45, %v7945_v49  ;;  %v8002_v18 = vperm.slane %v2165_v48, %v7945_v49 }
 0x3d9   : > { %v2063_v0 = vperm.slane %v2055_v50, %v7945_v49  ;;  %v2003_v25 = vperm.slane %v1997_v51, %v7945_v49  ;;  %v1768_v20 = vrot.slane %v7965_v13, 4  ;;  %v2059_v5 = vperm.slane %v2053_v56, %v7945_v49 }
 0x3da   : > { %v1844_v22 = vrot.slane %v6924_v55, 4  ;;  %v1847_v10 = vsel %vm1732_vm3, %v6924_v55, %v1846_v3 }
 0x3db   : > { %v6873_v12 = vpop.permute.xlu0 %6872  ;;  %v2090_v26 = vrot.slane %v2063_v0, 4  ;;  %v2022_v28 = vrot.slane %v2003_v25, 4  ;;  %v2078_v30 = vrot.slane %v2059_v5, 4 }
 0x3dc   : > { %v6875_v23 = vunpack.i.h.bf16 %v6873_v12  ;;  %v6874_v24 = vunpack.i.l.bf16 %v6873_v12  ;;  %v2034_v12 = vrot.slane %v2007_v27, 4  ;;  %v8031_v50 = vpop.permute.xlu2 %6927 }
 0x3de   : > { %v2064_v39 = vrot.slane %v6875_v23, 4  ;;  %v2008_v40 = vrot.slane %v6874_v24, 4  ;;  %v2011_v43 = vsel %vm1732_vm3, %v6874_v24, %v2010_v29  ;;  %v2067_v53 = vsel %vm1732_vm3, %v6875_v23, %v2066_v42 }
 0x3df   : > { %v2019_v58 = vperm.slane %v2011_v43, %v7945_v49  ;;  %v2075_v1 = vperm.slane %v2067_v53, %v7945_v49 }
 0x3e0   : > { %v2065_v46 = vsel %vm1732_vm3, %v2064_v39, %v6880_v17  ;;  %v2009_v47 = vsel %vm1732_vm3, %v2008_v40, %v6879_v6  ;;  %v8012_v6 = vperm.slane %v2109_v54, %v7945_v49  ;;  %v1900_v17 = vrot.slane %v6925_v60, 4 }
 0x3e1   : > { %v2015_v57 = vperm.slane %v2009_v47, %v7945_v49  ;;  %v2071_v61 = vperm.slane %v2065_v46, %v7945_v49  ;;  %v2032_v9 = vrot.slane %v2019_v58, 4  ;;  %v2088_v29 = vrot.slane %v2075_v1, 4 }
 0x3e2   : > { %v2035_v35 = vsel %vm1732_vm3, %v2019_v58, %v2034_v12  ;;  %v2318_v39 = vrot.slane %v7938_v37, 4  ;;  %v2091_v45 = vsel %vm1732_vm3, %v2075_v1, %v2090_v26  ;;  %v1901_v46 = vsel %vm1732_vm3, %v1900_v17, %v7924_v32  ;;  %v8069_v1 = vpop.permute.xlu1 %6882 }
 0x3e3   : > { %v2020_v8 = vrot.slane %v2015_v57, 4  ;;  %v2076_v23 = vrot.slane %v2071_v61, 4  ;;  %v2023_v42 = vsel %vm1732_vm3, %v2015_v57, %v2022_v28  ;;  %v2033_v43 = vsel %vm1732_vm3, %v2032_v9, %v2007_v27 }
 0x3e4   : > { %v1845_v47 = vsel %vm1732_vm3, %v1844_v22, %v7920_v31  ;;  %v8034_v51 = vperm.slane %v2035_v35, %v7962_v11  ;;  %v2079_v52 = vsel %vm1732_vm3, %v2071_v61, %v2078_v30  ;;  %v2089_v53 = vsel %vm1732_vm3, %v2088_v29, %v2063_v0 }
 0x3e5   : > { %v2021_v40 = vsel %vm1732_vm3, %v2020_v8, %v2003_v25  ;;  %v2077_v48 = vsel %vm1732_vm3, %v2076_v23, %v2059_v5  ;;  %v6930_v32 = vunpack.i.h.bf16 %v8031_v50  ;;  %v8041_v56 = vperm.slane %v2023_v42, %v7962_v11 }
 0x3e6   : > { %v2027_v54 = vperm.slane %v2021_v40, %v7962_v11  ;;  %v8044_v31 = vperm.slane %v2033_v43, %v7962_v11  ;;  %v8047_v3 = vperm.slane %v2091_v45, %v7962_v11  ;;  %v8051_v58 = vperm.slane %v1901_v46, %v7945_v49 }
 0x3e7   : > { %v8054_v27 = vperm.slane %v1903_v33, %v7945_v49  ;;  %v8057_v60 = vperm.slane %v2077_v48, %v7962_v11  ;;  %v8060_v55 = vperm.slane %v1845_v47, %v7945_v49  ;;  %v8063_v61 = vperm.slane %v2079_v52, %v7962_v11 }
 0x3e8   : > { %v8066_v0 = vperm.slane %v2089_v53, %v7962_v11  ;;  %v2262_v25 = vrot.slane %v7934_v36, 4  ;;  %v8072_v5 = vperm.slane %v1847_v10, %v7945_v49  ;;  %v2050_v8 = vrot.slane %v8034_v51, 4 }
 0x3e9   : > { %v2316_v9 = vrot.slane %v6930_v32, 4  ;;  %v2319_v12 = vsel %vm1732_vm3, %v6930_v32, %v2318_v39  ;;  %v2044_v17 = vrot.slane %v2027_v54, 4  ;;  %v2046_v22 = vrot.slane %v8041_v56, 4 }
 0x3ea   : > { %v2048_v23 = vrot.slane %v8044_v31, 4  ;;  %v2106_v26 = vrot.slane %v8047_v3, 4  ;;  %v2100_v30 = vrot.slane %v8057_v60, 4  ;;  %v6885_v33 = vunpack.i.h.bf16 %v8069_v1 }
 0x3eb   : > { %v2102_v40 = vrot.slane %v8063_v61, 4  ;;  %v2104_v39 = vrot.slane %v8066_v0, 4  ;;  %v6929_v42 = vunpack.i.l.bf16 %v8031_v50  ;;  %v8089_v45 = vsel %vm1732_vm3, 0.0, %v2050_v8 }
 0x3ec   : > { %v8093_v46 = vsel %vm1732_vm3, %v2316_v9, %v7938_v37  ;;  %v8096_v47 = vperm.slane %v2319_v12, %v7945_v49  ;;  %v2045_v10 = vsel %vm1732_vm3, 0.0, %v2044_v17  ;;  %v2047_v48 = vsel %vm1732_vm3, 0.0, %v2046_v22 }
 0x3ed   : > { %v2049_v52 = vsel %vm1732_vm3, 0.0, %v2048_v23  ;;  %v8102_v53 = vsel %vm1732_vm3, 0.0, %v2106_v26  ;;  %v2101_v32 = vsel %vm1732_vm3, 0.0, %v2100_v30  ;;  %v2532_v8 = vpack.c.bf16 %v2027_v54, %v2027_v54 }
 0x3ee   : > { %v1788_v43 = vrot.slane %v6885_v33, 4  ;;  %v1791_v37 = vsel %vm1732_vm3, %v6885_v33, %v1790_v62  ;;  %v2103_v9 = vsel %vm1732_vm3, 0.0, %v2102_v40  ;;  %v2105_v12 = vsel %vm1732_vm3, 0.0, %v2104_v39 }
 0x3ef   : > { %v2534_v17 = vpack.c.bf16 %v8041_v56, %v8041_v56  ;;  %v1799_v22 = vperm.slane %v1791_v37, %v7945_v49  ;;  %v2533_v23 = vpack.c.bf16 %v2045_v10, %v2045_v10  ;;  %v2535_v26 = vpack.c.bf16 %v2047_v48, %v2047_v48 }
 0x3f0   : > { %v1789_v30 = vsel %vm1732_vm3, %v1788_v43, %v7900_v19  ;;  %v6884_v54 = vunpack.i.l.bf16 %v8069_v1  ;;  %v2536_v35 = vpack.c.bf16 %v8044_v31, %v8044_v31  ;;  %v2537_v62 = vpack.c.bf16 %v2049_v52, %v2049_v52 }
 0x3f1   : > { %v2538_v33 = vpack.c.bf16 %v8034_v51, %v8034_v51  ;;  %v1795_v40 = vperm.slane %v1789_v30, %v7945_v49  ;;  %v2540_v56 = vpack.c.bf16 %v8057_v60, %v8057_v60  ;;  %v2541_v39 = vpack.c.bf16 %v2101_v32, %v2101_v32 }
 0x3f2   : > { %v2542_v10 = vpack.c.bf16 %v8063_v61, %v8063_v61  ;;  %v1826_v48 = vrot.slane %v1799_v22, 4  ;;  %v2543_v19 = vpack.c.bf16 %v2103_v9, %v2103_v9  ;;  %v2544_v1 = vpack.c.bf16 %v8066_v0, %v8066_v0 }
 0x3f3   : > { %v2545_v43 = vpack.c.bf16 %v2105_v12, %v2105_v12  ;;  %v1814_v31 = vrot.slane %v1795_v40, 4  ;;  %v2546_v52 = vpack.c.bf16 %v8047_v3, %v8047_v3  ;;  %v2712_v51 = vunpack.c.l.b16 %v2532_v8 }
 0x3f4   : > { %v2713_v37 = vunpack.c.l.b16 %v2533_v23  ;;  %v1731_v30 = vrot.slane %v6884_v54, 4  ;;  %v2714_v29 = vunpack.c.l.b16 %v2534_v17  ;;  %v2715_v28 = vunpack.c.l.b16 %v2535_v26 }
 0x3f5   : > { %v2716_v60 = vunpack.c.l.b16 %v2536_v35  ;;  %v1825_v61 = vsel %vm1732_vm3, %v1824_v2, %v1799_v22  ;;  %v2717_v32 = vunpack.c.l.b16 %v2537_v62  ;;  %v2718_v9 = vunpack.c.l.b16 %v2538_v33 }
 0x3f6   : > { %v1813_v0 = vsel %vm1732_vm3, %v1812_v38, %v1795_v40  ;;  %v1827_v12 = vsel %vm1732_vm3, %v7972_v21, %v1826_v48  ;;  %v2720_v3 = vunpack.c.l.b16 %v2540_v56  ;;  %v2721_v8 = vunpack.c.l.b16 %v2541_v39 }
 0x3f7   : > { %v2722_v23 = vunpack.c.l.b16 %v2542_v10  ;;  %v1815_v17 = vsel %vm1732_vm3, %v7969_v16, %v1814_v31  ;;  %v2723_v35 = vunpack.c.l.b16 %v2543_v19  ;;  %v2724_v26 = vunpack.c.l.b16 %v2544_v1 }
 0x3f8   : > { %v1831_v7 = vperm.slane %v1825_v61, %v7962_v11  ;;  %v1733_v2 = vsel %vm1732_vm3, %v1731_v30, %v7896_v15  ;;  %v2725_v22 = vunpack.c.l.b16 %v2545_v43  ;;  %v2726_v62 = vunpack.c.l.b16 %v2546_v52 }
 0x3f9   : > { %v1819_v38 = vperm.slane %v1813_v0, %v7962_v11  ;;  %v1835_v33 = vperm.slane %v1827_v12, %v7962_v11  ;;  %v8144_v21 = vunpack.i.l.s16 %v2712_v51  ;;  %v8146_v40 = vunpack.i.l.s16 %v2713_v37 }
 0x3fa   : > { %v8148_v56 = vunpack.i.l.s16 %v2714_v29  ;;  %v1823_v16 = vperm.slane %v1815_v17, %v7962_v11  ;;  %v8151_v39 = vunpack.i.l.s16 %v2715_v28  ;;  %v8153_v10 = vunpack.i.l.s16 %v2716_v60 }
 0x3fb   : > { %v1735_v48 = vsel %vm1732_vm3, %v6884_v54, %v1734_v63  ;;  %v1739_v19 = vperm.slane %v1733_v2, %v7945_v49  ;;  %v8159_v1 = vunpack.i.l.s16 %v2717_v32  ;;  %v8161_v43 = vunpack.i.l.s16 %v2718_v9 }
 0x3fc   : > { %v8163_v31 = vunpack.i.l.s16 %v2720_v3  ;;  %v1840_v29 = vrot.slane %v1831_v7, 4  ;;  %v8165_v52 = vunpack.i.l.s16 %v2721_v8  ;;  %v2260_v28 = vrot.slane %v6929_v42, 4 }
 0x3fd   : > { %v1836_v51 = vrot.slane %v1819_v38, 4  ;;  %v1842_v37 = vrot.slane %v1835_v33, 4  ;;  %v8169_v30 = vunpack.i.l.s16 %v2722_v23  ;;  %v8171_v15 = vunpack.i.l.s16 %v2723_v35 }
 0x3fe   : > { %v1838_v63 = vrot.slane %v1823_v16, 4  ;;  %v1743_v54 = vperm.slane %v1735_v48, %v7945_v49  ;;  %v8174_v60 = vunpack.i.l.s16 %v2724_v26  ;;  %v8176_v61 = vunpack.i.l.s16 %v2725_v22 }
 0x3ff   : > { %10151 = vst [vmem:[#allocation32_spill] sm:$0xff] %v8169_v30  ;;  %v8178_v32 = vunpack.i.l.s16 %v2726_v62  ;;  %v1758_v9 = vrot.slane %v1739_v19, 4  ;;  %v8182_v0 = vperm.slane %v8093_v46, %v7945_v49  ;;  %v1841_v3 = vsel %vm1732_vm3, 0.0, %v1840_v29 }
 0x400   : > { %v2508_v8 = vpack.c.bf16 %v1819_v38, %v1819_v38  ;;  %v2261_v23 = vsel %vm1732_vm3, %v2260_v28, %v7934_v36  ;;  %v2263_v17 = vsel %vm1732_vm3, %v6929_v42, %v2262_v25  ;;  %v1837_v35 = vsel %vm1732_vm3, 0.0, %v1836_v51  ;;  %v8204_v51 = vpop.permute.xlu0 %6897 }
 0x401   : > { %10152 = vst [vmem:[#allocation33_spill] sm:$0xff] %v8178_v32  ;;  %v1843_v26 = vsel %vm1732_vm3, 0.0, %v1842_v37  ;;  %v1839_v46 = vsel %vm1732_vm3, 0.0, %v1838_v63  ;;  %v2512_v2 = vpack.c.bf16 %v1831_v7, %v1831_v7  ;;  %v1757_v22 = vsel %vm1732_vm3, %v1756_v14, %v1739_v19 }
 0x402   : > { %v1769_v62 = vsel %vm1732_vm3, %v1768_v20, %v1743_v54  ;;  %v2510_v36 = vpack.c.bf16 %v1823_v16, %v1823_v16  ;;  %v2513_v38 = vpack.c.bf16 %v1841_v3, %v1841_v3  ;;  %v1759_v50 = vsel %vm1732_vm3, %v7951_v59, %v1758_v9 }
 0x403   : > { %v1770_v25 = vrot.slane %v1743_v54, 4  ;;  %v2509_v42 = vpack.c.bf16 %v1837_v35, %v1837_v35  ;;  %v2514_v48 = vpack.c.bf16 %v1835_v33, %v1835_v33  ;;  %v2515_v29 = vpack.c.bf16 %v1843_v26, %v1843_v26 }
 0x404   : > { %v2620_v28 = vunpack.c.l.b16 %v2508_v8  ;;  %v8207_v7 = vperm.slane %v2261_v23, %v7945_v49  ;;  %v8210_v14 = vperm.slane %v2263_v17, %v7945_v49  ;;  %v2511_v19 = vpack.c.bf16 %v1839_v46, %v1839_v46 }
 0x405   : > { %v1763_v20 = vperm.slane %v1757_v22, %v7962_v11  ;;  %v2624_v37 = vunpack.c.l.b16 %v2512_v2  ;;  %v1767_v59 = vperm.slane %v1759_v50, %v7962_v11  ;;  %v1775_v33 = vperm.slane %v1769_v62, %v7962_v11 }
 0x406   : > { %v2622_v63 = vunpack.c.l.b16 %v2510_v36  ;;  %v2625_v54 = vunpack.c.l.b16 %v2513_v38  ;;  %v1771_v9 = vsel %vm1732_vm3, %v7965_v13, %v1770_v25  ;;  %v6900_v3 = vunpack.i.h.bf16 %v8204_v51  ;;  %v6903_v13 = vpop.permute.xlu1 %6902 }
 0x407   : > { %v2621_v8 = vunpack.c.l.b16 %v2509_v42  ;;  %v2626_v23 = vunpack.c.l.b16 %v2514_v48  ;;  %v2627_v17 = vunpack.c.l.b16 %v2515_v29  ;;  %v8219_v35 = vunpack.i.l.s16 %v2620_v28  ;;  %v8231_v28 = vpop.permute.xlu2 %6932 }
 0x408   : > { %v2623_v2 = vunpack.c.l.b16 %v2511_v19  ;;  %v1780_v22 = vrot.slane %v1763_v20, 4  ;;  %v8223_v50 = vunpack.i.l.s16 %v2624_v37  ;;  %v1779_v62 = vperm.slane %v1771_v9, %v7962_v11 }
 0x409   : > { %10153 = vst [vmem:[#allocation34_spill] sm:$0xff] %v8219_v35  ;;  %v1782_v36 = vrot.slane %v1767_v59, 4  ;;  %v1784_v38 = vrot.slane %v1775_v33, 4  ;;  %v8226_v25 = vunpack.i.l.s16 %v2622_v63  ;;  %v8228_v42 = vunpack.i.l.s16 %v2625_v54 }
 0x40a   : > { %10154 = vst [vmem:[#allocation35_spill] sm:$0xff] %v8223_v50  ;;  %v2176_v48 = vrot.slane %v6900_v3, 4  ;;  %v6899_v29 = vunpack.i.l.bf16 %v8204_v51  ;;  %v8233_v12 = vunpack.i.l.s16 %v2621_v8  ;;  %v8235_v19 = vunpack.i.l.s16 %v2626_v23 }
 0x40b   : > { %10155 = vst [vmem:[#allocation36_spill] sm:$0xff] %v8226_v25  ;;  %v8237_v37 = vunpack.i.l.s16 %v2627_v17  ;;  %v8240_v46 = vunpack.i.l.s16 %v2623_v2  ;;  %v1781_v63 = vsel %vm1732_vm3, 0.0, %v1780_v22  ;;  %v6905_v16 = vunpack.i.h.bf16 %v6903_v13 }
 0x40c   : > { %10156 = vst [vmem:[#allocation37_spill] sm:$0xff] %v8228_v42  ;;  %v1783_v26 = vsel %vm1732_vm3, 0.0, %v1782_v36  ;;  %v1785_v51 = vsel %vm1732_vm3, 0.0, %v1784_v38  ;;  %v1786_v57 = vrot.slane %v1779_v62, 4  ;;  %v2500_v8 = vpack.c.bf16 %v1763_v20, %v1763_v20 }
 0x40d   : > { %10157 = vst [vmem:[#allocation38_spill] sm:$0xff] %v8233_v12  ;;  %v2120_v4 = vrot.slane %v6899_v29, 4  ;;  %v2177_v23 = vsel %vm1732_vm3, %v2176_v48, %v6905_v16  ;;  %v2178_v17 = vrot.slane %v6905_v16, 4  ;;  %v6904_v24 = vunpack.i.l.bf16 %v6903_v13 }
 0x40e   : > { %10158 = vst [vmem:[#allocation39_spill] sm:$0xff] %v8235_v19  ;;  %v2501_v34 = vpack.c.bf16 %v1781_v63, %v1781_v63  ;;  %v2502_v9 = vpack.c.bf16 %v1767_v59, %v1767_v59  ;;  %v2504_v2 = vpack.c.bf16 %v1775_v33, %v1775_v33  ;;  %v2503_v22 = vpack.c.bf16 %v1783_v26, %v1783_v26 }
 0x40f   : > { %10159 = vst [vmem:[#allocation40_spill] sm:$0xff] %v8237_v37  ;;  %v2183_v37 = vperm.slane %v2177_v23, %v7945_v49  ;;  %v2505_v19 = vpack.c.bf16 %v1785_v51, %v1785_v51  ;;  %v2506_v54 = vpack.c.bf16 %v1779_v62, %v1779_v62  ;;  %v2179_v42 = vsel %vm1732_vm3, %v6900_v3, %v2178_v17 }
 0x410   : > { %10160 = vst [vmem:[#allocation41_spill] sm:$0xff] %v8240_v46  ;;  %v2612_v36 = vunpack.c.l.b16 %v2500_v8  ;;  %v2187_v38 = vperm.slane %v2179_v42, %v7945_v49  ;;  %v10161_v20 = vrot.slane %v8002_v18, 4  ;;  %v1787_v16 = vsel %vm1732_vm3, 0.0, %v1786_v57 }
 0x411   : > { %v2188_v50 = vrot.slane %v2183_v37, 4  ;;  %v2121_v33 = vsel %vm1732_vm3, %v2120_v4, %v6904_v24  ;;  %v2122_v13 = vrot.slane %v6904_v24, 4  ;;  %v2613_v26 = vunpack.c.l.b16 %v2501_v34 }
 0x412   : > { %v2191_v48 = vsel %vm1732_vm3, %v2183_v37, %v10161_v20  ;;  %v2614_v63 = vunpack.c.l.b16 %v2502_v9  ;;  %v2200_v62 = vrot.slane %v2187_v38, 4  ;;  %v2615_v51 = vunpack.c.l.b16 %v2503_v22  ;;  %v8260_v37 = vpop.permute.xlu2 %6937 }
 0x413   : > { %v2199_v59 = vperm.slane %v2191_v48, %v7962_v11  ;;  %v2189_v3 = vsel %vm1732_vm3, %v2188_v50, %v8002_v18  ;;  %v2616_v42 = vunpack.c.l.b16 %v2504_v2  ;;  %v2507_v57 = vpack.c.bf16 %v1787_v16, %v1787_v16 }
 0x414   : > { %v2195_v23 = vperm.slane %v2189_v3, %v7962_v11  ;;  %v2617_v17 = vunpack.c.l.b16 %v2505_v19  ;;  %v2201_v4 = vsel %vm1732_vm3, %v2200_v62, %v7978_v41  ;;  %v2127_v34 = vperm.slane %v2121_v33, %v7945_v49 }
 0x415   : > { %v2618_v24 = vunpack.c.l.b16 %v2506_v54  ;;  %v8265_v9 = vunpack.i.l.s16 %v2612_v36  ;;  %v2214_v18 = vrot.slane %v2199_v59, 4  ;;  %v2123_v50 = vsel %vm1732_vm3, %v6899_v29, %v2122_v13 }
 0x416   : > { %v8268_v2 = vunpack.i.l.s16 %v2613_v26  ;;  %v8270_v22 = vunpack.i.l.s16 %v2614_v63  ;;  %v10165_v20 = vunpack.i.l.bf16 %v8231_v28  ;;  %v6939_v19 = vunpack.i.l.bf16 %v8260_v37 }
 0x417   : > { %10162 = vst [vmem:[#allocation42_spill] sm:$0xff] %v8265_v9  ;;  %v8275_v16 = vunpack.i.l.s16 %v2615_v51  ;;  %v8277_v3 = vunpack.i.l.s16 %v2616_v42  ;;  %v2207_v54 = vperm.slane %v2201_v4, %v7962_v11  ;;  %v2212_v36 = vrot.slane %v2195_v23, 4 }
 0x418   : > { %10163 = vst [vmem:[#allocation43_spill] sm:$0xff] %v8268_v2  ;;  %v2272_v48 = vrot.slane %v10165_v20, 4  ;;  %v8280_v33 = vunpack.i.l.s16 %v2617_v17  ;;  %v10169_v29 = vrot.slane %v7978_v41, 4  ;;  %v2131_v26 = vperm.slane %v2123_v50, %v7945_v49 }
 0x419   : > { %10164 = vst [vmem:[#allocation44_spill] sm:$0xff] %v8270_v22  ;;  %v2132_v63 = vrot.slane %v2127_v34, 4  ;;  %v2619_v62 = vunpack.c.l.b16 %v2507_v57  ;;  %v8286_v20 = vunpack.i.l.s16 %v2618_v24  ;;  %v2215_v42 = vsel %vm1732_vm3, 0.0, %v2214_v18  ;;  %v8296_v57 = vpop.permute.xlu0 %6912 }
 0x41a   : > { %10166 = vst [vmem:[#allocation45_spill] sm:$0xff] %v8275_v16  ;;  %v2203_v13 = vsel %vm1732_vm3, %v2187_v38, %v10169_v29  ;;  %v2558_v8 = vpack.c.bf16 %v2199_v59, %v2199_v59  ;;  %v6940_v4 = vunpack.i.h.bf16 %v8260_v37  ;;  %v2273_v17 = vsel %vm1732_vm3, %v2272_v48, %v6939_v19 }
 0x41b   : > { %10167 = vst [vmem:[#allocation46_spill] sm:$0xff] %v8277_v3  ;;  %v2274_v46 = vrot.slane %v6939_v19, 4  ;;  %v8293_v41 = vperm.slane %v2203_v13, %v7962_v11  ;;  %v2213_v38 = vsel %vm1732_vm3, 0.0, %v2212_v36  ;;  %v2216_v50 = vrot.slane %v2207_v54, 4 }
 0x41c   : > { %10168 = vst [vmem:[#allocation47_spill] sm:$0xff] %v8280_v33  ;;  %v2556_v29 = vpack.c.bf16 %v2195_v23, %v2195_v23  ;;  %v2559_v24 = vpack.c.bf16 %v2215_v42, %v2215_v42  ;;  %v2133_v51 = vsel %vm1732_vm3, %v2132_v63, %v8012_v6  ;;  %v10171_v59 = vrot.slane %v8012_v6, 4 }
 0x41d   : > { %10170 = vst [vmem:[#allocation48_spill] sm:$0xff] %v8286_v20  ;;  %v2144_v18 = vrot.slane %v2131_v26, 4  ;;  %v8303_v48 = vunpack.i.l.s16 %v2619_v62  ;;  %v10173_v19 = vunpack.i.h.bf16 %v8231_v28  ;;  %v2560_v25 = vpack.c.bf16 %v2207_v54, %v2207_v54 }
 0x41e   : > { %v2135_v37 = vsel %vm1732_vm3, %v2127_v34, %v10171_v59  ;;  %v2562_v23 = vpack.c.bf16 %v8293_v41, %v8293_v41  ;;  %v2557_v36 = vpack.c.bf16 %v2213_v38, %v2213_v38  ;;  %v2929_v12 = vunpack.c.l.b16 %v2558_v8 }
 0x41f   : > { %10172 = vst [vmem:[#allocation49_spill] sm:$0xff] %v8303_v48  ;;  %v2328_v13 = vrot.slane %v10173_v19, 4  ;;  %v2279_v42 = vperm.slane %v2273_v17, %v7945_v49  ;;  %v8312_v6 = vsel %vm1732_vm3, 0.0, %v2216_v50  ;;  %v2927_v34 = vunpack.c.l.b16 %v2556_v29 }
 0x420   : > { %v2139_v62 = vperm.slane %v2133_v51, %v7962_v11  ;;  %v2143_v59 = vperm.slane %v2135_v37, %v7962_v11  ;;  %v2930_v35 = vunpack.c.l.b16 %v2559_v24  ;;  %v2145_v54 = vsel %vm1732_vm3, %v2144_v18, %v7982_v44 }
 0x421   : > { %v2330_v19 = vrot.slane %v6940_v4, 4  ;;  %v10174_v38 = vunpack.i.l.bf16 %v8231_v28  ;;  %v2931_v63 = vunpack.c.l.b16 %v2560_v25  ;;  %v2933_v48 = vunpack.c.l.b16 %v2562_v23 }
 0x422   : > { %v10175_v50 = vrot.slane %v7982_v44, 4  ;;  %v2928_v24 = vunpack.c.l.b16 %v2557_v36  ;;  %v8327_v37 = vunpack.i.l.s16 %v2929_v12  ;;  %v2284_v18 = vrot.slane %v2279_v42, 4 }
 0x423   : > { %v2275_v8 = vsel %vm1732_vm3, %v10174_v38, %v2274_v46  ;;  %v8329_v20 = vunpack.i.l.s16 %v2927_v34  ;;  %v2151_v33 = vperm.slane %v2145_v54, %v7962_v11  ;;  %v2156_v46 = vrot.slane %v2139_v62, 4 }
 0x424   : > { %v2147_v29 = vsel %vm1732_vm3, %v2131_v26, %v10175_v50  ;;  %10176 = vst [vmem:[#allocation50_spill] sm:$0xff] %v8327_v37  ;;  %v2158_v38 = vrot.slane %v2143_v59, 4  ;;  %v8332_v17 = vunpack.i.l.s16 %v2930_v35  ;;  %v2283_v25 = vperm.slane %v2275_v8, %v7945_v49 }
 0x425   : > { %10177 = vst [vmem:[#allocation51_spill] sm:$0xff] %v8329_v20  ;;  %v2329_v44 = vsel %vm1732_vm3, %v2328_v13, %v6940_v4  ;;  %v10179_v26 = vunpack.i.h.bf16 %v8231_v28  ;;  %v8339_v36 = vunpack.i.l.s16 %v2931_v63  ;;  %v8341_v12 = vunpack.i.l.s16 %v2933_v48 }
 0x426   : > { %10178 = vst [vmem:[#allocation52_spill] sm:$0xff] %v8332_v17  ;;  %v8344_v34 = vperm.slane %v2147_v29, %v7962_v11  ;;  %v2548_v54 = vpack.c.bf16 %v2139_v62, %v2139_v62  ;;  %v2285_v35 = vsel %vm1732_vm3, %v2284_v18, %v8207_v7  ;;  %v10182_v50 = vrot.slane %v8207_v7, 4 }
 0x427   : > { %v2331_v23 = vsel %vm1732_vm3, %v10179_v26, %v2330_v19  ;;  %10180 = vst [vmem:[#allocation53_spill] sm:$0xff] %v8339_v36  ;;  %v2335_v4 = vperm.slane %v2329_v44, %v7945_v49  ;;  %v2157_v13 = vsel %vm1732_vm3, 0.0, %v2156_v46  ;;  %v2159_v48 = vsel %vm1732_vm3, 0.0, %v2158_v38 }
 0x428   : > { %10181 = vst [vmem:[#allocation54_spill] sm:$0xff] %v8341_v12  ;;  %v2287_v8 = vsel %vm1732_vm3, %v2279_v42, %v10182_v50  ;;  %v2339_v28 = vperm.slane %v2331_v23, %v7945_v49  ;;  %v2160_v63 = vrot.slane %v2151_v33, 4  ;;  %v2550_v19 = vpack.c.bf16 %v2143_v59, %v2143_v59 }
 0x429   : > { %v2552_v29 = vpack.c.bf16 %v2151_v33, %v2151_v33  ;;  %v2296_v26 = vrot.slane %v2283_v25, 4  ;;  %v2340_v62 = vrot.slane %v2335_v4, 4  ;;  %v10183_v51 = vrot.slane %v8182_v0, 4 }
 0x42a   : > { %v8358_v7 = vunpack.i.l.s16 %v2928_v24  ;;  %v2554_v42 = vpack.c.bf16 %v8344_v34, %v8344_v34  ;;  %v2291_v44 = vperm.slane %v2285_v35, %v7962_v11  ;;  %v2295_v46 = vperm.slane %v2287_v8, %v7962_v11 }
 0x42b   : > { %v2343_v18 = vsel %vm1732_vm3, %v2335_v4, %v10183_v51  ;;  %v2549_v23 = vpack.c.bf16 %v2157_v13, %v2157_v13  ;;  %v2551_v59 = vpack.c.bf16 %v2159_v48, %v2159_v48  ;;  %v2352_v33 = vrot.slane %v2339_v28, 4 }
 0x42c   : > { %10184 = vst [vmem:[#allocation55_spill] sm:$0xff] %v8358_v7  ;;  %v8366_v50 = vsel %vm1732_vm3, 0.0, %v2160_v63  ;;  %v2919_v12 = vunpack.c.l.b16 %v2548_v54  ;;  %v10185_v51 = vrot.slane %v8210_v14, 4  ;;  %v2351_v4 = vperm.slane %v2343_v18, %v7962_v11 }
 0x42d   : > { %v2921_v7 = vunpack.c.l.b16 %v2550_v19  ;;  %v2923_v36 = vunpack.c.l.b16 %v2552_v29  ;;  %v2297_v35 = vsel %vm1732_vm3, %v2296_v26, %v8210_v14  ;;  %v2341_v8 = vsel %vm1732_vm3, %v2340_v62, %v8182_v0 }
 0x42e   : > { %v2299_v24 = vsel %vm1732_vm3, %v2283_v25, %v10185_v51  ;;  %v2925_v13 = vunpack.c.l.b16 %v2554_v42  ;;  %v2308_v48 = vrot.slane %v2291_v44, 4  ;;  %v2310_v38 = vrot.slane %v2295_v46, 4 }
 0x42f   : > { %v10186_v63 = vrot.slane %v8096_v47, 4  ;;  %v2920_v17 = vunpack.c.l.b16 %v2549_v23  ;;  %v2922_v37 = vunpack.c.l.b16 %v2551_v59  ;;  %v8380_v25 = vperm.slane %v2299_v24, %v7962_v11 }
 0x430   : > { %v2353_v19 = vsel %vm1732_vm3, %v2352_v33, %v8096_v47  ;;  %v8387_v0 = vperm.slane %v2297_v35, %v7962_v11  ;;  %v2347_v29 = vperm.slane %v2341_v8, %v7962_v11  ;;  %v2366_v26 = vrot.slane %v2351_v4, 4 }
 0x431   : > { %v2355_v54 = vsel %vm1732_vm3, %v2339_v28, %v10186_v63  ;;  %10187 = vst [vmem:[#allocation56_spill] sm:$0xff] %v8380_v25  ;;  %v8390_v62 = vunpack.i.l.s16 %v2919_v12  ;;  %v8392_v28 = vunpack.i.l.s16 %v2921_v7  ;;  %v8394_v18 = vunpack.i.l.s16 %v2923_v36 }
 0x432   : > { %10188 = vst [vmem:[#allocation57_spill] sm:$0xff] %v8387_v0  ;;  %v8397_v42 = vperm.slane %v2355_v54, %v7962_v11  ;;  %v8399_v23 = vunpack.i.l.s16 %v2925_v13  ;;  %v2309_v47 = vsel %vm1732_vm3, 0.0, %v2308_v48  ;;  %v2311_v59 = vsel %vm1732_vm3, 0.0, %v2310_v38 }
 0x433   : > { %10189 = vst [vmem:[#allocation58_spill] sm:$0xff] %v8390_v62  ;;  %v8404_v33 = vperm.slane %v2353_v19, %v7962_v11  ;;  %v8406_v51 = vunpack.i.l.s16 %v2920_v17  ;;  %v8408_v12 = vunpack.i.l.s16 %v2922_v37  ;;  %v2566_v36 = vpack.c.bf16 %v2295_v46, %v2295_v46  ;;  %v6918_v17 = vpop.permute.xlu1 %6917 }
 0x434   : > { %10190 = vst [vmem:[#allocation59_spill] sm:$0xff] %v8392_v28  ;;  %v2364_v35 = vrot.slane %v2347_v29, 4  ;;  %v2367_v8 = vsel %vm1732_vm3, 0.0, %v2366_v26  ;;  %v2564_v13 = vpack.c.bf16 %v2291_v44, %v2291_v44  ;;  %v2565_v63 = vpack.c.bf16 %v2309_v47, %v2309_v47 }
 0x435   : > { %10191 = vst [vmem:[#allocation60_spill] sm:$0xff] %v8394_v18  ;;  %v2567_v38 = vpack.c.bf16 %v2311_v59, %v2311_v59  ;;  %v2568_v54 = vpack.c.bf16 %v8387_v0, %v8387_v0  ;;  %v2570_v19 = vpack.c.bf16 %v8380_v25, %v8380_v25  ;;  %v2574_v46 = vpack.c.bf16 %v2351_v4, %v2351_v4 }
 0x436   : > { %10192 = vst [vmem:[#allocation61_spill] sm:$0xff] %v8397_v42  ;;  %v2578_v7 = vpack.c.bf16 %v8397_v42, %v8397_v42  ;;  %v2572_v24 = vpack.c.bf16 %v2347_v29, %v2347_v29  ;;  %v2575_v26 = vpack.c.bf16 %v2367_v8, %v2367_v8  ;;  %v10197_v44 = vunpack.i.h.bf16 %v8296_v57 }
 0x437   : > { %10193 = vst [vmem:[#allocation62_spill] sm:$0xff] %v8399_v23  ;;  %v6914_v47 = vunpack.i.l.bf16 %v8296_v57  ;;  %v2365_v59 = vsel %vm1732_vm3, 0.0, %v2364_v35  ;;  %v2576_v14 = vpack.c.bf16 %v8404_v33, %v8404_v33  ;;  %v3086_v37 = vunpack.c.l.b16 %v2564_v13 }
 0x438   : > { %10194 = vst [vmem:[#allocation63_spill] sm:$0xff] %v8404_v33  ;;  %v1912_v48 = vrot.slane %v10197_v44, 4  ;;  %v6920_v0 = vunpack.i.h.bf16 %v6918_v17  ;;  %v3087_v20 = vunpack.c.l.b16 %v2565_v63  ;;  %v3088_v25 = vunpack.c.l.b16 %v2566_v36 }
 0x439   : > { %10195 = vst [vmem:[#allocation64_spill] sm:$0xff] %v8406_v51  ;;  %v3089_v4 = vunpack.c.l.b16 %v2567_v38  ;;  %v6919_v23 = vunpack.i.l.bf16 %v6918_v17  ;;  %v3090_v18 = vunpack.c.l.b16 %v2568_v54  ;;  %v1856_v42 = vrot.slane %v6914_v47, 4 }
 0x43a   : > { %10196 = vst [vmem:[#allocation65_spill] sm:$0xff] %v8408_v12  ;;  %v1913_v29 = vsel %vm1732_vm3, %v1912_v48, %v6920_v0  ;;  %v1914_v8 = vrot.slane %v6920_v0, 4  ;;  %v2573_v12 = vpack.c.bf16 %v2365_v59, %v2365_v59  ;;  %v8428_v44 = vunpack.c.l.b16 %v2570_v19 }
 0x43b   : > { %v3094_v51 = vunpack.c.l.b16 %v2572_v24  ;;  %v1919_v35 = vperm.slane %v1913_v29, %v7945_v49  ;;  %v3096_v28 = vunpack.c.l.b16 %v2574_v46  ;;  %v3097_v62 = vunpack.c.l.b16 %v2575_v26 }
 0x43c   : > { %v3098_v33 = vunpack.c.l.b16 %v2576_v14  ;;  %v10198_v13 = vunpack.i.h.bf16 %v8296_v57  ;;  %v10199_v54 = vrot.slane %v8051_v58, 4  ;;  %v1858_v48 = vrot.slane %v6919_v23, 4 }
 0x43d   : > { %v1924_v38 = vrot.slane %v1919_v35, 4  ;;  %v8438_v17 = vunpack.c.l.b16 %v2578_v7  ;;  %v8440_v24 = vunpack.i.l.s16 %v3086_v37  ;;  %v1857_v14 = vsel %vm1732_vm3, %v1856_v42, %v6919_v23 }
 0x43e   : > { %v1915_v36 = vsel %vm1732_vm3, %v10198_v13, %v1914_v8  ;;  %v1927_v0 = vsel %vm1732_vm3, %v1919_v35, %v10199_v54  ;;  %v3095_v46 = vunpack.c.l.b16 %v2573_v12  ;;  %v10200_v59 = vrot.slane %v8054_v27, 4 }
 0x43f   : > { %v1923_v63 = vperm.slane %v1915_v36, %v7945_v49  ;;  %v1935_v19 = vperm.slane %v1927_v0, %v7962_v11  ;;  %v1925_v57 = vsel %vm1732_vm3, %v1924_v38, %v8051_v58  ;;  %v8449_v8 = vunpack.i.l.s16 %v3087_v20 }
 0x440   : > { %v1931_v7 = vperm.slane %v1925_v57, %v7962_v11  ;;  %v8453_v13 = vunpack.i.l.s16 %v3088_v25  ;;  %v1859_v23 = vsel %vm1732_vm3, %v6914_v47, %v1858_v48  ;;  %v1863_v58 = vperm.slane %v1857_v14, %v7945_v49 }
 0x441   : > { %v1936_v26 = vrot.slane %v1923_v63, 4  ;;  %v1939_v29 = vsel %vm1732_vm3, %v1923_v63, %v10200_v59  ;;  %v1950_v35 = vrot.slane %v1935_v19, 4  ;;  %v8459_v12 = vunpack.i.l.s16 %v3089_v4 }
 0x442   : > { %v1947_v37 = vperm.slane %v1939_v29, %v7962_v11  ;;  %v1948_v20 = vrot.slane %v1931_v7, 4  ;;  %v8462_v38 = vunpack.i.l.s16 %v3090_v18  ;;  %v8464_v54 = vunpack.i.l.s16 %v3094_v51 }
 0x443   : > { %v1937_v42 = vsel %vm1732_vm3, %v1936_v26, %v8054_v27  ;;  %v1951_v25 = vsel %vm1732_vm3, 0.0, %v1950_v35  ;;  %v2526_v0 = vpack.c.bf16 %v1935_v19, %v1935_v19  ;;  %v8467_v57 = vunpack.i.l.s16 %v3096_v28 }
 0x444   : > { %v1943_v36 = vperm.slane %v1937_v42, %v7962_v11  ;;  %v1954_v63 = vrot.slane %v1947_v37, 4  ;;  %10201 = vst [vmem:[#allocation66_spill] sm:$0xff] %v8464_v54  ;;  %v1949_v27 = vsel %vm1732_vm3, 0.0, %v1948_v20  ;;  %v1867_v48 = vperm.slane %v1859_v23, %v7945_v49 }
 0x445   : > { %v8471_v4 = vunpack.i.l.s16 %v3097_v62  ;;  %v2524_v14 = vpack.c.bf16 %v1931_v7, %v1931_v7  ;;  %v1868_v26 = vrot.slane %v1863_v58, 4  ;;  %v10203_v59 = vrot.slane %v8060_v55, 4 }
 0x446   : > { %v1952_v47 = vrot.slane %v1943_v36, 4  ;;  %v1955_v51 = vsel %vm1732_vm3, 0.0, %v1954_v63  ;;  %v2527_v29 = vpack.c.bf16 %v1951_v25, %v1951_v25  ;;  %v2528_v35 = vpack.c.bf16 %v1943_v36, %v1943_v36 }
 0x447   : > { %10202 = vst [vmem:[#allocation67_spill] sm:$0xff] %v8471_v4  ;;  %v1871_v18 = vsel %vm1732_vm3, %v1863_v58, %v10203_v59  ;;  %v2539_v28 = vpack.c.bf16 %v8089_v45, %v8089_v45  ;;  %v8479_v19 = vunpack.i.l.s16 %v3095_v46  ;;  %v2525_v42 = vpack.c.bf16 %v1949_v27, %v1949_v27 }
 0x448   : > { %v2530_v20 = vpack.c.bf16 %v1947_v37, %v1947_v37  ;;  %v2836_v23 = vunpack.c.l.b16 %v2526_v0  ;;  %v8481_v62 = vunpack.i.l.s16 %v3098_v33  ;;  %v1953_v7 = vsel %vm1732_vm3, 0.0, %v1952_v47 }
 0x449   : > { %v1879_v49 = vperm.slane %v1871_v18, %v7962_v11  ;;  %v1880_v4 = vrot.slane %v1867_v48, 4  ;;  %v2531_v58 = vpack.c.bf16 %v1955_v51, %v1955_v51  ;;  %v2834_v59 = vunpack.c.l.b16 %v2524_v14 }
 0x44a   : > { %10204 = vst [vmem:[#allocation68_spill] sm:$0xff] %v8481_v62  ;;  %v1869_v36 = vsel %vm1732_vm3, %v1868_v26, %v8060_v55  ;;  %v10205_v63 = vrot.slane %v8072_v5, 4  ;;  %v2837_v46 = vunpack.c.l.b16 %v2527_v29  ;;  %v2838_v25 = vunpack.c.l.b16 %v2528_v35 }
 0x44b   : > { %v2547_v33 = vpack.c.bf16 %v8102_v53, %v8102_v53  ;;  %v2719_v37 = vunpack.c.l.b16 %v2539_v28  ;;  %v2529_v0 = vpack.c.bf16 %v1953_v7, %v1953_v7  ;;  %v2835_v27 = vunpack.c.l.b16 %v2525_v42 }
 0x44c   : > { %v1883_v45 = vsel %vm1732_vm3, %v1867_v48, %v10205_v63  ;;  %v2840_v47 = vunpack.c.l.b16 %v2530_v20  ;;  %v8492_v18 = vunpack.i.l.s16 %v2836_v23  ;;  %v1875_v14 = vperm.slane %v1869_v36, %v7962_v11 }
 0x44d   : > { %v1881_v55 = vsel %vm1732_vm3, %v1880_v4, %v8072_v5  ;;  %v1891_v26 = vperm.slane %v1883_v45, %v7962_v11  ;;  %v1894_v51 = vrot.slane %v1879_v49, 4  ;;  %v2841_v48 = vunpack.c.l.b16 %v2531_v58 }
 0x44e   : > { %10206 = vst [vmem:[#allocation69_spill] sm:$0xff] %v8492_v18  ;;  %v8498_v29 = vunpack.i.l.s16 %v2834_v59  ;;  %v1887_v35 = vperm.slane %v1881_v55, %v7962_v11  ;;  %v2518_v53 = vpack.c.bf16 %v1879_v49, %v1879_v49  ;;  %v8501_v28 = vunpack.i.l.s16 %v2837_v46 }
 0x44f   : > { %v1892_v42 = vrot.slane %v1875_v14, 4  ;;  %v1895_v20 = vsel %vm1732_vm3, 0.0, %v1894_v51  ;;  %v1898_v23 = vrot.slane %v1891_v26, 4  ;;  %v2516_v36 = vpack.c.bf16 %v1875_v14, %v1875_v14 }
 0x450   : > { %10207 = vst [vmem:[#allocation70_spill] sm:$0xff] %v8498_v29  ;;  %v1896_v7 = vrot.slane %v1887_v35, 4  ;;  %v2519_v63 = vpack.c.bf16 %v1895_v20, %v1895_v20  ;;  %v2520_v62 = vpack.c.bf16 %v1887_v35, %v1887_v35  ;;  %v2522_v58 = vpack.c.bf16 %v1891_v26, %v1891_v26 }
 0x451   : > { %10208 = vst [vmem:[#allocation71_spill] sm:$0xff] %v8501_v28  ;;  %v1893_v5 = vsel %vm1732_vm3, 0.0, %v1892_v42  ;;  %v1899_v4 = vsel %vm1732_vm3, 0.0, %v1898_v23  ;;  %v2828_v59 = vunpack.c.l.b16 %v2518_v53  ;;  %v2826_v55 = vunpack.c.l.b16 %v2516_v36 }
 0x452   : > { %v1897_v45 = vsel %vm1732_vm3, 0.0, %v1896_v7  ;;  %v2517_v49 = vpack.c.bf16 %v1893_v5, %v1893_v5  ;;  %v2523_v46 = vpack.c.bf16 %v1899_v4, %v1899_v4  ;;  %v2839_v51 = vunpack.c.l.b16 %v2529_v0 }
 0x453   : > { %v8507_v11 = vunpack.i.l.s16 %v2838_v25  ;;  %v2521_v14 = vpack.c.bf16 %v1897_v45, %v1897_v45  ;;  %v2829_v20 = vunpack.c.l.b16 %v2519_v63  ;;  %v2830_v42 = vunpack.c.l.b16 %v2520_v62 }
 0x454   : > { %v2827_v35 = vunpack.c.l.b16 %v2517_v49  ;;  %v2832_v28 = vunpack.c.l.b16 %v2522_v58  ;;  %v2833_v23 = vunpack.c.l.b16 %v2523_v46  ;;  %v8509_v26 = vunpack.i.l.s16 %v2840_v47 }
 0x455   : > { %10209 = vst [vmem:[#allocation72_spill] sm:$0xff] %v8507_v11  ;;  %v2831_v7 = vunpack.c.l.b16 %v2521_v14  ;;  %v8512_v5 = vunpack.i.l.s16 %v2826_v55  ;;  %v8514_v36 = vunpack.i.l.s16 %v2835_v27  ;;  %v8516_v25 = vunpack.i.l.s16 %v2841_v48 }
 0x456   : > { %10210 = vst [vmem:[#allocation73_spill] sm:$0xff] %v8509_v26  ;;  %v8518_v0 = vunpack.i.l.s16 %v2828_v59  ;;  %v2727_v63 = vunpack.c.l.b16 %v2547_v33  ;;  %v8520_v62 = vunpack.i.l.s16 %v2839_v51  ;;  %v8524_v58 = vunpack.i.l.s16 %v2829_v20 }
 0x457   : > { %10211 = vst [vmem:[#allocation74_spill] sm:$0xff] %v8512_v5  ;;  %v8526_v45 = vunpack.i.l.s16 %v2827_v35  ;;  %v8528_v49 = vunpack.i.l.s16 %v2830_v42  ;;  %v8530_v27 = vunpack.i.l.s16 %v2832_v28  ;;  %v8532_v48 = vunpack.i.l.s16 %v2833_v23 }
 0x458   : > { %10212 = vst [vmem:[#allocation75_spill] sm:$0xff] %v8514_v36  ;;  %v8534_v59 = vunpack.i.l.s16 %v2831_v7  ;;  %v8537_v46 = vunpack.i.l.s16 %v2719_v37  ;;  %v3328_v55 = vrot.slane %v8144_v21, 1  ;;  %v8541_v14 = vunpack.i.l.s16 %v2727_v63 }
 0x459   : > { %10213 = vst [vmem:[#allocation76_spill] sm:$0xff] %v8516_v25  ;;  %v3330_v20 = vrot.slane %v8148_v56, 7  ;;  %v3332_v35 = vrot.slane %v8151_v39, 6  ;;  %v3334_v42 = vrot.slane %v8153_v10, 5  ;;  %v3336_v23 = vrot.slane %v8159_v1, 4 }
 0x45a   : > { %10214 = vst [vmem:[#allocation77_spill] sm:$0xff] %v8518_v0  ;;  %v3329_v28 = vsel %vm2661_vm4, %v8146_v40, %v3328_v55  ;;  %v3338_v37 = vrot.slane %v8161_v43, 3  ;;  %v3340_v53 = vrot.slane %v8537_v46, 2  ;;  %v3342_v63 = vrot.slane %v8163_v31, 1  ;;  %v10232_v0 = vld [vmem:[#allocation35_spill] sm:$0xff] }
 0x45b   : > { %10215 = vst [vmem:[#allocation78_spill] sm:$0xff] %v8520_v62  ;;  %v3331_v7 = vsel %vm2664_vm6, %v3330_v20, %v3329_v28  ;;  %v3344_v47 = vrot.slane %v8169_v30, 7  ;;  %v3346_v51 = vrot.slane %v8171_v15, 6  ;;  %v3348_v55 = vrot.slane %v8174_v60, 5 }
 0x45c   : > { %10216 = vst [vmem:[#allocation79_spill] sm:$0xff] %v8524_v58  ;;  %v3333_v4 = vsel %vm2667_vm5, %v3332_v35, %v3331_v7  ;;  %v3350_v33 = vrot.slane %v8176_v61, 4  ;;  %v3343_v26 = vsel %vm2661_vm4, %v8165_v52, %v3342_v63  ;;  %v3352_v20 = vrot.slane %v8178_v32, 3 }
 0x45d   : > { %10217 = vst [vmem:[#allocation80_spill] sm:$0xff] %v8526_v45  ;;  %v3335_v25 = vsel %vm2670_vm7, %v3334_v42, %v3333_v4  ;;  %v3354_v28 = vrot.slane %v8541_v14, 2  ;;  %v3345_v11 = vsel %vm2664_vm6, %v3344_v47, %v3343_v26  ;;  %v2760_v35 = vrot.slane %v8146_v40, 7 }
 0x45e   : > { %10218 = vst [vmem:[#allocation81_spill] sm:$0xff] %v8528_v49  ;;  %v3337_v62 = vsel %vm2673_vm8, %v3336_v23, %v3335_v25  ;;  %v2762_v7 = vrot.slane %v8148_v56, 6  ;;  %v3347_v36 = vsel %vm2667_vm5, %v3346_v51, %v3345_v11  ;;  %v2764_v4 = vrot.slane %v8151_v39, 5 }
 0x45f   : > { %10219 = vst [vmem:[#allocation82_spill] sm:$0xff] %v8530_v27  ;;  %v3339_v18 = vsel %vm2676_vm9, %v3338_v37, %v3337_v62  ;;  %v2766_v42 = vrot.slane %v8153_v10, 4  ;;  %v3349_v29 = vsel %vm2670_vm7, %v3348_v55, %v3347_v36  ;;  %v2761_v25 = vsel %vm2661_vm4, %v2760_v35, %v8144_v21  ;;  %v10230_v27 = vld [vmem:[#allocation36_spill] sm:$0xff] }
 0x460   : > { %10220 = vst [vmem:[#allocation83_spill] sm:$0xff] %v8532_v48  ;;  %v3341_v63 = vsel %vm2679_vm10, %v3340_v53, %v3339_v18  ;;  %v2768_v26 = vrot.slane %v8159_v1, 3  ;;  %v3351_v47 = vsel %vm2673_vm8, %v3350_v33, %v3349_v29  ;;  %v2763_v23 = vsel %vm2664_vm6, %v2762_v7, %v2761_v25 }
 0x461   : > { %10221 = vst [vmem:[#allocation84_spill] sm:$0xff] %v8534_v59  ;;  %v2770_v62 = vrot.slane %v8161_v43, 2  ;;  %v2772_v11 = vrot.slane %v8537_v46, 1  ;;  %v3353_v51 = vsel %vm2676_vm9, %v3352_v20, %v3351_v47  ;;  %v2765_v37 = vsel %vm2667_vm5, %v2764_v4, %v2763_v23 }
 0x462   : > { %10222 = vst [vmem:[#allocation85_spill] sm:$0xff] %v8541_v14  ;;  %v2774_v18 = vrot.slane %v8165_v52, 7  ;;  %v2776_v53 = vrot.slane %v8169_v30, 6  ;;  %v3355_v36 = vsel %vm2679_vm10, %v3354_v28, %v3353_v51  ;;  %v2767_v55 = vsel %vm2670_vm7, %v2766_v42, %v2765_v37  ;;  %v10234_v30 = vld [vmem:[#allocation39_spill] sm:$0xff] }
 0x463   : > { %v2778_v29 = vrot.slane %v8171_v15, 5  ;;  %v2780_v33 = vrot.slane %v8174_v60, 4  ;;  %v3356_v35 = vpack.c.b16 %v3355_v36, %v3341_v63  ;;  %v2769_v7 = vsel %vm2673_vm8, %v2768_v26, %v2767_v55 }
 0x464   : > { %v2775_v20 = vsel %vm2661_vm4, %v2774_v18, %v8163_v31  ;;  %v2782_v4 = vrot.slane %v8176_v61, 3  ;;  %v2771_v25 = vsel %vm2676_vm9, %v2770_v62, %v2769_v7  ;;  %v2784_v28 = vrot.slane %v8178_v32, 2  ;;  %v10225_v7 = vld [vmem:[#allocation48_spill] sm:$0xff] }
 0x465   : > { %v2777_v47 = vsel %vm2664_vm6, %v2776_v53, %v2775_v20  ;;  %v2786_v42 = vrot.slane %v8541_v14, 1  ;;  %v3361_v23 = vsel %vm2789_vm11, %v3356_v35, 0  ;;  %v2773_v51 = vsel %vm2679_vm10, %v2772_v11, %v2771_v25  ;;  %v10224_v35 = vld [vmem:[#allocation47_spill] sm:$0xff]  ;;  %v10226_v20 = vld [vmem:[#allocation49_spill] sm:$0xff] }
 0x466   : > { %v2779_v63 = vsel %vm2667_vm5, %v2778_v29, %v2777_v47  ;;  %v10223_v26 = vrot.slane %v8265_v9, 1  ;;  %3370 = vmatpush.bf16.xpose.msrb.mxu0 %v3361_v23  ;;  %v3301_v18 = vrot.slane %v8270_v22, 7  ;;  %v3303_v53 = vrot.slane %v8275_v16, 6 }
 0x467   : > { %v2781_v62 = vsel %vm2670_vm7, %v2780_v33, %v2779_v63  ;;  %v3305_v36 = vrot.slane %v8277_v3, 5  ;;  %v3307_v11 = vrot.slane %v10224_v35, 4  ;;  %v3309_v29 = vrot.slane %v10225_v7, 3  ;;  %v10229_v63 = vld [vmem:[#allocation38_spill] sm:$0xff] }
 0x468   : > { %v3300_v37 = vsel %vm2661_vm4, %v8268_v2, %v10223_v26  ;;  %v2783_v55 = vsel %vm2673_vm8, %v2782_v4, %v2781_v62  ;;  %v3311_v25 = vrot.slane %v10226_v20, 2  ;;  %v10227_v26 = vld [vmem:[#allocation34_spill] sm:$0xff]  ;;  %v3315_v59 = vrot.slane %v10230_v27, 7  ;;  %v10231_v62 = vld [vmem:[#allocation41_spill] sm:$0xff] }
 0x469   : > { %v2785_v47 = vsel %vm2676_vm9, %v2784_v28, %v2783_v55  ;;  %v3302_v23 = vsel %vm2664_vm6, %v3301_v18, %v3300_v37  ;;  %v10228_v33 = vrot.slane %v10227_v26, 1  ;;  %v3317_v58 = vrot.slane %v10231_v62, 6  ;;  %v10233_v18 = vld [vmem:[#allocation37_spill] sm:$0xff] }
 0x46a   : > { %v2787_v49 = vsel %vm2679_vm10, %v2786_v42, %v2785_v47  ;;  %v3304_v4 = vsel %vm2667_vm5, %v3303_v53, %v3302_v23  ;;  %v3319_v45 = vrot.slane %v10232_v0, 5  ;;  %v3321_v55 = vrot.slane %v10233_v18, 4  ;;  %v10235_v42 = vld [vmem:[#allocation40_spill] sm:$0xff] }
 0x46b   : > { %v3314_v48 = vsel %vm2661_vm4, %v10229_v63, %v10228_v33  ;;  %v2788_v5 = vpack.c.b16 %v2787_v49, %v2773_v51  ;;  %v3306_v28 = vsel %vm2670_vm7, %v3305_v36, %v3304_v4  ;;  %v3323_v32 = vrot.slane %v10234_v30, 3 }
 0x46c   : > { %v3316_v37 = vsel %vm2664_vm6, %v3315_v59, %v3314_v48  ;;  %v3308_v14 = vsel %vm2673_vm8, %v3307_v11, %v3306_v28  ;;  %v3325_v47 = vrot.slane %v10235_v42, 2  ;;  %v10236_v51 = vrot.slane %v8344_v34, 4 }
 0x46d   : > { %v3318_v33 = vsel %vm2667_vm5, %v3317_v58, %v3316_v37  ;;  %v2794_v53 = vsel %vm2789_vm11, %v2788_v5, 0  ;;  %v3310_v23 = vsel %vm2676_vm9, %v3309_v29, %v3308_v14  ;;  %v10237_v58 = vrot.slane %v8293_v41, 4  ;;  %v10241_v41 = vld [vmem:[#allocation59_spill] sm:$0xff] }
 0x46e   : > { %v3320_v49 = vsel %vm2670_vm7, %v3319_v45, %v3318_v33  ;;  %v2163_v48 = vsel %vm1732_vm3, 0.0, %v10236_v51  ;;  %2803 = vmatpush.bf16.xpose.msra.mxu3 %v2794_v53  ;;  %v3312_v59 = vsel %vm2679_vm10, %v3311_v25, %v3310_v23  ;;  %v10238_v45 = vpack.c.bf16 %v8366_v50, %v8366_v50  ;;  %v10245_v50 = vld [vmem:[#allocation64_spill] sm:$0xff] }
 0x46f   : > { %v3322_v36 = vsel %vm2673_vm8, %v3321_v55, %v3320_v49  ;;  %v2219_v11 = vsel %vm1732_vm3, 0.0, %v10237_v58  ;;  %v2555_v4 = vpack.c.bf16 %v2163_v48, %v2163_v48  ;;  %v10239_v34 = vpack.c.bf16 %v8312_v6, %v8312_v6  ;;  %v10240_v55 = vld [vmem:[#allocation58_spill] sm:$0xff]  ;;  %v10246_v6 = vld [vmem:[#allocation65_spill] sm:$0xff] }
 0x470   : > { %v3324_v5 = vsel %vm2676_vm9, %v3323_v32, %v3322_v36  ;;  %v2563_v28 = vpack.c.bf16 %v2219_v11, %v2219_v11  ;;  %v2924_v14 = vunpack.c.l.b16 %v10238_v45  ;;  %v3406_v33 = vrot.slane %v10240_v55, 1  ;;  %v10247_v11 = vld [vmem:[#allocation60_spill] sm:$0xff] }
 0x471   : > { %v2932_v29 = vunpack.c.l.b16 %v10239_v34  ;;  %v3326_v25 = vsel %vm2679_vm10, %v3325_v47, %v3324_v5  ;;  %v2926_v37 = vunpack.c.l.b16 %v2555_v4  ;;  %v3408_v53 = vrot.slane %v10241_v41, 7 }
 0x472   : > { %v3327_v23 = vpack.c.b16 %v3326_v25, %v3312_v59  ;;  %v2934_v49 = vunpack.c.l.b16 %v2563_v28  ;;  %v8650_v51 = vunpack.i.l.s16 %v2924_v14  ;;  %v3407_v36 = vsel %vm2661_vm4, %v10245_v50, %v3406_v33  ;;  %v10249_v28 = vld [vmem:[#allocation62_spill] sm:$0xff] }
 0x473   : > { %v8652_v32 = vunpack.i.l.s16 %v2932_v29  ;;  %v8654_v48 = vunpack.i.l.s16 %v2926_v37  ;;  %v3410_v58 = vrot.slane %v10246_v6, 6  ;;  %v3412_v47 = vrot.slane %v10247_v11, 5  ;;  %v10250_v29 = vld [vmem:[#allocation51_spill] sm:$0xff]  ;;  %v10251_v37 = vld [vmem:[#allocation50_spill] sm:$0xff]  ;;  %v10252_v11 = vld [vmem:[#allocation52_spill] sm:$0xff] }
 0x474   : > { %10242 = vst [vmem:[#allocation59_spill] sm:$0xff] %v8650_v51  ;;  %6143 = vmatmul.msk.bf16.vlgmr.msrb.gmra.mxu0 %vm2789_vm11, %v3327_v23  ;;  %v8661_v4 = vunpack.i.l.s16 %v2934_v49  ;;  %v3409_v59 = vsel %vm2664_vm6, %v3408_v53, %v3407_v36  ;;  %v3414_v5 = vrot.slane %v8650_v51, 4  ;;  %v3416_v45 = vrot.slane %v10249_v28, 3  ;;  %v10253_v49 = vld [vmem:[#allocation53_spill] sm:$0xff]  ;;  %v10254_v51 = vld [vmem:[#allocation55_spill] sm:$0xff] }
 0x475   : > { %10243 = vst [vmem:[#allocation86_spill] sm:$0xff] %v8652_v32  ;;  %v3411_v14 = vsel %vm2667_vm5, %v3410_v58, %v3409_v59  ;;  %v3418_v34 = vrot.slane %v8654_v48, 2  ;;  %v3420_v25 = vrot.slane %v10250_v29, 1  ;;  %v3422_v33 = vrot.slane %v10251_v37, 7  ;;  %v10255_v58 = vld [vmem:[#allocation54_spill] sm:$0xff] }
 0x476   : > { %10244 = vst [vmem:[#allocation87_spill] sm:$0xff] %v8654_v48  ;;  %v3413_v55 = vsel %vm2670_vm7, %v3412_v47, %v3411_v14  ;;  %v3424_v23 = vrot.slane %v10252_v11, 6  ;;  %v3426_v6 = vrot.slane %v10253_v49, 5  ;;  %v3428_v53 = vrot.slane %v8652_v32, 4 }
 0x477   : > { %10248 = vst [vmem:[#allocation64_spill] sm:$0xff] %v8661_v4  ;;  %v3415_v36 = vsel %vm2673_vm8, %v3414_v5, %v3413_v55  ;;  %v3421_v28 = vsel %vm2661_vm4, %v10254_v51, %v3420_v25  ;;  %v3430_v59 = vrot.slane %v10255_v58, 3  ;;  %v3432_v48 = vrot.slane %v8661_v4, 2 }
 0x478   : > { %v3417_v29 = vsel %vm2676_vm9, %v3416_v45, %v3415_v36  ;;  %v3423_v37 = vsel %vm2664_vm6, %v3422_v33, %v3421_v28  ;;  %v2660_v47 = vrot.slane %v8268_v2, 7  ;;  %v2663_v14 = vrot.slane %v8270_v22, 6  ;;  %v10281_v22 = vld [vmem:[#allocation81_spill] sm:$0xff]  ;;  %v10282_v2 = vld [vmem:[#allocation84_spill] sm:$0xff] }
 0x479   : > { %v3419_v49 = vsel %vm2679_vm10, %v3418_v34, %v3417_v29  ;;  %v3425_v32 = vsel %vm2667_vm5, %v3424_v23, %v3423_v37  ;;  %v2666_v55 = vrot.slane %v8275_v16, 5  ;;  %v2669_v5 = vrot.slane %v8277_v3, 4  ;;  %v10273_v3 = vld [vmem:[#allocation32_spill] sm:$0xff]  ;;  %v10280_v16 = vld [vmem:[#allocation79_spill] sm:$0xff] }
 0x47a   : > { %v3427_v25 = vsel %vm2670_vm7, %v3426_v6, %v3425_v32  ;;  %v2662_v4 = vsel %vm2661_vm4, %v2660_v47, %v8265_v9  ;;  %v2672_v45 = vrot.slane %v10224_v35, 3  ;;  %v2675_v28 = vrot.slane %v10225_v7, 2 }
 0x47b   : > { %v3429_v33 = vsel %vm2673_vm8, %v3428_v53, %v3427_v25  ;;  %v2665_v34 = vsel %vm2664_vm6, %v2663_v14, %v2662_v4  ;;  %v2678_v29 = vrot.slane %v10226_v20, 1  ;;  %v2681_v37 = vrot.slane %v10229_v63, 7 }
 0x47c   : > { %v3431_v23 = vsel %vm2676_vm9, %v3430_v59, %v3429_v33  ;;  %v2668_v32 = vsel %vm2667_vm5, %v2666_v55, %v2665_v34  ;;  %v2683_v6 = vrot.slane %v10230_v27, 6  ;;  %v2685_v36 = vrot.slane %v10231_v62, 5  ;;  %v6574_v33 = vld [vmem:[%s7760_s26 + $0x8] sm:$0xff]  ;;  %v10277_v62 = vld [vmem:[#allocation80_spill] sm:$0xff] }
 0x47d   : > { %v3433_v47 = vsel %vm2679_vm10, %v3432_v48, %v3431_v23  ;;  %v2671_v7 = vsel %vm2670_vm7, %v2669_v5, %v2668_v32  ;;  %v2682_v53 = vsel %vm2661_vm4, %v2681_v37, %v10227_v26  ;;  %v2687_v4 = vrot.slane %v10232_v0, 4 }
 0x47e   : > { %v3434_v14 = vpack.c.b16 %v3433_v47, %v3419_v49  ;;  %v2674_v25 = vsel %vm2673_vm8, %v2672_v45, %v2671_v7  ;;  %v2684_v59 = vsel %vm2664_vm6, %v2683_v6, %v2682_v53  ;;  %v2689_v55 = vrot.slane %v10233_v18, 3  ;;  %v10256_v45 = vld [vmem:[#allocation57_spill] sm:$0xff]  ;;  %v10258_v6 = vld [vmem:[#allocation56_spill] sm:$0xff]  ;;  %v10260_v53 = vld [vmem:[#allocation63_spill] sm:$0xff] }
 0x47f   : > { %v2677_v34 = vsel %vm2676_vm9, %v2675_v28, %v2674_v25  ;;  %v2686_v20 = vsel %vm2667_vm5, %v2685_v36, %v2684_v59  ;;  %v2691_v48 = vrot.slane %v10234_v30, 2  ;;  %v2693_v5 = vrot.slane %v10235_v42, 1 }
 0x480   : > { %v3439_v37 = vsel %vm2789_vm11, %v3434_v14, 0  ;;  %v2680_v49 = vsel %vm2679_vm10, %v2678_v29, %v2677_v34  ;;  %v2688_v7 = vsel %vm2670_vm7, %v2687_v4, %v2686_v20  ;;  %v10257_v23 = vrot.slane %v10256_v45, 4  ;;  %v10262_v14 = vld [vmem:[#allocation61_spill] sm:$0xff]  ;;  %v6573_v45 = vld [vmem:[%s7760_s26] sm:$0xff] }
 0x481   : > { %3448 = vmatpush.bf16.xpose.msrb.mxu1 %v3439_v37  ;;  %v2690_v28 = vsel %vm2673_vm8, %v2689_v55, %v2688_v7  ;;  %v10259_v36 = vrot.slane %v10258_v6, 4  ;;  %v10261_v25 = vrot.slane %v10260_v53, 4  ;;  %v10263_v42 = vrot.slane %v10262_v14, 4 }
 0x482   : > { %v2313_v32 = vsel %vm1732_vm3, 0.0, %v10257_v23  ;;  %v2692_v20 = vsel %vm2676_vm9, %v2691_v48, %v2690_v28  ;;  %v8733_v23 = vunpack.i.l.s16 %v8428_v44  ;;  %v8736_v6 = vunpack.i.l.s16 %v8438_v17 }
 0x483   : > { %v2315_v47 = vsel %vm1732_vm3, 0.0, %v10259_v36  ;;  %v2369_v59 = vsel %vm1732_vm3, 0.0, %v10261_v25  ;;  %v2371_v29 = vsel %vm1732_vm3, 0.0, %v10263_v42  ;;  %v2569_v4 = vpack.c.bf16 %v2313_v32, %v2313_v32 }
 0x484   : > { %v2571_v34 = vpack.c.bf16 %v2315_v47, %v2315_v47  ;;  %v2577_v37 = vpack.c.bf16 %v2369_v59, %v2369_v59  ;;  %v2694_v55 = vsel %vm2679_vm10, %v2693_v5, %v2692_v20  ;;  %v2579_v7 = vpack.c.bf16 %v2371_v29, %v2371_v29  ;;  %10264 = vst [vmem:[#allocation52_spill] sm:$0xff] %v8733_v23 }
 0x485   : > { %10265 = vst [vmem:[#allocation55_spill] sm:$0xff] %v8736_v6  ;;  %v2695_v36 = vpack.c.b16 %v2694_v55, %v2680_v49  ;;  %v3091_v53 = vunpack.c.l.b16 %v2569_v4  ;;  %v3510_v48 = vrot.slane %v8453_v13, 7  ;;  %v3512_v32 = vrot.slane %v8459_v12, 6 }
 0x486   : > { %v3093_v25 = vunpack.c.l.b16 %v2571_v34  ;;  %v3099_v42 = vunpack.c.l.b16 %v2577_v37  ;;  %v3101_v14 = vunpack.c.l.b16 %v2579_v7  ;;  %v3514_v17 = vrot.slane %v8462_v38, 5  ;;  %v10270_v7 = vld [vmem:[#allocation67_spill] sm:$0xff] }
 0x487   : > { %6075 = vmatmul.msk.bf16.vlgmr.msra.gmra.mxu3 %vm2789_vm11, %v2695_v36  ;;  %v8742_v5 = vunpack.i.l.s16 %v3091_v53  ;;  %v3518_v59 = vrot.slane %v8733_v23, 3  ;;  %v3522_v29 = vrot.slane %v8464_v54, 1  ;;  %v3524_v37 = vrot.slane %v8467_v57, 7  ;;  %v10271_v53 = vld [vmem:[#allocation68_spill] sm:$0xff] }
 0x488   : > { %v8744_v44 = vunpack.i.l.s16 %v3093_v25  ;;  %v8746_v28 = vunpack.i.l.s16 %v3099_v42  ;;  %v8749_v49 = vunpack.i.l.s16 %v3101_v14  ;;  %v3526_v36 = vrot.slane %v10270_v7, 6 }
 0x489   : > { %3670 = vmatpush.bf16.msra.mxu1 %v6574_v33  ;;  %v3508_v33 = vrot.slane %v8440_v24, 1  ;;  %10266 = vst [vmem:[#allocation54_spill] sm:$0xff] %v8742_v5  ;;  %v3516_v4 = vrot.slane %v8742_v5, 4  ;;  %v3528_v25 = vrot.slane %v10271_v53, 5  ;;  %v3383_v26 = vrot.slane %v10281_v22, 5 }
 0x48a   : > { %10267 = vst [vmem:[#allocation57_spill] sm:$0xff] %v8744_v44  ;;  %v3520_v34 = vrot.slane %v8744_v44, 2  ;;  %v3385_v9 = vrot.slane %v10282_v2, 4 }
 0x48b   : > { %10268 = vst [vmem:[#allocation56_spill] sm:$0xff] %v8746_v28  ;;  %v3509_v47 = vsel %vm2661_vm4, %v8449_v8, %v3508_v33  ;;  %v3530_v33 = vrot.slane %v8746_v28, 4  ;;  %v10291_v28 = vld [vmem:[#allocation72_spill] sm:$0xff] }
 0x48c   : > { %10269 = vst [vmem:[#allocation63_spill] sm:$0xff] %v8749_v49  ;;  %v3511_v20 = vsel %vm2664_vm6, %v3510_v48, %v3509_v47  ;;  %v3532_v48 = vrot.slane %v8736_v6, 3  ;;  %v3397_v54 = vrot.slane %v10291_v28, 5 }
 0x48d   : > { %3671 = vmatpush.bf16.msra.mxu1 %v6573_v45  ;;  %v3513_v55 = vsel %vm2667_vm5, %v3512_v32, %v3511_v20  ;;  %v3523_v45 = vsel %vm2661_vm4, %v8479_v19, %v3522_v29  ;;  %v3534_v32 = vrot.slane %v8749_v49, 2  ;;  %v3712_v29 = vrot.slane %v8144_v21, 2  ;;  %v10285_v49 = vld [vmem:[#allocation70_spill] sm:$0xff] }
 0x48e   : > { %v3515_v42 = vsel %vm2670_vm7, %v3514_v17, %v3513_v55  ;;  %v3525_v14 = vsel %vm2664_vm6, %v3524_v37, %v3523_v45  ;;  %v3713_v17 = vrot.slane %v8146_v40, 1  ;;  %v3716_v37 = vrot.slane %v8151_v39, 7 }
 0x48f   : > { %v3517_v47 = vsel %vm2673_vm8, %v3516_v4, %v3515_v42  ;;  %v3527_v30 = vsel %vm2667_vm5, %v3526_v36, %v3525_v14  ;;  %v3718_v4 = vrot.slane %v8153_v10, 6  ;;  %v3720_v36 = vrot.slane %v8159_v1, 5 }
 0x490   : > { %v3519_v20 = vsel %vm2676_vm9, %v3518_v59, %v3517_v47  ;;  %v3529_v18 = vsel %vm2670_vm7, %v3528_v25, %v3527_v30  ;;  %v3714_v14 = vsel %vm2661_vm4, %v3713_v17, %v3712_v29  ;;  %v3722_v59 = vrot.slane %v8161_v43, 4 }
 0x491   : > { %v3521_v55 = vsel %vm2679_vm10, %v3520_v34, %v3519_v20  ;;  %v3531_v45 = vsel %vm2673_vm8, %v3530_v33, %v3529_v18  ;;  %v3724_v30 = vrot.slane %v8537_v46, 3  ;;  %v3715_v47 = vsel %vm2664_vm6, %v8148_v56, %v3714_v14 }
 0x492   : > { %v3533_v42 = vsel %vm2676_vm9, %v3532_v48, %v3531_v45  ;;  %v3726_v34 = vrot.slane %v8163_v31, 2  ;;  %v3727_v18 = vrot.slane %v8165_v52, 1  ;;  %v3717_v20 = vsel %vm2667_vm5, %v3716_v37, %v3715_v47  ;;  %v10275_v47 = vld [vmem:[#allocation74_spill] sm:$0xff] }
 0x493   : > { %v3535_v25 = vsel %vm2679_vm10, %v3534_v32, %v3533_v42  ;;  %v3730_v48 = vrot.slane %v8171_v15, 7  ;;  %v3732_v29 = vrot.slane %v8174_v60, 6  ;;  %v3719_v17 = vsel %vm2670_vm7, %v3718_v4, %v3717_v20  ;;  %v10272_v42 = vld [vmem:[#allocation33_spill] sm:$0xff] }
 0x494   : > { %v3536_v33 = vpack.c.b16 %v3535_v25, %v3521_v55  ;;  %v3728_v45 = vsel %vm2661_vm4, %v3727_v18, %v3726_v34  ;;  %v3734_v32 = vrot.slane %v8176_v61, 5  ;;  %v3736_v35 = vrot.slane %v10272_v42, 4  ;;  %v10274_v25 = vld [vmem:[#allocation85_spill] sm:$0xff] }
 0x495   : > { %v3721_v14 = vsel %vm2673_vm8, %v3720_v36, %v3719_v17  ;;  %v3729_v55 = vsel %vm2664_vm6, %v10273_v3, %v3728_v45  ;;  %v3738_v37 = vrot.slane %v10274_v25, 3  ;;  %v10276_v0 = vrot.slane %v10275_v47, 1  ;;  %v10278_v18 = vld [vmem:[#allocation77_spill] sm:$0xff] }
 0x496   : > { %3548 = vmatpush.bf16.msrb.mxu2 %v3536_v33  ;;  %v3723_v4 = vsel %vm2676_vm9, %v3722_v59, %v3721_v14  ;;  %v3731_v34 = vsel %vm2667_vm5, %v3730_v48, %v3729_v55  ;;  %v10279_v20 = vrot.slane %v10278_v18, 7  ;;  %v3381_v36 = vrot.slane %v10280_v16, 6  ;;  %v10283_v14 = vld [vmem:[#allocation82_spill] sm:$0xff]  ;;  %v10284_v55 = vld [vmem:[#allocation83_spill] sm:$0xff] }
 0x497   : > { %v3378_v27 = vsel %vm2661_vm4, %v10277_v62, %v10276_v0  ;;  %v3725_v17 = vsel %vm2679_vm10, %v3724_v30, %v3723_v4  ;;  %v3733_v45 = vsel %vm2670_vm7, %v3732_v29, %v3731_v34  ;;  %v3387_v48 = vrot.slane %v10283_v14, 3  ;;  %v10287_v4 = vld [vmem:[#allocation75_spill] sm:$0xff] }
 0x498   : > { %v3380_v33 = vsel %vm2664_vm6, %v10279_v20, %v3378_v27  ;;  %v3735_v0 = vsel %vm2673_vm8, %v3734_v32, %v3733_v45  ;;  %v3389_v63 = vrot.slane %v10284_v55, 2  ;;  %v10286_v30 = vrot.slane %v10285_v49, 1  ;;  %v10288_v34 = vld [vmem:[#allocation71_spill] sm:$0xff] }
 0x499   : > { %v3382_v59 = vsel %vm2667_vm5, %v3381_v36, %v3380_v33  ;;  %v3737_v27 = vsel %vm2676_vm9, %v3736_v35, %v3735_v0  ;;  %v3395_v6 = vrot.slane %v10288_v34, 6  ;;  %v10289_v33 = vld [vmem:[#allocation69_spill] sm:$0xff] }
 0x49a   : > { %v3384_v20 = vsel %vm2670_vm7, %v3383_v26, %v3382_v59  ;;  %v3392_v29 = vsel %vm2661_vm4, %v10287_v4, %v10286_v30  ;;  %v3739_v44 = vsel %vm2679_vm10, %v3738_v37, %v3737_v27  ;;  %v10290_v36 = vrot.slane %v10289_v33, 7  ;;  %v10292_v59 = vld [vmem:[#allocation78_spill] sm:$0xff]  ;;  %v10293_v37 = vld [vmem:[#allocation73_spill] sm:$0xff] }
 0x49b   : > { %v3386_v32 = vsel %vm2673_vm8, %v3385_v9, %v3384_v20  ;;  %v3740_v35 = vpack.c.b16 %v3739_v44, %v3725_v17  ;;  %v3399_v23 = vrot.slane %v10292_v59, 4  ;;  %v3401_v27 = vrot.slane %v10293_v37, 3  ;;  %v10294_v9 = vld [vmem:[#allocation76_spill] sm:$0xff] }
 0x49c   : > { %v3394_v45 = vsel %vm2664_vm6, %v10290_v36, %v3392_v29  ;;  %v3388_v26 = vsel %vm2676_vm9, %v3387_v48, %v3386_v32  ;;  %v3403_v20 = vrot.slane %v10294_v9, 2  ;;  %v4063_v44 = vrot.slane %v8144_v21, 3 }
 0x49d   : > { %v3396_v0 = vsel %vm2667_vm5, %v3395_v6, %v3394_v45  ;;  %v3390_v30 = vsel %vm2679_vm10, %v3389_v63, %v3388_v26  ;;  %v3745_v5 = vsel %vm2789_vm11, %v3740_v35, 0  ;;  %v4064_v17 = vrot.slane %v8146_v40, 2 }
 0x49e   : > { %v3398_v53 = vsel %vm2670_vm7, %v3397_v54, %v3396_v0  ;;  %3754 = vmatpush.bf16.xpose.msra.mxu2 %v3745_v5  ;;  %v4066_v48 = vrot.slane %v8148_v56, 1  ;;  %v4069_v63 = vrot.slane %v8153_v10, 7  ;;  %v4071_v54 = vrot.slane %v8159_v1, 6 }
 0x49f   : > { %v3400_v29 = vsel %vm2673_vm8, %v3399_v23, %v3398_v53  ;;  %v4065_v36 = vsel %vm2661_vm4, %v4064_v17, %v4063_v44  ;;  %v4073_v45 = vrot.slane %v8161_v43, 5  ;;  %v4075_v23 = vrot.slane %v8537_v46, 4  ;;  %v10297_v44 = vld [vmem:[#allocation58_spill] sm:$0xff] }
 0x4a0   : > { %v3402_v6 = vsel %vm2676_vm9, %v3401_v27, %v3400_v29  ;;  %v4067_v40 = vsel %vm2664_vm6, %v4066_v48, %v4065_v36  ;;  %v4077_v5 = vrot.slane %v8163_v31, 3  ;;  %v4078_v53 = vrot.slane %v8165_v52, 2 }
 0x4a1   : > { %v3404_v32 = vsel %vm2679_vm10, %v3403_v20, %v3402_v6  ;;  %v4068_v56 = vsel %vm2667_vm5, %v8151_v39, %v4067_v40  ;;  %v4080_v10 = vrot.slane %v10273_v3, 1  ;;  %v4083_v1 = vrot.slane %v8174_v60, 7  ;;  %v10296_v20 = vld [vmem:[#allocation60_spill] sm:$0xff]  ;;  %v10298_v6 = vld [vmem:[#allocation59_spill] sm:$0xff] }
 0x4a2   : > { %v3405_v21 = vpack.c.b16 %v3404_v32, %v3390_v30  ;;  %v4085_v35 = vrot.slane %v8176_v61, 6  ;;  %v4070_v43 = vsel %vm2670_vm7, %v4069_v63, %v4068_v56  ;;  %v4079_v46 = vsel %vm2661_vm4, %v4078_v53, %v4077_v5  ;;  %v10295_v30 = vld [vmem:[#allocation65_spill] sm:$0xff]  ;;  %v10299_v32 = vld [vmem:[#allocation62_spill] sm:$0xff] }
 0x4a3   : > { %v4087_v26 = vrot.slane %v10272_v42, 5  ;;  %v4089_v31 = vrot.slane %v10274_v25, 4  ;;  %v4072_v52 = vsel %vm2673_vm8, %v4071_v54, %v4070_v43  ;;  %v4081_v39 = vsel %vm2664_vm6, %v4080_v10, %v4079_v46  ;;  %v10301_v5 = vld [vmem:[#allocation50_spill] sm:$0xff] }
 0x4a4   : > { %6144 = vmatmul.msk.bf16.vlgmr.msrb.gmra.mxu1 %vm2789_vm11, %v3405_v21  ;;  %v2967_v3 = vrot.slane %v10245_v50, 7  ;;  %v2969_v60 = vrot.slane %v10241_v41, 6  ;;  %v4074_v61 = vsel %vm2676_vm9, %v4073_v45, %v4072_v52  ;;  %v4082_v0 = vsel %vm2667_vm5, %v8171_v15, %v4081_v39  ;;  %v10300_v15 = vld [vmem:[#allocation87_spill] sm:$0xff] }
 0x4a5   : > { %v2971_v27 = vrot.slane %v10295_v30, 5  ;;  %v2973_v29 = vrot.slane %v10296_v20, 4  ;;  %v4076_v42 = vsel %vm2679_vm10, %v4075_v23, %v4074_v61  ;;  %v4084_v25 = vsel %vm2670_vm7, %v4083_v1, %v4082_v0  ;;  %v10303_v39 = vld [vmem:[#allocation51_spill] sm:$0xff] }
 0x4a6   : > { %v2968_v17 = vsel %vm2661_vm4, %v2967_v3, %v10297_v44  ;;  %v2975_v48 = vrot.slane %v10298_v6, 3  ;;  %v4086_v63 = vsel %vm2673_vm8, %v4085_v35, %v4084_v25  ;;  %v2977_v36 = vrot.slane %v10299_v32, 2  ;;  %v10302_v35 = vld [vmem:[#allocation53_spill] sm:$0xff]  ;;  %v10304_v3 = vld [vmem:[#allocation86_spill] sm:$0xff] }
 0x4a7   : > { %v2970_v54 = vsel %vm2664_vm6, %v2969_v60, %v2968_v17  ;;  %v2979_v45 = vrot.slane %v10300_v15, 1  ;;  %v4088_v21 = vsel %vm2676_vm9, %v4087_v26, %v4086_v63  ;;  %v2981_v23 = vrot.slane %v10254_v51, 7 }
 0x4a8   : > { %v2972_v40 = vsel %vm2667_vm5, %v2971_v27, %v2970_v54  ;;  %v2983_v53 = vrot.slane %v10301_v5, 6  ;;  %v4090_v56 = vsel %vm2679_vm10, %v4089_v31, %v4088_v21  ;;  %v2985_v1 = vrot.slane %v10252_v11, 5 }
 0x4a9   : > { %v2974_v10 = vsel %vm2670_vm7, %v2973_v29, %v2972_v40  ;;  %v2987_v43 = vrot.slane %v10302_v35, 4  ;;  %v4091_v46 = vpack.c.b16 %v4090_v56, %v4076_v42  ;;  %v2982_v26 = vsel %vm2661_vm4, %v2981_v23, %v10303_v39  ;;  %v10305_v42 = vld [vmem:[#allocation64_spill] sm:$0xff] }
 0x4aa   : > { %v2976_v52 = vsel %vm2673_vm8, %v2975_v48, %v2974_v10  ;;  %v2989_v60 = vrot.slane %v10304_v3, 3  ;;  %v2876_v61 = vrot.slane %v10278_v18, 6  ;;  %v2984_v31 = vsel %vm2664_vm6, %v2983_v53, %v2982_v26 }
 0x4ab   : > { %v2978_v0 = vsel %vm2676_vm9, %v2977_v36, %v2976_v52  ;;  %v2991_v27 = vrot.slane %v10255_v58, 2  ;;  %v4096_v29 = vsel %vm2789_vm11, %v4091_v46, 0  ;;  %v2986_v25 = vsel %vm2667_vm5, %v2985_v1, %v2984_v31 }
 0x4ac   : > { %v2993_v17 = vrot.slane %v10305_v42, 1  ;;  %v2874_v48 = vrot.slane %v10277_v62, 7  ;;  %4105 = vmatpush.bf16.xpose.msrb.mxu1 %v4096_v29  ;;  %v2980_v63 = vsel %vm2679_vm10, %v2979_v45, %v2978_v0  ;;  %v2988_v54 = vsel %vm2670_vm7, %v2987_v43, %v2986_v25 }
 0x4ad   : > { %v2878_v21 = vrot.slane %v10280_v16, 5  ;;  %v2880_v36 = vrot.slane %v10281_v22, 4  ;;  %v2990_v40 = vsel %vm2673_vm8, %v2989_v60, %v2988_v54  ;;  %v2882_v53 = vrot.slane %v10282_v2, 3 }
 0x4ae   : > { %v2875_v23 = vsel %vm2661_vm4, %v2874_v48, %v10275_v47  ;;  %v2884_v56 = vrot.slane %v10283_v14, 2  ;;  %v2992_v10 = vsel %vm2676_vm9, %v2991_v27, %v2990_v40  ;;  %v2888_v45 = vrot.slane %v10287_v4, 7 }
 0x4af   : > { %v2877_v1 = vsel %vm2664_vm6, %v2876_v61, %v2875_v23  ;;  %v2892_v43 = vrot.slane %v10288_v34, 5  ;;  %v2994_v46 = vsel %vm2679_vm10, %v2993_v17, %v2992_v10  ;;  %v2886_v26 = vrot.slane %v10284_v55, 1 }
 0x4b0   : > { %v2879_v52 = vsel %vm2667_vm5, %v2878_v21, %v2877_v1  ;;  %v2894_v60 = vrot.slane %v10291_v28, 4  ;;  %v2995_v0 = vpack.c.b16 %v2994_v46, %v2980_v63  ;;  %v2889_v27 = vsel %vm2661_vm4, %v2888_v45, %v10285_v49 }
 0x4b1   : > { %v2881_v31 = vsel %vm2670_vm7, %v2880_v36, %v2879_v52  ;;  %v2896_v61 = vrot.slane %v10292_v59, 3  ;;  %v10306_v25 = vrot.slane %v10289_v33, 6  ;;  %v2898_v48 = vrot.slane %v10293_v37, 2 }
 0x4b2   : > { %v2883_v29 = vsel %vm2673_vm8, %v2882_v53, %v2881_v31  ;;  %v3000_v54 = vsel %vm2789_vm11, %v2995_v0, 0  ;;  %v2900_v36 = vrot.slane %v10294_v9, 1  ;;  %v3775_v0 = vrot.slane %v10285_v49, 2 }
 0x4b3   : > { %v2891_v17 = vsel %vm2664_vm6, %v10306_v25, %v2889_v27  ;;  %v2885_v21 = vsel %vm2676_vm9, %v2884_v56, %v2883_v29  ;;  %3009 = vmatpush.bf16.xpose.msrb.mxu3 %v3000_v54  ;;  %v3776_v31 = vrot.slane %v10287_v4, 1  ;;  %v3765_v29 = vrot.slane %v10280_v16, 7 }
 0x4b4   : > { %v2893_v63 = vsel %vm2667_vm5, %v2892_v43, %v2891_v17  ;;  %v2887_v23 = vsel %vm2679_vm10, %v2886_v26, %v2885_v21  ;;  %v3761_v26 = vrot.slane %v10275_v47, 2 }
 0x4b5   : > { %v2895_v40 = vsel %vm2670_vm7, %v2894_v60, %v2893_v63  ;;  %v3762_v60 = vrot.slane %v10277_v62, 1  ;;  %v4112_v63 = vrot.slane %v10275_v47, 3  ;;  %v3781_v47 = vrot.slane %v10291_v28, 6 }
 0x4b6   : > { %v2897_v53 = vsel %vm2673_vm8, %v2896_v61, %v2895_v40  ;;  %v3777_v61 = vsel %vm2661_vm4, %v3776_v31, %v3775_v0  ;;  %v3767_v40 = vrot.slane %v10281_v22, 6  ;;  %v4126_v0 = vrot.slane %v10285_v49, 3 }
 0x4b7   : > { %v2899_v10 = vsel %vm2676_vm9, %v2898_v48, %v2897_v53  ;;  %v3763_v27 = vsel %vm2661_vm4, %v3762_v60, %v3761_v26  ;;  %v3779_v48 = vrot.slane %v10288_v34, 7  ;;  %v3778_v21 = vsel %vm2664_vm6, %v10289_v33, %v3777_v61 }
 0x4b8   : > { %v2901_v1 = vsel %vm2679_vm10, %v2900_v36, %v2899_v10  ;;  %v3764_v25 = vsel %vm2664_vm6, %v10278_v18, %v3763_v27  ;;  %v3769_v53 = vrot.slane %v10282_v2, 5  ;;  %v3771_v10 = vrot.slane %v10283_v14, 4 }
 0x4b9   : > { %v2902_v45 = vpack.c.b16 %v2901_v1, %v2887_v23  ;;  %v3766_v36 = vsel %vm2667_vm5, %v3765_v29, %v3764_v25  ;;  %v4113_v23 = vrot.slane %v10277_v62, 2  ;;  %v3773_v1 = vrot.slane %v10284_v55, 3 }
 0x4ba   : > { %v3783_v60 = vrot.slane %v10292_v59, 5  ;;  %v3785_v62 = vrot.slane %v10293_v37, 4  ;;  %v4127_v61 = vrot.slane %v10287_v4, 2 }
 0x4bb   : > { %6108 = vmatmul.msk.bf16.vlgmr.msrb.gmra.mxu3 %vm2789_vm11, %v2902_v45  ;;  %v4115_v45 = vrot.slane %v10278_v18, 1  ;;  %v3787_v18 = vrot.slane %v10294_v9, 3 }
 0x4f1   : > { %v8937_v56 = vpop.f32.mrf.mxu0 }
 0x4f2   : > { %v3455_v43 = vsel %vm3016_vm12, %v8937_v56, -inf }
 0x4f3   : > { %3456 = vmax.xlane.f32.xlu0 %v3455_v43  ;;  %v3768_v43 = vsel %vm2670_vm7, %v3767_v40, %v3766_v36  ;;  %v4118_v36 = vrot.slane %v10281_v22, 7  ;;  %v4128_v22 = vsel %vm2661_vm4, %v4127_v61, %v4126_v0  ;;  %v1686_v0 = vpop.f32.mrf.mxu2  ;;  %v3134_v61 = vrot.slane %v8449_v8, 7 }
 0x4f4   : > { %v3770_v26 = vsel %vm2673_vm8, %v3769_v53, %v3768_v43  ;;  %v4120_v53 = vrot.slane %v10282_v2, 6  ;;  %v4134_v43 = vrot.slane %v10292_v59, 6 }
 0x4f5   : > { %v3772_v31 = vsel %vm2676_vm9, %v3771_v10, %v3770_v26  ;;  %v4122_v10 = vrot.slane %v10283_v14, 5  ;;  %v4136_v14 = vrot.slane %v10293_v37, 5 }
 0x4f6   : > { %v8981_v29 = vsel %vm2679_vm10, %v3773_v1, %v3772_v31  ;;  %v3136_v31 = vrot.slane %v8453_v13, 6 }
 0x4f7   : > { %10307 = vst [vmem:[#allocation61_spill] sm:$0xff] %v8981_v29  ;;  %v4142_v29 = vrot.slane %v10245_v50, 2 }
 0x4f9   : > { %v8941_v46 = vpop.f32.mrf.mxu0 }
 0x4fa   : > { %v3458_v52 = vsel %vm3016_vm12, %v8941_v46, -inf }
 0x4fb   : > { %3459 = vmax.xlane.f32.xlu1 %v3458_v52  ;;  %v3780_v52 = vsel %vm2667_vm5, %v3779_v48, %v3778_v21  ;;  %v4114_v48 = vsel %vm2661_vm4, %v4113_v23, %v4112_v63  ;;  %v4124_v23 = vrot.slane %v10284_v55, 4  ;;  %v10322_v63 = vld [vmem:[#allocation43_spill] sm:$0xff] }
 0x4fc   : > { %v3782_v27 = vsel %vm2670_vm7, %v3781_v47, %v3780_v52  ;;  %v4116_v49 = vsel %vm2664_vm6, %v4115_v45, %v4114_v48  ;;  %v4132_v45 = vrot.slane %v10291_v28, 7  ;;  %v4138_v47 = vrot.slane %v10294_v9, 4  ;;  %v10311_v48 = vld [vmem:[#allocation29_spill] sm:$0xff] }
 0x4fd   : > { %v3784_v25 = vsel %vm2673_vm8, %v3783_v60, %v3782_v27  ;;  %v4117_v4 = vsel %vm2667_vm5, %v10280_v16, %v4116_v49  ;;  %v1688_v27 = vpop.f32.mrf.mxu2  ;;  %v3148_v49 = vrot.slane %v8479_v19, 7 }
 0x4fe   : > { %v3786_v21 = vsel %vm2676_vm9, %v3785_v62, %v3784_v25  ;;  %v3138_v25 = vrot.slane %v8459_v12, 5 }
 0x4ff   : > { %v8990_v40 = vsel %vm2679_vm10, %v3787_v18, %v3786_v21  ;;  %v3150_v18 = vrot.slane %v8467_v57, 6  ;;  %v3140_v21 = vrot.slane %v8462_v38, 4 }
 0x500   : > { %10308 = vst [vmem:[#allocation33_spill] sm:$0xff] %v8990_v40 }
 0x50a   : > { %v8954_v17 = vpop.f32.mrf.mxu3 }
 0x50b   : > { %v3017_v54 = vsel %vm3016_vm12, %v8954_v17, -inf }
 0x50c   : > { %3018 = vmax.xlane.f32.xlu1 %v3017_v54  ;;  %v4129_v54 = vrot.slane %v10289_v33, 1  ;;  %v4119_v33 = vsel %vm2670_vm7, %v4118_v36, %v4117_v4  ;;  %v3152_v36 = vrot.slane %v10270_v7, 5  ;;  %v9038_v4 = vadd.f32 %v1688_v27, %v10311_v48 }
 0x50d   : > { %v4121_v1 = vsel %vm2673_vm8, %v4120_v53, %v4119_v33  ;;  %v3135_v53 = vsel %vm2661_vm4, %v3134_v61, %v8440_v24 }
 0x50e   : > { %v4123_v16 = vsel %vm2676_vm9, %v4122_v10, %v4121_v1  ;;  %v4130_v2 = vsel %vm2664_vm6, %v4129_v54, %v4128_v22  ;;  %v9032_v54 = vadd.f32 %v1686_v0, %v10311_v48  ;;  %v10312_v10 = vld [vmem:[#allocation54_spill] sm:$0xff]  ;;  %v3137_v22 = vsel %vm2664_vm6, %v3136_v31, %v3135_v53  ;;  %v10319_v31 = vld [vmem:[#allocation63_spill] sm:$0xff] }
 0x50f   : > { %v4131_v52 = vsel %vm2667_vm5, %v10288_v34, %v4130_v2  ;;  %v9012_v26 = vsel %vm2679_vm10, %v4124_v23, %v4123_v16  ;;  %v3142_v33 = vrot.slane %v10312_v10, 3  ;;  %v10313_v23 = vld [vmem:[#allocation68_spill] sm:$0xff]  ;;  %v10315_v16 = vld [vmem:[#allocation66_spill] sm:$0xff]  ;;  %v3160_v48 = vrot.slane %v10319_v31, 1 }
 0x510   : > { %v4133_v55 = vsel %vm2670_vm7, %v4132_v45, %v4131_v52  ;;  %10309 = vst [vmem:[#allocation32_spill] sm:$0xff] %v9012_v26  ;;  %v3154_v1 = vrot.slane %v10313_v23, 4  ;;  %v10314_v45 = vld [vmem:[#allocation52_spill] sm:$0xff]  ;;  %v3149_v2 = vsel %vm2661_vm4, %v3148_v49, %v10315_v16  ;;  %v9058_v53 = vpack.i.bf16 %v9038_v4, %v9032_v54 }
 0x511   : > { %v4135_v28 = vsel %vm2673_vm8, %v4134_v43, %v4133_v55  ;;  %v3144_v43 = vrot.slane %v10314_v45, 2  ;;  %v10317_v55 = vld [vmem:[#allocation57_spill] sm:$0xff]  ;;  %v3684_v26 = vrot.slane %v10322_v63, 1  ;;  %v10323_v63 = vld [vmem:[#allocation34_spill] sm:$0xff] }
 0x512   : > { %v4137_v59 = vsel %vm2676_vm9, %v4136_v14, %v4135_v28  ;;  %v9021_v62 = vpop.f32.mrf.mxu3  ;;  %v10316_v14 = vld [vmem:[#allocation56_spill] sm:$0xff]  ;;  %v3146_v28 = vrot.slane %v10317_v55, 1 }
 0x513   : > { %v9017_v60 = vsel %vm2679_vm10, %v4138_v47, %v4137_v59  ;;  %v3156_v52 = vrot.slane %v10316_v14, 3  ;;  %v3139_v47 = vsel %vm2667_vm5, %v3138_v25, %v3137_v22  ;;  %v3151_v59 = vsel %vm2664_vm6, %v3150_v18, %v3149_v2 }
 0x514   : > { %10310 = vst [vmem:[#allocation85_spill] sm:$0xff] %v9017_v60  ;;  %v3141_v27 = vsel %vm2670_vm7, %v3140_v21, %v3139_v47  ;;  %v3153_v61 = vsel %vm2667_vm5, %v3152_v36, %v3151_v59  ;;  %v4141_v60 = vrot.slane %v10297_v44, 3 }
 0x515   : > { %v3143_v49 = vsel %vm2673_vm8, %v3142_v33, %v3141_v27  ;;  %v3155_v25 = vsel %vm2670_vm7, %v3154_v1, %v3153_v61 }
 0x516   : > { %v3145_v22 = vsel %vm2676_vm9, %v3144_v43, %v3143_v49  ;;  %v3157_v18 = vsel %vm2673_vm8, %v3156_v52, %v3155_v25  ;;  %v3020_v49 = vsel %vm3016_vm12, %v9021_v62, -inf }
 0x517   : > { %v3147_v2 = vsel %vm2679_vm10, %v3146_v28, %v3145_v22 }
 0x53e   : > { %v9023_v34 = vpop.f32.mrf.mxu3 }
 0x53f   : > { %v3023_v9 = vsel %vm3016_vm12, %v9023_v34, -inf }
 0x540   : > { %3024 = vmax.xlane.f32.xlu1 %v3023_v9  ;;  %v10318_v9 = vld [vmem:[#allocation55_spill] sm:$0xff] }
 0x541   : > { %v3158_v0 = vrot.slane %v10318_v9, 2  ;;  %v3916_v40 = vrot.slane %v10318_v9, 4 }
 0x543   : > { %v3159_v21 = vsel %vm2676_vm9, %v3158_v0, %v3157_v18 }
 0x544   : > { %v3161_v36 = vsel %vm2679_vm10, %v3160_v48, %v3159_v21 }
 0x545   : > { %v3162_v47 = vpack.c.b16 %v3161_v36, %v3147_v2 }
 0x546   : > { %v9082_v22 = vpop.f32.mrf.mxu3 }
 0x547   : > { %3174 = vmatpush.bf16.msra.mxu3 %v3162_v47  ;;  %v3026_v18 = vsel %vm3016_vm12, %v9082_v22, -inf }
 0x559   : > { %6942 = vrot.lane.b32.xlu1 %v9058_v53, %s7464_s24 }
 0x566   : > { %v3457_v59 = vpop.xlane.xlu0 %3456 }
 0x567   : > { %v3467_v33 = vsub.f32 %v8937_v56, %v3457_v59  ;;  %v9093_v59 = vpop.f32.mrf.mxu1 }
 0x569   : > { %v3471_v27 = vmul.f32 1.442695, %v3467_v33 }
 0x56b   : > { %6957 = vpow2.f32 %v3471_v27 }
 0x56e   : > { %v3460_v1 = vpop.xlane.xlu1 %3459 }
 0x56f   : > { %v3468_v43 = vsub.f32 %v8941_v46, %v3460_v1  ;;  %v9099_v1 = vpop.f32.mrf.mxu1 }
 0x571   : > { %v9071_v52 = vpop.eup %6957  ;;  %v3473_v28 = vmul.f32 1.442695, %v3468_v43  ;;  %v3464_v43 = vsel %vm3016_vm12, %v9099_v1, -inf }
 0x572   : > { %v3479_v0 = vsel %vm3016_vm12, %v9071_v52, 0.0 }
 0x573   : > { %6959 = vpow2.f32 %v3473_v28  ;;  %3480 = vadd.xlane.f32.xlu2 %v3479_v0  ;;  %v3461_v28 = vsel %vm3016_vm12, %v9093_v59, -inf  ;;  %v3906_v0 = vrot.slane %v10315_v16, 2 }
 0x579   : > { %v9075_v61 = vpop.eup %6959 }
 0x57a   : > { %v3482_v48 = vsel %vm3016_vm12, %v9075_v61, 0.0 }
 0x57b   : > { %3483 = vadd.xlane.f32.xlu0 %v3482_v48  ;;  %v3893_v48 = vrot.slane %v8449_v8, 1 }
 0x57f   : > { %v3019_v56 = vpop.xlane.xlu1 %3018 }
 0x580   : > { %v3029_v46 = vsub.f32 %v8954_v17, %v3019_v56  ;;  %v3907_v56 = vrot.slane %v8479_v19, 1 }
 0x582   : > { %v3033_v25 = vmul.f32 1.442695, %v3029_v46 }
 0x583   : > { %3021 = vmax.xlane.f32.xlu0 %v3020_v49 }
 0x584   : > { %6961 = vpow2.f32 %v3033_v25  ;;  %v3908_v25 = vsel %vm2661_vm4, %v3907_v56, %v3906_v0 }
 0x58a   : > { %v9086_v2 = vpop.eup %6961 }
 0x58b   : > { %3027 = vmax.xlane.f32.xlu0 %v3026_v18  ;;  %v3041_v21 = vsel %vm3016_vm12, %v9086_v2, 0.0  ;;  %v3896_v18 = vrot.slane %v8459_v12, 7 }
 0x58c   : > { %3042 = vadd.xlane.f32.xlu2 %v3041_v21  ;;  %v3910_v21 = vrot.slane %v10270_v7, 7 }
 0x5a4   : > { %6947 = vrot.lane.b32.xlu2 %v9058_v53, %s7462_s21 }
 0x5b3   : > { %v3025_v36 = vpop.xlane.xlu1 %3024 }
 0x5b4   : > { %v3031_v17 = vsub.f32 %v9023_v34, %v3025_v36  ;;  %v3892_v34 = vrot.slane %v8440_v24, 2 }
 0x5b6   : > { %v3037_v47 = vmul.f32 1.442695, %v3031_v17  ;;  %v3894_v46 = vsel %vm2661_vm4, %v3893_v48, %v3892_v34  ;;  %v3909_v17 = vsel %vm2664_vm6, %v8467_v57, %v3908_v25  ;;  %v10320_v48 = vld [vmem:[#allocation38_spill] sm:$0xff]  ;;  %v3914_v25 = vrot.slane %v10316_v14, 5 }
 0x5b7   : > { %v3895_v36 = vsel %vm2664_vm6, %v8453_v13, %v3894_v46  ;;  %v3911_v34 = vsel %vm2667_vm5, %v3910_v21, %v3909_v17  ;;  %v3698_v56 = vrot.slane %v10320_v48, 1  ;;  %v3900_v46 = vrot.slane %v10312_v10, 5 }
 0x5b8   : > { %6963 = vpow2.f32 %v3037_v47  ;;  %v3898_v47 = vrot.slane %v8462_v38, 6  ;;  %v4156_v17 = vrot.slane %v10254_v51, 2  ;;  %v3902_v48 = vrot.slane %v10314_v45, 4 }
 0x5be   : > { %v9095_v33 = vpop.eup %6963 }
 0x5bf   : > { %v3047_v27 = vsel %vm3016_vm12, %v9095_v33, 0.0 }
 0x5c0   : > { %3048 = vadd.xlane.f32.xlu1 %v3047_v27  ;;  %v3912_v27 = vrot.slane %v10313_v23, 6 }
 0x5c2   : > { %v3913_v21 = vsel %vm2670_vm7, %v3912_v27, %v3911_v34  ;;  %v4144_v27 = vrot.slane %v10241_v41, 1 }
 0x5c8   : > { %3465 = vmax.xlane.f32.xlu1 %v3464_v43 }
 0x5cd   : > { %3462 = vmax.xlane.f32.xlu2 %v3461_v28  ;;  %v3897_v28 = vsel %vm2667_vm5, %v3896_v18, %v3895_v36  ;;  %v4155_v36 = vrot.slane %v10303_v39, 3 }
 0x5ce   : > { %v3899_v18 = vsel %vm2670_vm7, %v3898_v47, %v3897_v28  ;;  %v3915_v47 = vsel %vm2673_vm8, %v3914_v25, %v3913_v21  ;;  %v4158_v28 = vrot.slane %v10301_v5, 1 }
 0x5cf   : > { %v3901_v10 = vsel %vm2673_vm8, %v3900_v46, %v3899_v18  ;;  %v3917_v25 = vsel %vm2676_vm9, %v3916_v40, %v3915_v47  ;;  %v10324_v18 = vld [vmem:[#allocation44_spill] sm:$0xff] }
 0x5d0   : > { %v3903_v46 = vsel %vm2676_vm9, %v3902_v48, %v3901_v10  ;;  %v4161_v10 = vrot.slane %v10302_v35, 7 }
 0x5e6   : > { %v3481_v49 = vpop.xlane.xlu2 %3480 }
 0x5e7   : > { %6965 = vrcp.f32 %v3481_v49  ;;  %v10321_v49 = vld [vmem:[#allocation42_spill] sm:$0xff] }
 0x5e8   : > { %v3683_v37 = vrot.slane %v10321_v49, 2 }
 0x5ea   : > { %v3685_v14 = vsel %vm2661_vm4, %v3684_v26, %v3683_v37  ;;  %v3904_v26 = vrot.slane %v10317_v55, 3  ;;  %v3918_v37 = vrot.slane %v10319_v31, 3 }
 0x5eb   : > { %v3686_v21 = vsel %vm2664_vm6, %v10324_v18, %v3685_v14 }
 0x5ec   : > { %v3905_v14 = vsel %vm2679_vm10, %v3904_v26, %v3903_v46  ;;  %v10329_v46 = vld [vmem:[#allocation46_spill] sm:$0xff] }
 0x5ed   : > { %v6966_v0 = vpop.eup %6965 }
 0x5ee   : > { %v3484_v43 = vpop.xlane.xlu0 %3483  ;;  %v3495_v49 = vmul.f32 %v6966_v0, %v9071_v52  ;;  %v4143_v52 = vsel %vm2661_vm4, %v4142_v29, %v4141_v60  ;;  %v4157_v0 = vsel %vm2661_vm4, %v4156_v17, %v4155_v36  ;;  %v10327_v36 = vld [vmem:[#allocation41_spill] sm:$0xff] }
 0x5ef   : > { %6967 = vrcp.f32 %v3484_v43  ;;  %v3697_v43 = vrot.slane %v10323_v63, 2  ;;  %v4145_v29 = vsel %vm2664_vm6, %v4144_v27, %v4143_v52  ;;  %v4159_v60 = vsel %vm2664_vm6, %v4158_v28, %v4157_v0 }
 0x5f0   : > { %v3499_v63 = vpack.c.bf16 %v3495_v49, %v3495_v49  ;;  %v10326_v49 = vld [vmem:[#allocation36_spill] sm:$0xff]  ;;  %v3701_v17 = vrot.slane %v10327_v36, 7  ;;  %v4146_v47 = vsel %vm2667_vm5, %v10295_v30, %v4145_v29  ;;  %v4160_v27 = vsel %vm2667_vm5, %v10252_v11, %v4159_v60 }
 0x5f1   : > { %v3699_v7 = vsel %vm2661_vm4, %v3698_v56, %v3697_v43  ;;  %v10325_v56 = vld [vmem:[#allocation45_spill] sm:$0xff]  ;;  %v4149_v36 = vrot.slane %v10298_v6, 6  ;;  %v4162_v29 = vsel %vm2670_vm7, %v4161_v10, %v4160_v27  ;;  %v4151_v60 = vrot.slane %v10299_v32, 5 }
 0x5f2   : > { %v3687_v43 = vrot.slane %v10325_v56, 7  ;;  %v3505_v40 = vunpack.c.l.b16 %v3499_v63  ;;  %v4163_v63 = vrot.slane %v10304_v3, 6  ;;  %v4167_v27 = vrot.slane %v10305_v42, 4 }
 0x5f5   : > { %v6968_v34 = vpop.eup %6967 }
 0x5f6   : > { %v3496_v9 = vmul.f32 %v6968_v34, %v9075_v61  ;;  %v3700_v61 = vsel %vm2664_vm6, %v10326_v49, %v3699_v7  ;;  %v4147_v34 = vrot.slane %v10296_v20, 7  ;;  %v3688_v7 = vsel %vm2667_vm5, %v3687_v43, %v3686_v21 }
 0x5f7   : > { %v3702_v0 = vsel %vm2667_vm5, %v3701_v17, %v3700_v61  ;;  %v4165_v61 = vrot.slane %v10255_v58, 5  ;;  %v10330_v17 = vld [vmem:[#allocation47_spill] sm:$0xff] }
 0x5f8   : > { %v3500_v45 = vpack.c.bf16 %v3496_v9, %v3496_v9  ;;  %v3919_v9 = vsel %vm2679_vm10, %v3918_v37, %v3917_v25  ;;  %v3689_v37 = vrot.slane %v10329_v46, 6  ;;  %v4148_v25 = vsel %vm2670_vm7, %v4147_v34, %v4146_v47 }
 0x5f9   : > { %v3920_v52 = vpack.c.b16 %v3919_v9, %v3905_v14  ;;  %v4150_v9 = vsel %vm2673_vm8, %v4149_v36, %v4148_v25  ;;  %v4153_v47 = vrot.slane %v10300_v15, 4  ;;  %v3022_v25 = vpop.xlane.xlu0 %3021 }
 0x5fa   : > { %v3506_v48 = vunpack.c.l.b16 %v3500_v45  ;;  %v10328_v45 = vld [vmem:[#allocation35_spill] sm:$0xff]  ;;  %v3690_v21 = vsel %vm2670_vm7, %v3689_v37, %v3688_v7  ;;  %v10332_v7 = vld [vmem:[#allocation48_spill] sm:$0xff]  ;;  %v4152_v37 = vsel %vm2676_vm9, %v4151_v60, %v4150_v9  ;;  %v3030_v60 = vsub.f32 %v9021_v62, %v3022_v25  ;;  %v6943_v25 = vpop.permute.xlu1 %6942 }
 0x5fb   : > { %v3703_v26 = vrot.slane %v10328_v45, 6 }
 0x5fc   : > { %v3507_v28 = vpack.c.b16 %v3506_v48, %v3505_v40  ;;  %v3691_v40 = vrot.slane %v10330_v17, 5  ;;  %v10331_v48 = vld [vmem:[#allocation37_spill] sm:$0xff] }
 0x5fd   : > { %v3704_v43 = vsel %vm2670_vm7, %v3703_v26, %v3702_v0  ;;  %v3705_v14 = vrot.slane %v10331_v48, 5  ;;  %v10333_v0 = vld [vmem:[#allocation39_spill] sm:$0xff] }
 0x5fe   : > { %6145 = vmatmul.msk.bf16.vlgmr.msrb.gmra.mxu2 %vm3016_vm12, %v3507_v28  ;;  %v4164_v28 = vsel %vm2673_vm8, %v4163_v63, %v4162_v29  ;;  %v3692_v34 = vsel %vm2673_vm8, %v3691_v40, %v3690_v21  ;;  %v3707_v26 = vrot.slane %v10333_v0, 4  ;;  %v10334_v29 = vld [vmem:[#allocation49_spill] sm:$0xff] }
 0x5ff   : > { %3932 = vmatpush.bf16.msrb.mxu2 %v3920_v52  ;;  %v3706_v10 = vsel %vm2673_vm8, %v3705_v14, %v3704_v43  ;;  %v3693_v52 = vrot.slane %v10332_v7, 4  ;;  %v4166_v48 = vsel %vm2676_vm9, %v4165_v61, %v4164_v28  ;;  %v3695_v21 = vrot.slane %v10334_v29, 3  ;;  %v10335_v43 = vld [vmem:[#allocation40_spill] sm:$0xff] }
 0x600   : > { %v3708_v63 = vsel %vm2676_vm9, %v3707_v26, %v3706_v10  ;;  %v3709_v40 = vrot.slane %v10335_v43, 3  ;;  %v4154_v14 = vsel %vm2679_vm10, %v4153_v47, %v4152_v37  ;;  %v4168_v17 = vsel %vm2679_vm10, %v4167_v27, %v4166_v48  ;;  %v3043_v48 = vpop.xlane.xlu2 %3042 }
 0x601   : > { %v3694_v36 = vsel %vm2676_vm9, %v3693_v52, %v3692_v34  ;;  %v4169_v61 = vpack.c.b16 %v4168_v17, %v4154_v14  ;;  %v3035_v28 = vmul.f32 1.442695, %v3030_v60  ;;  %v3028_v62 = vpop.xlane.xlu0 %3027 }
 0x602   : > { %v3696_v7 = vsel %vm2679_vm10, %v3695_v21, %v3694_v36  ;;  %v3710_v0 = vsel %vm2679_vm10, %v3709_v40, %v3708_v63  ;;  %v3032_v17 = vsub.f32 %v9082_v22, %v3028_v62  ;;  %v6576_v22 = vld [vmem:[%s7760_s26 + $0x18] sm:$0xff]  ;;  %v3794_v62 = vrot.slane %v10295_v30, 7 }
 0x603   : > { %v3711_v9 = vpack.c.b16 %v3710_v0, %v3696_v7  ;;  %v4174_v34 = vsel %vm2789_vm11, %v4169_v61, 0  ;;  %6969 = vpow2.f32 %v3035_v28  ;;  %3633 = vmatpush.bf16.msra.mxu0 %v6576_v22  ;;  %v3790_v61 = vrot.slane %v10297_v44, 2 }
 0x604   : > { %v3039_v0 = vmul.f32 1.442695, %v3032_v17  ;;  %v3805_v44 = vrot.slane %v10254_v51, 1  ;;  %v6945_v22 = vunpack.i.h.bf16 %v6943_v25 }
 0x608   : > { %v9204_v27 = vpop.permute.xlu2 %6947 }
 0x609   : > { %v6970_v10 = vpop.eup %6969 }
 0x60a   : > { %v3044_v47 = vsel %vm3016_vm12, %v6970_v10, 0.0 }
 0x60b   : > { %3045 = vadd.xlane.f32.xlu0 %v3044_v47 }
 0x60e   : > { %6167 = vmatmul.msk.bf16.vlgmr.msra.gmra.mxu2 %vm2789_vm11, %v3711_v9  ;;  %v3791_v9 = vrot.slane %v10245_v50, 1 }
 0x60f   : > { %4183 = vmatpush.bf16.xpose.msra.mxu2 %v4174_v34 }
 0x610   : > { %v3792_v47 = vsel %vm2661_vm4, %v3791_v9, %v3790_v61  ;;  %v3798_v61 = vrot.slane %v10298_v6, 5  ;;  %v3810_v6 = vrot.slane %v10302_v35, 6 }
 0x61f   : > { %6952 = vrot.lane.b32.xlu0 %v9058_v53, %s7463_s28 }
 0x633   : > { %v3049_v40 = vpop.xlane.xlu1 %3048 }
 0x640   : > { %v3463_v7 = vpop.xlane.xlu2 %3462 }
 0x641   : > { %v3469_v52 = vsub.f32 %v9093_v59, %v3463_v7  ;;  %v6575_v59 = vld [vmem:[%s7760_s26 + $0x10] sm:$0xff]  ;;  %v3466_v7 = vpop.xlane.xlu1 %3465 }
 0x642   : > { %3634 = vmatpush.bf16.msra.mxu0 %v6575_v59 }
 0x643   : > { %v3475_v26 = vmul.f32 1.442695, %v3469_v52  ;;  %v6950_v52 = vunpack.i.h.bf16 %v9204_v27 }
 0x645   : > { %6971 = vpow2.f32 %v3475_v26  ;;  %v3470_v26 = vsub.f32 %v9099_v1, %v3466_v7  ;;  %v3808_v1 = vrot.slane %v10252_v11, 7 }
 0x646   : > { %6973 = vpow2.f32 %v3039_v0  ;;  %v3804_v0 = vrot.slane %v10303_v39, 2 }
 0x647   : > { %6975 = vrcp.f32 %v3043_v48  ;;  %v3793_v48 = vsel %vm2664_vm6, %v10241_v41, %v3792_v47  ;;  %v6949_v41 = vunpack.i.l.bf16 %v9204_v27  ;;  %v3477_v39 = vmul.f32 1.442695, %v3470_v26 }
 0x64b   : > { %v9208_v37 = vpop.eup %6971 }
 0x64c   : > { %v3485_v53 = vsel %vm3016_vm12, %v9208_v37, 0.0  ;;  %v9212_v36 = vpop.eup %6973 }
 0x64d   : > { %3486 = vadd.xlane.f32.xlu2 %v3485_v53  ;;  %v3050_v63 = vsel %vm3016_vm12, %v9212_v36, 0.0  ;;  %v6976_v34 = vpop.eup %6975  ;;  %v3795_v53 = vsel %vm2667_vm5, %v3794_v62, %v3793_v48  ;;  %v3800_v62 = vrot.slane %v10299_v32, 4 }
 0x64e   : > { %3051 = vadd.xlane.f32.xlu0 %v3050_v63  ;;  %v3057_v17 = vmul.f32 %v6976_v34, %v9086_v2  ;;  %v3796_v63 = vrot.slane %v10296_v20, 6  ;;  %v6944_v2 = vunpack.i.l.bf16 %v6943_v25  ;;  %v2386_v25 = vrot.slane %v6949_v41, 4 }
 0x650   : > { %v3061_v30 = vpack.c.bf16 %v3057_v17, %v3057_v17  ;;  %v3797_v51 = vsel %vm2670_vm7, %v3796_v63, %v3795_v53  ;;  %v2384_v20 = vrot.slane %v6944_v2, 4  ;;  %v2387_v35 = vsel %vm1732_vm3, %v6944_v2, %v2386_v25 }
 0x651   : > { %v3799_v17 = vsel %vm2673_vm8, %v3798_v61, %v3797_v51 }
 0x652   : > { %v3067_v9 = vunpack.c.l.b16 %v3061_v30  ;;  %v2385_v11 = vsel %vm1732_vm3, %v2384_v20, %v6949_v41  ;;  %v3801_v26 = vsel %vm2676_vm9, %v3800_v62, %v3799_v17 }
 0x67e   : > { %v3046_v28 = vpop.xlane.xlu0 %3045 }
 0x67f   : > { %6977 = vrcp.f32 %v3046_v28  ;;  %v2440_v28 = vrot.slane %v6945_v22, 4 }
 0x680   : > { %6979 = vpow2.f32 %v3477_v39  ;;  %v3816_v39 = vrot.slane %v10305_v42, 3 }
 0x681   : > { %v3550_v21 = vpop.f32.mrf.mxu2  ;;  %v2441_v7 = vsel %vm1732_vm3, %v2440_v28, %v6950_v52  ;;  %6981 = vrcp.f32 %v3049_v40  ;;  %v2430_v40 = vrot.slane %v9038_v4, 4 }
 0x685   : > { %v6978_v50 = vpop.eup %6977 }
 0x686   : > { %v3058_v59 = vmul.f32 %v6978_v50, %v6970_v10  ;;  %v3802_v50 = vrot.slane %v10300_v15, 3  ;;  %v2374_v15 = vrot.slane %v9032_v54, 4  ;;  %v9264_v41 = vpop.eup %6979 }
 0x687   : > { %v3488_v62 = vsel %vm3016_vm12, %v9264_v41, 0.0 }
 0x689   : > { %v3552_v14 = vpop.f32.mrf.mxu2 }
 0x68a   : > { %v3607_v60 = vpack.c.bf16 %v3552_v14, %v3550_v21  ;;  %v2442_v21 = vrot.slane %v6950_v52, 4  ;;  %v3062_v14 = vpack.c.bf16 %v3058_v59, %v3058_v59  ;;  %v3812_v52 = vrot.slane %v10304_v3, 5 }
 0x68b   : > { %v3814_v59 = vrot.slane %v10255_v58, 4 }
 0x68c   : > { %6155 = vmatmul.msk.bf16.vlgmr.msra.gmra.mxu0 %vm2789_vm11, %v3607_v60  ;;  %v3806_v60 = vsel %vm2661_vm4, %v3805_v44, %v3804_v0  ;;  %v3068_v34 = vunpack.c.l.b16 %v3062_v14  ;;  %v2443_v27 = vsel %vm1732_vm3, %v6945_v22, %v2442_v21  ;;  %v10336_v0 = vld [vmem:[#allocation30_spill] sm:$0xff] }
 0x68d   : > { %v3807_v10 = vsel %vm2664_vm6, %v10301_v5, %v3806_v60  ;;  %v2451_v44 = vperm.slane %v2443_v27, %v10336_v0  ;;  %v9257_v53 = vperm.slane %v2385_v11, %v10336_v0  ;;  %v2447_v63 = vperm.slane %v2441_v7, %v10336_v0 }
 0x68e   : > { %v3069_v47 = vpack.c.b16 %v3068_v34, %v3067_v9  ;;  %v3809_v5 = vsel %vm2667_vm5, %v3808_v1, %v3807_v10  ;;  %v9267_v3 = vperm.slane %v2387_v35, %v10336_v0  ;;  %v9270_v60 = vsel %vm2679_vm10, %v3802_v50, %v3801_v26  ;;  %v6982_v10 = vpop.eup %6981 }
 0x68f   : > { %v3811_v22 = vsel %vm2670_vm7, %v3810_v6, %v3809_v5  ;;  %v2464_v14 = vrot.slane %v2451_v44, 4  ;;  %v2396_v9 = vrot.slane %v9257_v53, 4  ;;  %v2452_v28 = vrot.slane %v2447_v63, 4 }
 0x690   : > { %6125 = vmatmul.msk.bf16.vlgmr.msra.gmra.mxu3 %vm3016_vm12, %v3069_v47  ;;  %v3813_v34 = vsel %vm2673_vm8, %v3812_v52, %v3811_v22  ;;  %v2408_v5 = vrot.slane %v9267_v3, 4  ;;  %v9296_v35 = vmul.f32 %v6982_v10, %v9095_v33 }
 0x691   : > { %v9246_v48 = vpop.f32.mrf.mxu2  ;;  %v6953_v30 = vpop.permute.xlu0 %6952  ;;  %v3815_v50 = vsel %vm2676_vm9, %v3814_v59, %v3813_v34 }
 0x692   : > { %v3839_v32 = vsel %vm3016_vm12, %v9246_v48, -inf  ;;  %v6955_v2 = vunpack.i.h.bf16 %v6953_v30  ;;  %v6954_v21 = vunpack.i.l.bf16 %v6953_v30 }
 0x693   : > { %3840 = vmax.xlane.f32.xlu1 %v3839_v32 }
 0x694   : > { %v2428_v51 = vrot.slane %v6955_v2, 4  ;;  %v2431_v58 = vsel %vm1732_vm3, %v6955_v2, %v2430_v40  ;;  %v2372_v61 = vrot.slane %v6954_v21, 4  ;;  %v2375_v1 = vsel %vm1732_vm3, %v6954_v21, %v2374_v15 }
 0x695   : > { %v2439_v20 = vperm.slane %v2431_v58, %v10336_v0  ;;  %v2383_v27 = vperm.slane %v2375_v1, %v10336_v0 }
 0x696   : > { %v2429_v25 = vsel %vm1732_vm3, %v2428_v51, %v9038_v4  ;;  %v2373_v42 = vsel %vm1732_vm3, %v2372_v61, %v9032_v54  ;;  %v10337_v4 = vld [vmem:[#allocation31_spill] sm:$0xff] }
 0x697   : > { %v2435_v17 = vperm.slane %v2429_v25, %v10336_v0  ;;  %v2465_v6 = vsel %vm1732_vm3, %v2464_v14, %v2439_v20  ;;  %v2466_v11 = vrot.slane %v2439_v20, 4  ;;  %v2379_v7 = vperm.slane %v2373_v42, %v10336_v0 }
 0x698   : > { %v2471_v32 = vperm.slane %v2465_v6, %v10337_v4  ;;  %v2410_v14 = vrot.slane %v2383_v27, 4 }
 0x699   : > { %v9283_v47 = vpop.f32.mrf.mxu2  ;;  %v2453_v26 = vsel %vm1732_vm3, %v2452_v28, %v2435_v17  ;;  %v2454_v52 = vrot.slane %v2435_v17, 4  ;;  %v2467_v30 = vsel %vm1732_vm3, %v2451_v44, %v2466_v11  ;;  %v2397_v21 = vsel %vm1732_vm3, %v2396_v9, %v2379_v7 }
 0x69a   : > { %v3842_v54 = vsel %vm3016_vm12, %v9283_v47, -inf  ;;  %v2459_v0 = vperm.slane %v2453_v26, %v10337_v4  ;;  %v2475_v22 = vperm.slane %v2467_v30, %v10337_v4  ;;  %v2480_v15 = vrot.slane %v2471_v32, 4 }
 0x69b   : > { %3489 = vadd.xlane.f32.xlu1 %v3488_v62  ;;  %3843 = vmax.xlane.f32.xlu0 %v3842_v54  ;;  %v2592_v40 = vpack.c.bf16 %v2471_v32, %v2471_v32  ;;  %v2455_v2 = vsel %vm1732_vm3, %v2447_v63, %v2454_v52  ;;  %v2398_v59 = vrot.slane %v2379_v7, 4  ;;  %v9310_v32 = vsel %vm2679_vm10, %v3816_v39, %v3815_v50 }
 0x69c   : > { %v2463_v33 = vperm.slane %v2455_v2, %v10337_v4  ;;  %v2476_v51 = vrot.slane %v2459_v0, 4  ;;  %v2481_v58 = vsel %vm1732_vm3, 0.0, %v2480_v15  ;;  %v2482_v61 = vrot.slane %v2475_v22, 4 }
 0x69d   : > { %v2588_v44 = vpack.c.bf16 %v2459_v0, %v2459_v0  ;;  %v2593_v1 = vpack.c.bf16 %v2481_v58, %v2481_v58  ;;  %v2594_v28 = vpack.c.bf16 %v2475_v22, %v2475_v22  ;;  %v3214_v20 = vunpack.c.l.b16 %v2592_v40 }
 0x69e   : > { %v2477_v34 = vsel %vm1732_vm3, 0.0, %v2476_v51  ;;  %v2478_v10 = vrot.slane %v2463_v33, 4  ;;  %v2483_v25 = vsel %vm1732_vm3, 0.0, %v2482_v61  ;;  %v2590_v63 = vpack.c.bf16 %v2463_v33, %v2463_v33 }
 0x69f   : > { %v2589_v42 = vpack.c.bf16 %v2477_v34, %v2477_v34  ;;  %v2595_v9 = vpack.c.bf16 %v2483_v25, %v2483_v25  ;;  %v3210_v62 = vunpack.c.l.b16 %v2588_v44  ;;  %v3215_v17 = vunpack.c.l.b16 %v2593_v1 }
 0x6a0   : > { %v2479_v6 = vsel %vm1732_vm3, 0.0, %v2478_v10  ;;  %v3212_v11 = vunpack.c.l.b16 %v2590_v63  ;;  %v3216_v7 = vunpack.c.l.b16 %v2594_v28  ;;  %v2403_v52 = vperm.slane %v2397_v21, %v10337_v4 }
 0x6a1   : > { %v2591_v54 = vpack.c.bf16 %v2479_v6, %v2479_v6  ;;  %v3211_v26 = vunpack.c.l.b16 %v2589_v42  ;;  %v2409_v30 = vsel %vm1732_vm3, %v2408_v5, %v2383_v27  ;;  %v9316_v22 = vunpack.i.l.s16 %v3214_v20 }
 0x6a2   : > { %v2399_v15 = vsel %vm1732_vm3, %v9257_v53, %v2398_v59  ;;  %v2411_v40 = vsel %vm1732_vm3, %v9267_v3, %v2410_v14  ;;  %v3217_v2 = vunpack.c.l.b16 %v2595_v9  ;;  %v9322_v39 = vunpack.i.l.s16 %v3210_v62 }
 0x6a3   : > { %v9324_v50 = vunpack.i.l.s16 %v3212_v11  ;;  %v9326_v33 = vunpack.i.l.s16 %v3215_v17  ;;  %v3213_v21 = vunpack.c.l.b16 %v2591_v54  ;;  %v9328_v27 = vunpack.i.l.s16 %v3216_v7 }
 0x6a4   : > { %v2407_v5 = vperm.slane %v2399_v15, %v10337_v4  ;;  %v2415_v51 = vperm.slane %v2409_v30, %v10337_v4  ;;  %v9332_v58 = vunpack.i.l.s16 %v3211_v26  ;;  %v2419_v53 = vperm.slane %v2411_v40, %v10337_v4 }
 0x6a5   : > { %v2420_v59 = vrot.slane %v2403_v52, 4  ;;  %v2580_v3 = vpack.c.bf16 %v2403_v52, %v2403_v52 }
 0x6a6   : > { %v2422_v14 = vrot.slane %v2407_v5, 4  ;;  %v2424_v61 = vrot.slane %v2415_v51, 4  ;;  %v2582_v44 = vpack.c.bf16 %v2407_v5, %v2407_v5  ;;  %v2584_v1 = vpack.c.bf16 %v2415_v51, %v2415_v51 }
 0x6a7   : > { %v2421_v28 = vsel %vm1732_vm3, 0.0, %v2420_v59  ;;  %v2426_v20 = vrot.slane %v2419_v53, 4  ;;  %v2586_v34 = vpack.c.bf16 %v2419_v53, %v2419_v53  ;;  %v3202_v10 = vunpack.c.l.b16 %v2580_v3 }
 0x6a8   : > { %v2423_v25 = vsel %vm1732_vm3, 0.0, %v2422_v14  ;;  %v2425_v63 = vsel %vm1732_vm3, 0.0, %v2424_v61  ;;  %v2581_v42 = vpack.c.bf16 %v2421_v28, %v2421_v28  ;;  %v3204_v9 = vunpack.c.l.b16 %v2582_v44 }
 0x6a9   : > { %v2427_v62 = vsel %vm1732_vm3, 0.0, %v2426_v20  ;;  %v2583_v4 = vpack.c.bf16 %v2423_v25, %v2423_v25  ;;  %v2585_v17 = vpack.c.bf16 %v2425_v63, %v2425_v63  ;;  %v3206_v6 = vunpack.c.l.b16 %v2584_v1 }
 0x6aa   : > { %v2587_v11 = vpack.c.bf16 %v2427_v62, %v2427_v62  ;;  %v3203_v7 = vunpack.c.l.b16 %v2581_v42  ;;  %v3208_v54 = vunpack.c.l.b16 %v2586_v34  ;;  %v9339_v26 = vunpack.i.l.s16 %v3202_v10 }
 0x6ab   : > { %v3205_v52 = vunpack.c.l.b16 %v2583_v4  ;;  %v3207_v30 = vunpack.c.l.b16 %v2585_v17  ;;  %v9341_v15 = vunpack.i.l.s16 %v3204_v9  ;;  %v9343_v40 = vunpack.i.l.s16 %v3206_v6 }
 0x6ac   : > { %v9345_v5 = vunpack.i.l.s16 %v3213_v21  ;;  %v3209_v51 = vunpack.c.l.b16 %v2587_v11  ;;  %v9347_v53 = vunpack.i.l.s16 %v3203_v7  ;;  %v9349_v59 = vunpack.i.l.s16 %v3208_v54 }
 0x6ad   : > { %v9351_v3 = vunpack.i.l.s16 %v3217_v2  ;;  %v3574_v14 = vrot.slane %v9322_v39, 1  ;;  %v9354_v61 = vunpack.i.l.s16 %v3205_v52  ;;  %v9356_v44 = vunpack.i.l.s16 %v3207_v30 }
 0x6ae   : > { %v9358_v1 = vunpack.i.l.s16 %v3209_v51  ;;  %v3560_v28 = vrot.slane %v9339_v26, 1  ;;  %v3250_v21 = vrot.slane %v9347_v53, 7  ;;  %v3252_v20 = vrot.slane %v9341_v15, 6 }
 0x6af   : > { %v3254_v34 = vrot.slane %v9354_v61, 5  ;;  %v3256_v10 = vrot.slane %v9343_v40, 4  ;;  %v3258_v2 = vrot.slane %v9356_v44, 3  ;;  %v3264_v25 = vrot.slane %v9332_v58, 7 }
 0x6b0   : > { %v3251_v63 = vsel %vm2661_vm4, %v3250_v21, %v9339_v26  ;;  %v3260_v42 = vrot.slane %v9349_v59, 2  ;;  %v3266_v9 = vrot.slane %v9324_v50, 6  ;;  %v3268_v62 = vrot.slane %v9345_v5, 5 }
 0x6b1   : > { %v3253_v4 = vsel %vm2664_vm6, %v3252_v20, %v3251_v63  ;;  %v3262_v17 = vrot.slane %v9358_v1, 1  ;;  %v3265_v6 = vsel %vm2661_vm4, %v3264_v25, %v9322_v39  ;;  %v3270_v11 = vrot.slane %v9316_v22, 4 }
 0x6b2   : > { %v3255_v7 = vsel %vm2667_vm5, %v3254_v34, %v3253_v4  ;;  %v3267_v54 = vsel %vm2664_vm6, %v3266_v9, %v3265_v6  ;;  %v3272_v52 = vrot.slane %v9326_v33, 3  ;;  %v3274_v30 = vrot.slane %v9328_v27, 2 }
 0x6b3   : > { %v3257_v51 = vsel %vm2670_vm7, %v3256_v10, %v3255_v7  ;;  %v3269_v21 = vsel %vm2667_vm5, %v3268_v62, %v3267_v54  ;;  %v3561_v20 = vsel %vm2661_vm4, %v9347_v53, %v3560_v28  ;;  %v3562_v63 = vrot.slane %v9341_v15, 7 }
 0x6b4   : > { %v3259_v25 = vsel %vm2673_vm8, %v3258_v2, %v3257_v51  ;;  %v3271_v0 = vsel %vm2670_vm7, %v3270_v11, %v3269_v21  ;;  %v3276_v34 = vrot.slane %v9351_v3, 1  ;;  %v3564_v9 = vrot.slane %v9354_v61, 6 }
 0x6b5   : > { %v3261_v4 = vsel %vm2676_vm9, %v3260_v42, %v3259_v25  ;;  %v3273_v6 = vsel %vm2673_vm8, %v3272_v52, %v3271_v0  ;;  %v3563_v10 = vsel %vm2664_vm6, %v3562_v63, %v3561_v20  ;;  %v3566_v62 = vrot.slane %v9343_v40, 5 }
 0x6b6   : > { %v3263_v28 = vsel %vm2679_vm10, %v3262_v17, %v3261_v4  ;;  %v3275_v7 = vsel %vm2676_vm9, %v3274_v30, %v3273_v6  ;;  %v3565_v2 = vsel %vm2667_vm5, %v3564_v9, %v3563_v10  ;;  %v3568_v11 = vrot.slane %v9356_v44, 4 }
 0x6b7   : > { %v3277_v54 = vsel %vm2679_vm10, %v3276_v34, %v3275_v7  ;;  %v3567_v51 = vsel %vm2670_vm7, %v3566_v62, %v3565_v2  ;;  %v3570_v42 = vrot.slane %v9349_v59, 3  ;;  %v3575_v0 = vsel %vm2661_vm4, %v9332_v58, %v3574_v14 }
 0x6b8   : > { %v3278_v52 = vpack.c.b16 %v3277_v54, %v3263_v28  ;;  %v3569_v21 = vsel %vm2673_vm8, %v3568_v11, %v3567_v51  ;;  %v3576_v17 = vrot.slane %v9324_v50, 7  ;;  %v3578_v30 = vrot.slane %v9345_v5, 6 }
 0x6b9   : > { %v10338_v63 = vpack.c.bf16 %v9296_v35, %v9296_v35  ;;  %v3571_v34 = vsel %vm2676_vm9, %v3570_v42, %v3569_v21  ;;  %v3580_v9 = vrot.slane %v9316_v22, 5  ;;  %v3958_v4 = vrot.slane %v9322_v39, 2 }
 0x6ba   : > { %3290 = vmatpush.bf16.msrb.mxu3 %v3278_v52  ;;  %v3577_v14 = vsel %vm2664_vm6, %v3576_v17, %v3575_v0  ;;  %v3572_v6 = vrot.slane %v9358_v1, 2  ;;  %v3582_v62 = vrot.slane %v9326_v33, 4  ;;  %v4309_v28 = vrot.slane %v9322_v39, 3 }
 0x6bb   : > { %v9411_v25 = vunpack.c.l.b16 %v10338_v63  ;;  %v3579_v10 = vsel %vm2667_vm5, %v3578_v30, %v3577_v14  ;;  %v3944_v35 = vrot.slane %v9339_v26, 2  ;;  %v3584_v2 = vrot.slane %v9328_v27, 3 }
 0x6bc   : > { %v3581_v7 = vsel %vm2670_vm7, %v3580_v9, %v3579_v10  ;;  %v3573_v54 = vsel %vm2679_vm10, %v3572_v6, %v3571_v34  ;;  %v3586_v42 = vrot.slane %v9351_v3, 2  ;;  %v4295_v0 = vrot.slane %v9339_v26, 3 }
 0x6bd   : > { %v3583_v51 = vsel %vm2673_vm8, %v3582_v62, %v3581_v7  ;;  %v4301_v39 = vrot.slane %v9343_v40, 7  ;;  %v4315_v21 = vrot.slane %v9316_v22, 7  ;;  %v4305_v30 = vrot.slane %v9349_v59, 5 }
 0x6be   : > { %v3585_v52 = vsel %vm2676_vm9, %v3584_v2, %v3583_v51  ;;  %v4319_v63 = vrot.slane %v9328_v27, 5  ;;  %v3950_v34 = vrot.slane %v9343_v40, 6  ;;  %v4303_v9 = vrot.slane %v9356_v44, 6 }
 0x6bf   : > { %v3587_v17 = vsel %vm2679_vm10, %v3586_v42, %v3585_v52  ;;  %v4317_v6 = vrot.slane %v9326_v33, 6  ;;  %v3954_v26 = vrot.slane %v9349_v59, 4  ;;  %v4296_v10 = vrot.slane %v9347_v53, 2 }
 0x6c0   : > { %v3588_v14 = vpack.c.b16 %v3587_v17, %v3573_v54  ;;  %v4298_v62 = vrot.slane %v9341_v15, 1  ;;  %v4310_v7 = vrot.slane %v9332_v58, 2  ;;  %v3952_v2 = vrot.slane %v9356_v44, 5 }
 0x6c1   : > { %v3052_v11 = vpop.xlane.xlu0 %3051  ;;  %v4312_v40 = vrot.slane %v9324_v50, 1  ;;  %v4321_v54 = vrot.slane %v9351_v3, 4  ;;  %v3945_v51 = vrot.slane %v9347_v53, 1  ;;  %v4297_v59 = vsel %vm2661_vm4, %v4296_v10, %v4295_v0 }
 0x6c2   : > { %6983 = vrcp.f32 %v3052_v11  ;;  %3600 = vmatpush.bf16.msra.mxu3 %v3588_v14  ;;  %v4307_v11 = vrot.slane %v9358_v1, 4  ;;  %v4311_v52 = vsel %vm2661_vm4, %v4310_v7, %v4309_v28  ;;  %v3948_v17 = vrot.slane %v9354_v61, 7 }
 0x6c3   : > { %v3959_v20 = vrot.slane %v9332_v58, 1  ;;  %v4299_v14 = vsel %vm2664_vm6, %v4298_v62, %v4297_v59  ;;  %v4313_v43 = vsel %vm2664_vm6, %v4312_v40, %v4311_v52  ;;  %v3946_v29 = vsel %vm2661_vm4, %v3945_v51, %v3944_v35 }
 0x6c4   : > { %v4300_v53 = vsel %vm2667_vm5, %v9354_v61, %v4299_v14  ;;  %v4314_v0 = vsel %vm2667_vm5, %v9345_v5, %v4313_v43  ;;  %v3947_v28 = vsel %vm2664_vm6, %v9341_v15, %v3946_v29  ;;  %v3956_v10 = vrot.slane %v9358_v1, 3 }
 0x6c5   : > { %v4316_v62 = vsel %vm2670_vm7, %v4315_v21, %v4314_v0  ;;  %v3949_v7 = vsel %vm2667_vm5, %v3948_v17, %v3947_v28  ;;  %v3960_v43 = vsel %vm2661_vm4, %v3959_v20, %v3958_v4 }
 0x6c6   : > { %v4318_v40 = vsel %vm2673_vm8, %v4317_v6, %v4316_v62  ;;  %v3951_v61 = vsel %vm2670_vm7, %v3950_v34, %v3949_v7  ;;  %v3961_v34 = vsel %vm2664_vm6, %v9324_v50, %v3960_v43  ;;  %v3964_v6 = vrot.slane %v9316_v22, 6 }
 0x6c7   : > { %v4320_v15 = vsel %vm2676_vm9, %v4319_v63, %v4318_v40  ;;  %v3953_v1 = vsel %vm2673_vm8, %v3952_v2, %v3951_v61  ;;  %v3962_v63 = vrot.slane %v9345_v5, 7  ;;  %v10339_v2 = vpack.c.b16 %v9310_v32, %v9270_v60  ;;  %v3487_v32 = vpop.xlane.xlu2 %3486 }
 0x6c8   : > { %v6984_v42 = vpop.eup %6983  ;;  %v9475_v21 = vsel %vm2679_vm10, %v4321_v54, %v4320_v15  ;;  %v3968_v54 = vrot.slane %v9328_v27, 4  ;;  %v3970_v22 = vrot.slane %v9351_v3, 3  ;;  %6985 = vrcp.f32 %v3487_v32 }
 0x6c9   : > { %v3060_v44 = vmul.f32 %v6984_v42, %v9212_v36  ;;  %v4302_v36 = vsel %vm2670_vm7, %v4301_v39, %v4300_v53  ;;  %v3963_v50 = vsel %vm2667_vm5, %v3962_v63, %v3961_v34  ;;  %v4244_v62 = vrot.slane %v8449_v8, 2  ;;  %v10340_v34 = vld [vmem:[#allocation67_spill] sm:$0xff] }
 0x6ca   : > { %v4304_v35 = vsel %vm2673_vm8, %v4303_v9, %v4302_v36  ;;  %v3955_v9 = vsel %vm2676_vm9, %v3954_v26, %v3953_v1  ;;  %v3823_v26 = vsel %vm2789_vm11, %v10339_v2, 0  ;;  %v4258_v7 = vrot.slane %v8479_v19, 2 }
 0x6cb   : > { %v3064_v58 = vpack.c.bf16 %v3060_v44, %v3060_v44  ;;  %v4306_v29 = vsel %vm2676_vm9, %v4305_v30, %v4304_v35  ;;  %v3957_v30 = vsel %vm2679_vm10, %v3956_v10, %v3955_v9  ;;  %v4260_v61 = vrot.slane %v8467_v57, 1 }
 0x6cc   : > { %v9472_v39 = vsel %vm2679_vm10, %v4307_v11, %v4306_v29  ;;  %v3965_v11 = vsel %vm2670_vm7, %v3964_v6, %v3963_v50  ;;  %v10342_v6 = vld [vmem:[#allocation56_spill] sm:$0xff] }
 0x6cd   : > { %v3184_v51 = vunpack.c.l.b16 %v3064_v58  ;;  %v4323_v4 = vpack.c.b16 %v9475_v21, %v9472_v39  ;;  %v4243_v58 = vrot.slane %v8440_v24, 3  ;;  %v4249_v39 = vrot.slane %v8462_v38, 7 }
 0x6ce   : > { %v6986_v14 = vpop.eup %6985  ;;  %v4263_v21 = vrot.slane %v10313_v23, 7  ;;  %v4265_v2 = vrot.slane %v10342_v6, 6 }
 0x6cf   : > { %v3185_v20 = vpack.c.b16 %v3184_v51, %v9411_v25  ;;  %v3966_v25 = vrot.slane %v9326_v33, 5  ;;  %v3497_v3 = vmul.f32 %v6986_v14, %v9208_v37  ;;  %v4246_v37 = vrot.slane %v8453_v13, 1 }
 0x6d0   : > { %v4245_v24 = vsel %vm2661_vm4, %v4244_v62, %v4243_v58  ;;  %v4037_v62 = vrot.slane %v10324_v18, 1 }
 0x6d1   : > { %6142 = vmatmul.msk.bf16.vlgmr.msrb.gmra.mxu3 %vm3016_vm12, %v3185_v20  ;;  %v3967_v5 = vsel %vm2673_vm8, %v3966_v25, %v3965_v11  ;;  %v3501_v35 = vpack.c.bf16 %v3497_v3, %v3497_v3  ;;  %v4247_v19 = vsel %vm2664_vm6, %v4246_v37, %v4245_v24  ;;  %v10344_v25 = vld [vmem:[#allocation55_spill] sm:$0xff]  ;;  %v4054_v24 = vrot.slane %v10328_v45, 7 }
 0x6d2   : > { %3832 = vmatpush.bf16.xpose.msrb.mxu3 %v3823_v26  ;;  %v3969_v42 = vsel %vm2676_vm9, %v3968_v54, %v3967_v5  ;;  %v4248_v9 = vsel %vm2667_vm5, %v8459_v12, %v4247_v19  ;;  %v10343_v26 = vld [vmem:[#allocation52_spill] sm:$0xff]  ;;  %v4267_v11 = vrot.slane %v10344_v25, 5  ;;  %v4255_v5 = vrot.slane %v10317_v55, 4  ;;  %v10349_v55 = vld [vmem:[#allocation43_spill] sm:$0xff] }
 0x6d3   : > { %v3971_v59 = vsel %vm2679_vm10, %v3970_v22, %v3969_v42  ;;  %v3557_v29 = vunpack.c.l.b16 %v3501_v35  ;;  %v4250_v38 = vsel %vm2670_vm7, %v4249_v39, %v4248_v9  ;;  %v4253_v50 = vrot.slane %v10343_v26, 5 }
 0x6d4   : > { %v3972_v60 = vpack.c.b16 %v3971_v59, %v3957_v30  ;;  %v10341_v30 = vld [vmem:[#allocation54_spill] sm:$0xff] }
 0x6d5   : > { %v4251_v63 = vrot.slane %v10341_v30, 6 }
 0x6d7   : > { %v4252_v12 = vsel %vm2673_vm8, %v4251_v63, %v4250_v38 }
 0x6d8   : > { %v4254_v22 = vsel %vm2676_vm9, %v4253_v50, %v4252_v12 }
 0x6d9   : > { %v4256_v59 = vsel %vm2679_vm10, %v4255_v5, %v4254_v22 }
 0x706   : > { %v3841_v52 = vpop.xlane.xlu1 %3840 }
 0x707   : > { %v3851_v17 = vsub.f32 %v9246_v48, %v3841_v52  ;;  %v4257_v48 = vrot.slane %v10315_v16, 3  ;;  %v10345_v52 = vld [vmem:[#allocation33_spill] sm:$0xff] }
 0x709   : > { %v3855_v33 = vmul.f32 1.442695, %v3851_v17  ;;  %v4259_v51 = vsel %vm2661_vm4, %v4258_v7, %v4257_v48  ;;  %v10346_v17 = vld [vmem:[#allocation61_spill] sm:$0xff] }
 0x70b   : > { %6987 = vpow2.f32 %v3855_v33  ;;  %v10347_v33 = vpack.c.b16 %v10345_v52, %v10346_v17 }
 0x70e   : > { %v3490_v44 = vpop.xlane.xlu1 %3489  ;;  %v3844_v27 = vpop.xlane.xlu0 %3843 }
 0x70f   : > { %6989 = vrcp.f32 %v3490_v44  ;;  %v3852_v53 = vsub.f32 %v9283_v47, %v3844_v27  ;;  %v10348_v44 = vld [vmem:[#allocation38_spill] sm:$0xff]  ;;  %v4035_v27 = vrot.slane %v10349_v55, 2 }
 0x710   : > { %v4049_v14 = vrot.slane %v10348_v44, 2 }
 0x711   : > { %v9501_v0 = vpop.eup %6987  ;;  %v3857_v28 = vmul.f32 1.442695, %v3852_v53  ;;  %v10350_v53 = vld [vmem:[#allocation34_spill] sm:$0xff] }
 0x712   : > { %v3863_v10 = vsel %vm3016_vm12, %v9501_v0, 0.0  ;;  %v4048_v3 = vrot.slane %v10350_v53, 3 }
 0x713   : > { %3864 = vadd.xlane.f32.xlu0 %v3863_v10  ;;  %v3176_v36 = vpop.f32.mrf.mxu3  ;;  %6991 = vpow2.f32 %v3857_v28  ;;  %v10351_v28 = vld [vmem:[#allocation42_spill] sm:$0xff] }
 0x714   : > { %v4034_v10 = vrot.slane %v10351_v28, 3  ;;  %v4050_v48 = vsel %vm2661_vm4, %v4049_v14, %v4048_v3 }
 0x715   : > { %v6990_v47 = vpop.eup %6989 }
 0x716   : > { %v3498_v40 = vmul.f32 %v6990_v47, %v9264_v41  ;;  %v4261_v41 = vsel %vm2664_vm6, %v4260_v61, %v4259_v51  ;;  %v4036_v58 = vsel %vm2661_vm4, %v4035_v27, %v4034_v10  ;;  %v10352_v61 = vld [vmem:[#allocation41_spill] sm:$0xff]  ;;  %v4040_v51 = vrot.slane %v10329_v46, 7 }
 0x717   : > { %v4262_v20 = vsel %vm2667_vm5, %v10340_v34, %v4261_v41  ;;  %v4038_v7 = vsel %vm2664_vm6, %v4037_v62, %v4036_v58  ;;  %v10358_v34 = vld [vmem:[#allocation40_spill] sm:$0xff]  ;;  %v6578_v10 = vld [vmem:[%s7760_s26 + $0x28] sm:$0xff] }
 0x718   : > { %v3502_v43 = vpack.c.bf16 %v3498_v40, %v3498_v40  ;;  %v4264_v23 = vsel %vm2670_vm7, %v4263_v21, %v4262_v20  ;;  %v4039_v37 = vsel %vm2667_vm5, %v10325_v56, %v4038_v7  ;;  %v10357_v21 = vld [vmem:[#allocation49_spill] sm:$0xff]  ;;  %v4060_v20 = vrot.slane %v10358_v34, 4  ;;  %4017 = vmatpush.bf16.msrb.mxu0 %v6578_v10  ;;  %v6577_v58 = vld [vmem:[%s7760_s26 + $0x20] sm:$0xff] }
 0x719   : > { %v9515_v16 = vpop.eup %6991  ;;  %v4266_v54 = vsel %vm2673_vm8, %v4265_v2, %v4264_v23  ;;  %v4041_v18 = vsel %vm2670_vm7, %v4040_v51, %v4039_v37  ;;  %v4046_v9 = vrot.slane %v10357_v21, 4 }
 0x71a   : > { %v3558_v15 = vunpack.c.l.b16 %v3502_v43  ;;  %v3866_v8 = vsel %vm3016_vm12, %v9515_v16, 0.0  ;;  %v4268_v42 = vsel %vm2676_vm9, %v4267_v11, %v4266_v54 }
 0x71b   : > { %v3178_v13 = vpop.f32.mrf.mxu3  ;;  %3867 = vadd.xlane.f32.xlu2 %v3866_v8  ;;  %v10354_v8 = vld [vmem:[#allocation37_spill] sm:$0xff] }
 0x71c   : > { %v3559_v1 = vpack.c.b16 %v3558_v15, %v3557_v29  ;;  %v3297_v57 = vpack.c.bf16 %v3178_v13, %v3176_v36  ;;  %v4051_v36 = vrot.slane %v10326_v49, 1  ;;  %v10353_v29 = vld [vmem:[#allocation47_spill] sm:$0xff]  ;;  %v4056_v19 = vrot.slane %v10354_v8, 6  ;;  %4018 = vmatpush.bf16.msrb.mxu0 %v6577_v58 }
 0x71d   : > { %v4042_v15 = vrot.slane %v10353_v29, 6 }
 0x71e   : > { %6146 = vmatmul.msk.bf16.vlgmr.msra.gmra.mxu3 %vm3016_vm12, %v3559_v1  ;;  %6165 = vmatmul.msk.bf16.vlgmr.msra.gmra.mxu1 %vm2789_vm11, %v3297_v57  ;;  %v4052_v47 = vsel %vm2664_vm6, %v4051_v36, %v4050_v48  ;;  %v10355_v1 = vld [vmem:[#allocation48_spill] sm:$0xff]  ;;  %v10356_v57 = vld [vmem:[#allocation39_spill] sm:$0xff] }
 0x71f   : > { %3984 = vmatpush.bf16.msra.mxu3 %v3972_v60  ;;  %4335 = vmatpush.bf16.msra.mxu1 %v4323_v4  ;;  %v4269_v4 = vrot.slane %v10319_v31, 4  ;;  %v4053_v43 = vsel %vm2667_vm5, %v10352_v61, %v4052_v47  ;;  %v4043_v41 = vsel %vm2673_vm8, %v4042_v15, %v4041_v18  ;;  %v4044_v13 = vrot.slane %v10355_v1, 5 }
 0x720   : > { %v4055_v49 = vsel %vm2670_vm7, %v4054_v24, %v4053_v43  ;;  %v4058_v45 = vrot.slane %v10356_v57, 5 }
 0x721   : > { %v4270_v60 = vsel %vm2679_vm10, %v4269_v4, %v4268_v42  ;;  %v4057_v56 = vsel %vm2673_vm8, %v4056_v19, %v4055_v49  ;;  %v4045_v46 = vsel %vm2676_vm9, %v4044_v13, %v4043_v41 }
 0x722   : > { %v4271_v32 = vpack.c.b16 %v4270_v60, %v4256_v59  ;;  %v4059_v39 = vsel %vm2676_vm9, %v4058_v45, %v4057_v56  ;;  %v4047_v30 = vsel %vm2679_vm10, %v4046_v9, %v4045_v46  ;;  %v10359_v60 = vld [vmem:[#allocation85_spill] sm:$0xff] }
 0x723   : > { %v4061_v63 = vsel %vm2679_vm10, %v4060_v20, %v4059_v39 }
 0x724   : > { %v4062_v6 = vpack.c.b16 %v4061_v63, %v4047_v30 }
 0x72e   : > { %6168 = vmatmul.msk.bf16.vlgmr.msrb.gmra.mxu3 %vm2789_vm11, %v10347_v33 }
 0x72f   : > { %4283 = vmatpush.bf16.msrb.mxu3 %v4271_v32  ;;  %v10360_v32 = vld [vmem:[#allocation32_spill] sm:$0xff] }
 0x730   : > { %v10361_v52 = vpack.c.b16 %v10359_v60, %v10360_v32 }
 0x754   : > { %v3292_v31 = vpop.f32.mrf.mxu3 }
 0x75c   : > { %v3294_v35 = vpop.f32.mrf.mxu3 }
 0x75d   : > { %v3298_v40 = vpack.c.bf16 %v3294_v35, %v3292_v31 }
 0x75f   : > { %6166 = vmatmul.msk.bf16.gmra.mxu1 %vm2789_vm11, %v3298_v40 }
 0x76f   : > { %6181 = vmatmul.msk.bf16.vlgmr.msrb.gmra.mxu1 %vm2789_vm11, %v4062_v6 }
 0x786   : > { %v3865_v2 = vpop.xlane.xlu0 %3864 }
 0x787   : > { %6993 = vrcp.f32 %v3865_v2 }
 0x78d   : > { %v6994_v23 = vpop.eup %6993 }
 0x78e   : > { %v3868_v38 = vpop.xlane.xlu2 %3867  ;;  %v3879_v26 = vmul.f32 %v6994_v23, %v9501_v0 }
 0x78f   : > { %6995 = vrcp.f32 %v3868_v38 }
 0x790   : > { %v3883_v25 = vpack.c.bf16 %v3879_v26, %v3879_v26 }
 0x792   : > { %v3889_v54 = vunpack.c.l.b16 %v3883_v25 }
 0x795   : > { %v6996_v50 = vpop.eup %6995 }
 0x796   : > { %v3880_v11 = vmul.f32 %v6996_v50, %v9515_v16 }
 0x798   : > { %v3884_v12 = vpack.c.bf16 %v3880_v11, %v3880_v11 }
 0x79a   : > { %v3890_v5 = vunpack.c.l.b16 %v3884_v12 }
 0x79b   : > { %v9589_v44 = vpop.f32.mrf.mxu1 }
 0x79c   : > { %v3891_v4 = vpack.c.b16 %v3890_v5, %v3889_v54 }
 0x79e   : > { %6169 = vmatmul.msk.bf16.vlgmr.msrb.gmra.mxu2 %vm3016_vm12, %v3891_v4 }
 0x7a1   : > { %v3602_v22 = vpop.f32.mrf.mxu3 }
 0x7a3   : > { %v9591_v14 = vpop.f32.mrf.mxu1 }
 0x7a9   : > { %v3604_v42 = vpop.f32.mrf.mxu3 }
 0x7aa   : > { %v3608_v59 = vpack.c.bf16 %v3604_v42, %v3602_v22 }
 0x7ac   : > { %6156 = vmatmul.msk.bf16.gmra.mxu0 %vm2789_vm11, %v3608_v59 }
 0x7ae   : > { %6182 = vmatmul.msk.bf16.vlgmr.msra.gmra.mxu2 %vm2789_vm11, %v10361_v52 }
 0x7b1   : > { %v3834_v0 = vpop.f32.mrf.mxu3 }
 0x7b2   : > { %v3845_v16 = vsel %vm3016_vm12, %v3834_v0, -inf }
 0x7b3   : > { %3846 = vmax.xlane.f32.xlu1 %v3845_v16 }
 0x7b9   : > { %v3836_v17 = vpop.f32.mrf.mxu3 }
 0x7ba   : > { %v3848_v33 = vsel %vm3016_vm12, %v3836_v17, -inf }
 0x7bb   : > { %3849 = vmax.xlane.f32.xlu0 %v3848_v33 }
 0x7dc   : > { %v9593_v55 = vpop.f32.mrf.mxu1 }
 0x7e4   : > { %v9595_v27 = vpop.f32.mrf.mxu1 }
 0x7ec   : > { %v4107_v31 = vpop.f32.mrf.mxu1 }
 0x7ed   : > { %v4190_v53 = vsel %vm3016_vm12, %v4107_v31, -inf }
 0x7ee   : > { %4191 = vmax.xlane.f32.xlu2 %v4190_v53 }
 0x7f4   : > { %v4109_v3 = vpop.f32.mrf.mxu1 }
 0x7f5   : > { %v4193_v28 = vsel %vm3016_vm12, %v4109_v3, -inf }
 0x7f6   : > { %4194 = vmax.xlane.f32.xlu1 %v4193_v28 }
 0x821   : > { %v3934_v48 = vpop.f32.mrf.mxu2 }
 0x826   : > { %v3847_v36 = vpop.xlane.xlu1 %3846 }
 0x827   : > { %v3853_v62 = vsub.f32 %v3834_v0, %v3847_v36 }
 0x829   : > { %v3859_v7 = vmul.f32 1.442695, %v3853_v62  ;;  %v3936_v47 = vpop.f32.mrf.mxu2 }
 0x82a   : > { %v3991_v35 = vpack.c.bf16 %v3936_v47, %v3934_v48 }
 0x82b   : > { %6997 = vpow2.f32 %v3859_v7 }
 0x82c   : > { %6179 = vmatmul.msk.bf16.vlgmr.msrb.gmra.mxu0 %vm2789_vm11, %v3991_v35 }
 0x82e   : > { %v3850_v40 = vpop.xlane.xlu0 %3849 }
 0x82f   : > { %v3854_v37 = vsub.f32 %v3836_v17, %v3850_v40 }
 0x831   : > { %v6998_v61 = vpop.eup %6997  ;;  %v3861_v43 = vmul.f32 1.442695, %v3854_v37  ;;  %v4185_v24 = vpop.f32.mrf.mxu2 }
 0x832   : > { %v3869_v51 = vsel %vm3016_vm12, %v6998_v61, 0.0  ;;  %v4196_v18 = vsel %vm3016_vm12, %v4185_v24, -inf }
 0x833   : > { %6999 = vpow2.f32 %v3861_v43  ;;  %3870 = vadd.xlane.f32.xlu1 %v3869_v51  ;;  %4197 = vmax.xlane.f32.xlu0 %v4196_v18 }
 0x839   : > { %v7000_v49 = vpop.eup %6999  ;;  %v4187_v29 = vpop.f32.mrf.mxu2 }
 0x83a   : > { %v3872_v15 = vsel %vm3016_vm12, %v7000_v49, 0.0  ;;  %v4199_v8 = vsel %vm3016_vm12, %v4187_v29, -inf }
 0x83b   : > { %3873 = vadd.xlane.f32.xlu0 %v3872_v15  ;;  %4200 = vmax.xlane.f32.xlu2 %v4199_v8 }
 0x861   : > { %v4192_v19 = vpop.xlane.xlu2 %4191 }
 0x862   : > { %v4202_v41 = vsub.f32 %v4107_v31, %v4192_v19 }
 0x864   : > { %v4206_v56 = vmul.f32 1.442695, %v4202_v41 }
 0x866   : > { %7001 = vpow2.f32 %v4206_v56 }
 0x869   : > { %v4195_v1 = vpop.xlane.xlu1 %4194 }
 0x86a   : > { %v4203_v13 = vsub.f32 %v4109_v3, %v4195_v1 }
 0x86c   : > { %v7002_v57 = vpop.eup %7001  ;;  %v4208_v45 = vmul.f32 1.442695, %v4203_v13  ;;  %v3636_v13 = vpop.f32.mrf.mxu0 }
 0x86d   : > { %v4214_v46 = vsel %vm3016_vm12, %v7002_v57, 0.0 }
 0x86e   : > { %7003 = vpow2.f32 %v4208_v45  ;;  %4215 = vadd.xlane.f32.xlu2 %v4214_v46 }
 0x874   : > { %v7004_v39 = vpop.eup %7003 }
 0x875   : > { %v4217_v21 = vsel %vm3016_vm12, %v7004_v39, 0.0 }
 0x876   : > { %4218 = vadd.xlane.f32.xlu1 %v4217_v21  ;;  %v3674_v21 = vadd.f32 %v9589_v44, %v3636_v13  ;;  %v6611_v13 = vld [vmem:[%s7762_s27 + $0xec] sm:$0xf0] }
 0x8a6   : > { %v4198_v9 = vpop.xlane.xlu0 %4197  ;;  %v3871_v34 = vpop.xlane.xlu1 %3870 }
 0x8a7   : > { %v4204_v20 = vsub.f32 %v4185_v24, %v4198_v9  ;;  %7005 = vrcp.f32 %v3871_v34  ;;  %v1417_v9 = vld [vmem:[#allocation2] sm:$0xff]  }
 0x8a9   : > { %v4210_v30 = vmul.f32 1.442695, %v4204_v20  ;;  %v9620_v20 = vld [vmem:[%s7791_s15] sm:$0xff] }
 0x8ab   : > { %7007 = vpow2.f32 %v4210_v30  ;;  %v4385_v30 = vperm.slane %v9620_v20, 3 }
 0x8ad   : > { %v7006_v2 = vpop.eup %7005 }
 0x8ae   : > { %v3874_v63 = vpop.xlane.xlu0 %3873  ;;  %v4201_v6 = vpop.xlane.xlu2 %4200  ;;  %v3881_v50 = vmul.f32 %v7006_v2, %v6998_v61  ;;  %v1421_v2 = vunpack.c.l.bf16 %v1417_v9 }
 0x8af   : > { %7009 = vrcp.f32 %v3874_v63  ;;  %v4205_v38 = vsub.f32 %v4187_v29, %v4201_v6  ;;  %v6579_v29 = vld [vmem:[%s7760_s26 + $0x30] sm:$0xff] }
 0x8b0   : > { %v3885_v12 = vpack.c.bf16 %v3881_v50, %v3881_v50 }
 0x8b1   : > { %v7008_v23 = vpop.eup %7007  ;;  %v4212_v26 = vmul.f32 1.442695, %v4205_v38 }
 0x8b2   : > { %v4220_v25 = vsel %vm3016_vm12, %v7008_v23, 0.0  ;;  %v3941_v22 = vunpack.c.l.b16 %v3885_v12 }
 0x8b3   : > { %7011 = vpow2.f32 %v4212_v26  ;;  %4221 = vadd.xlane.f32.xlu0 %v4220_v25 }
 0x8b5   : > { %v7010_v11 = vpop.eup %7009 }
 0x8b6   : > { %v3882_v54 = vmul.f32 %v7010_v11, %v7000_v49  ;;  %v6580_v49 = vld [vmem:[%s7760_s26 + $0x38] sm:$0xff]  ;;  %s10362_s26 = sld [smem:[#allocation24_spill]] }
 0x8b7   : > { %4368 = vmatpush.bf16.msrb.mxu2 %v6580_v49 }
 0x8b8   : > { %v3886_v5 = vpack.c.bf16 %v3882_v54, %v3882_v54  ;;  %v1422_v54 = vunpack.c.h.bf16 %v1417_v9 }
 0x8b9   : > { %v7012_v4 = vpop.eup %7011 }
 0x8ba   : > { %v3942_v42 = vunpack.c.l.b16 %v3886_v5  ;;  %v4223_v59 = vsel %vm3016_vm12, %v7012_v4, 0.0 }
 0x8bb   : > { %4224 = vadd.xlane.f32.xlu2 %v4223_v59  ;;  %4369 = vmatpush.bf16.msrb.mxu2 %v6579_v29 }
 0x8bc   : > { %v3943_v60 = vpack.c.b16 %v3942_v42, %v3941_v22  ;;  %v1419_v42 = vld [vmem:[#allocation2 + $0x8] sm:$0xff]   ;;  %p6451_p3 = scmp.ne.s32.totalorder %s10362_s26, 1 }
 0x8bd   : > { %s10364_s22 = sld [smem:[#allocation103_spill]] (!%p6451_p3) }
 0x8be   : > { %6170 = vmatmul.msk.bf16.vlgmr.msra.gmra.mxu3 %vm3016_vm12, %v3943_v60 }
 0x8e1   : > { %v4216_v32 = vpop.xlane.xlu2 %4215 }
 0x8e2   : > { %7013 = vrcp.f32 %v4216_v32 }
 0x8e8   : > { %v7014_v0 = vpop.eup %7013 }
 0x8e9   : > { %v4219_v52 = vpop.xlane.xlu1 %4218  ;;  %v4230_v16 = vmul.f32 %v7014_v0, %v7002_v57  ;;  %v3638_v57 = vpop.f32.mrf.mxu0 }
 0x8ea   : > { %7015 = vrcp.f32 %v4219_v52  ;;  %v3676_v26 = vadd.f32 %v9591_v14, %v3638_v57  ;;  %v1423_v52 = vunpack.c.l.bf16 %v1419_v42  ;;  %v6609_v57 = vld [vmem:[%s7762_s27 + $0xe4] sm:$0xf] }
 0x8eb   : > { %v4234_v33 = vpack.c.bf16 %v4230_v16, %v4230_v16 }
 0x8ed   : > { %v4240_v3 = vunpack.c.l.b16 %v4234_v33 }
 0x8f0   : > { %v7016_v17 = vpop.eup %7015 }
 0x8f1   : > { %v4231_v31 = vmul.f32 %v7016_v17, %v7004_v39  ;;  %v3641_v45 = vpop.f32.mrf.mxu0 }
 0x8f2   : > { %v3679_v22 = vadd.f32 %v9593_v55, %v3641_v45 }
 0x8f3   : > { %v4235_v53 = vpack.c.bf16 %v4231_v31, %v4231_v31 }
 0x8f5   : > { %v4241_v28 = vunpack.c.l.b16 %v4235_v53 }
 0x8f7   : > { %v4242_v10 = vpack.c.b16 %v4241_v28, %v4240_v3  ;;  %v1424_v3 = vunpack.c.h.bf16 %v1419_v42  ;;  %v6277_v42 = vld [vmem:[%s7762_s27 + $0xa0] sm:$0xf] }
 0x8f9   : > { %6183 = vmatmul.msk.bf16.vlgmr.msrb.gmra.mxu3 %vm3016_vm12, %v4242_v10  ;;  %v3643_v46 = vpop.f32.mrf.mxu0 }
 0x8fa   : > { %v3681_v14 = vadd.f32 %v9595_v27, %v3643_v46  ;;  %v6311_v46 = vld [vmem:[%s7762_s27 + $0xf0] sm:$0xf0] }
 0x8fb   : > { %v6314_v9 = vor.u32 %v6609_v57, %v6311_v46  ;;  %v6255_v57 = vld [vmem:[%s7762_s27 + $0x78] sm:$0xf0]  ;;  %v6229_v46 = vld [vmem:[%s7762_s27 + $0x40] sm:$0xf] }
 0x8fd   : > { %4714 = vmatpush.bf16.msra.mxu3 %v6314_v9 }
 0x901   : > { %v4020_v39 = vpop.f32.mrf.mxu0 }
 0x902   : > { %v4030_v34 = vadd.f32 %v4020_v39, %v3674_v21  ;;  %v6317_v39 = vld [vmem:[%s7762_s27 + $0xe8] sm:$0xf]  ;;  %v6612_v21 = vld [vmem:[%s7762_s27 + $0xf4] sm:$0xf0] }
 0x926   : > { %v4222_v58 = vpop.xlane.xlu0 %4221 }
 0x927   : > { %7017 = vrcp.f32 %v4222_v58  ;;  %v7467_v58 = vmov 128.0  }
 0x92d   : > { %v7018_v36 = vpop.eup %7017 }
 0x92e   : > { %v4225_v48 = vpop.xlane.xlu2 %4224  ;;  %v4232_v62 = vmul.f32 %v7018_v36, %v7008_v23  ;;  %v4022_v23 = vpop.f32.mrf.mxu0 }
 0x92f   : > { %7019 = vrcp.f32 %v4225_v48  ;;  %v4031_v25 = vadd.f32 %v4022_v23, %v3676_v26  ;;  %v6605_v23 = vld [vmem:[%s7762_s27 + $0xc4] sm:$0xf] }
 0x930   : > { %v4236_v47 = vpack.c.bf16 %v4232_v62, %v4232_v62  ;;  %7021 = vrcp.f32 %v7467_v58  ;;  %v6599_v58 = vld [vmem:[%s7762_s27 + $0x8c] sm:$0xf0] }
 0x932   : > { %v4292_v37 = vunpack.c.l.b16 %v4236_v47 }
 0x935   : > { %v7020_v7 = vpop.eup %7019 }
 0x936   : > { %v4233_v35 = vmul.f32 %v7020_v7, %v7012_v4  ;;  %v7022_v55 = vpop.eup %7021 }
 0x937   : > { %v4403_v48 = vmul.f32 128.0, %v7022_v55  ;;  %vm4407_vm13 = vweird.f32 %v7022_v55 }
 0x938   : > { %v4237_v40 = vpack.c.bf16 %v4233_v35, %v4233_v35 }
 0x939   : > { %v4404_v36 = vsub.f32 1.0, %v4403_v48  ;;  %v6263_v48 = vld [vmem:[%s7762_s27 + $0x90] sm:$0xf0] }
 0x93a   : > { %v4293_v61 = vunpack.c.l.b16 %v4237_v40 }
 0x93b   : > { %v4405_v62 = vmul.f32 %v7022_v55, %v4404_v36 }
 0x93c   : > { %v4294_v43 = vpack.c.b16 %v4293_v61, %v4292_v37 }
 0x93d   : > { %v4406_v7 = vadd.f32 %v7022_v55, %v4405_v62  ;;  %v6269_v62 = vld [vmem:[%s7762_s27 + $0x88] sm:$0xf] }
 0x93e   : > { %6184 = vmatmul.msk.bf16.vlgmr.msra.gmra.mxu1 %vm3016_vm12, %v4294_v43 }
 0x93f   : > { %v9626_v47 = vsel %vm4407_vm13, %v7022_v55, %v4406_v7  ;;  %v6597_v55 = vld [vmem:[%s7762_s27 + $0x84] sm:$0xf]  ;;  %v6600_v7 = vld [vmem:[%s7762_s27 + $0x94] sm:$0xf0] }
 0x941   : > { %v3986_v24 = vpop.f32.mrf.mxu3 }
 0x949   : > { %v3988_v51 = vpop.f32.mrf.mxu3 }
 0x94a   : > { %v3992_v18 = vpack.c.bf16 %v3988_v51, %v3986_v24 }
 0x94c   : > { %6180 = vmatmul.msk.bf16.gmra.mxu0 %vm2789_vm11, %v3992_v18 }
 0x97c   : > { %v4285_v15 = vpop.f32.mrf.mxu3 }
 0x984   : > { %v4287_v8 = vpop.f32.mrf.mxu3 }
 0x985   : > { %v4342_v19 = vpack.c.bf16 %v4287_v8, %v4285_v15 }
 0x987   : > { %6193 = vmatmul.msk.bf16.vlgmr.msrb.gmra.mxu2 %vm2789_vm11, %v4342_v19 }
 0x9bb   : > { %v4337_v41 = vpop.f32.mrf.mxu1 }
 0x9c3   : > { %v4339_v56 = vpop.f32.mrf.mxu1 }
 0x9c4   : > { %v4343_v1 = vpack.c.bf16 %v4339_v56, %v4337_v41 }
 0x9c6   : > { %6194 = vmatmul.msk.bf16.gmra.mxu2 %vm2789_vm11, %v4343_v1  ;;  %v6309_v1 = vld [vmem:[%s7762_s27 + $0xe0] sm:$0xf] }
 0x9c7   : > { %v6310_v45 = vor.u32 %v6611_v13, %v6309_v1  ;;  %v6596_v1 = vld [vmem:[%s7762_s27 + $0x74] sm:$0xf0]  ;;  %v6594_v13 = vld [vmem:[%s7762_s27 + $0x6c] sm:$0xf] }
 0x9c9   : > { %v4025_v4 = vpop.f32.mrf.mxu0  ;;  %4695 = vmatpush.bf16.msra.mxu0 %v6310_v45 }
 0x9ca   : > { %v4032_v59 = vadd.f32 %v4025_v4, %v3679_v22  ;;  %v6606_v4 = vld [vmem:[%s7762_s27 + $0xcc] sm:$0xf]  ;;  %v6303_v22 = vld [vmem:[%s7762_s27 + $0xd8] sm:$0xf0] }
 0x9d1   : > { %v4027_v16 = vpop.f32.mrf.mxu0 }
 0x9d2   : > { %v4033_v33 = vadd.f32 %v4027_v16, %v3681_v14 }
 0xa0a   : > { %v4371_v63 = vpop.f32.mrf.mxu2 }
 0xa0b   : > { %v4381_v6 = vadd.f32 %v4371_v63, %v4030_v34  ;;  %v6318_v34 = vor.u32 %v6612_v21, %v6317_v39  ;;  %v6319_v63 = vld [vmem:[%s7762_s27 + $0xf8] sm:$0xf0] }
 0xa0d   : > { %v4386_v38 = vadd.f32 %v4385_v30, %v4381_v6  ;;  %4733 = vmatpush.bf16.msrb.mxu1 %v6318_v34 }
 0xa0f   : > { %v4390_v50 = vadd.f32 %v4386_v38, %v1421_v2  ;;  %v6293_v2 = vld [vmem:[%s7762_s27 + $0xc0] sm:$0xf]  ;;  %v6607_v38 = vld [vmem:[%s7762_s27 + $0xcc] sm:$0xf0] }
 0xa11   : > { %4394 = vadd.xlane.f32.xlu1 %v4390_v50 }
 0xa12   : > { %v4373_v11 = vpop.f32.mrf.mxu2 }
 0xa13   : > { %v4382_v12 = vadd.f32 %v4373_v11, %v4031_v25  ;;  %v6295_v25 = vld [vmem:[%s7762_s27 + $0xd0] sm:$0xf0]  ;;  %v6301_v11 = vld [vmem:[%s7762_s27 + $0xc8] sm:$0xf] }
 0xa15   : > { %v4387_v44 = vadd.f32 %v4385_v30, %v4382_v12  ;;  %v6608_v12 = vld [vmem:[%s7762_s27 + $0xd4] sm:$0xf0] }
 0xa17   : > { %v4391_v5 = vadd.f32 %v4387_v44, %v1422_v54  ;;  %v6298_v44 = vor.u32 %v6605_v23, %v6295_v25  ;;  %v6237_v23 = vld [vmem:[%s7762_s27 + $0x48] sm:$0xf]  ;;  %v6239_v25 = vld [vmem:[%s7762_s27 + $0x58] sm:$0xf0] }
 0xa19   : > { %4396 = vadd.xlane.f32.xlu0 %v4391_v5  ;;  %4715 = vmatpush.bf16.msra.mxu3 %v6298_v44 }
 0xa49   : > { %v4376_v60 = vpop.f32.mrf.mxu2 }
 0xa4a   : > { %v4383_v32 = vadd.f32 %v4376_v60, %v4032_v59  ;;  %v6306_v59 = vor.u32 %v6606_v4, %v6303_v22  ;;  %v6603_v60 = vld [vmem:[%s7762_s27 + $0xac] sm:$0xf0]  ;;  %v6585_v22 = vld [vmem:[%s7762_s27 + $0x24] sm:$0xf] }
 0xa4b   : > { %v6278_v16 = vor.u32 %v6603_v60, %v6277_v42  ;;  %v6587_v4 = vld [vmem:[%s7762_s27 + $0x2c] sm:$0xf0]  ;;  %v6215_v42 = vld [vmem:[%s7762_s27 + $0x30] sm:$0xf0] }
 0xa4c   : > { %v4388_v0 = vadd.f32 %v4385_v30, %v4383_v32  ;;  %v6601_v32 = vld [vmem:[%s7762_s27 + $0xa4] sm:$0xf] }
 0xa4e   : > { %v4392_v17 = vadd.f32 %v4388_v0, %v1423_v52  ;;  %v6279_v52 = vld [vmem:[%s7762_s27 + $0xb0] sm:$0xf0] }
 0xa4f   : > { %v6282_v14 = vor.u32 %v6601_v32, %v6279_v52  ;;  %v6221_v32 = vld [vmem:[%s7762_s27 + $0x28] sm:$0xf]  ;;  %v6588_v52 = vld [vmem:[%s7762_s27 + $0x34] sm:$0xf0] }
 0xa50   : > { %4398 = vadd.xlane.f32.xlu2 %v4392_v17 }
 0xa51   : > { %v4378_v31 = vpop.f32.mrf.mxu2  ;;  %4716 = vmatpush.bf16.msra.mxu3 %v6282_v14  ;;  %v6223_v14 = vld [vmem:[%s7762_s27 + $0x38] sm:$0xf0] }
 0xa52   : > { %v4384_v53 = vadd.f32 %v4378_v31, %v4033_v33  ;;  %v6604_v33 = vld [vmem:[%s7762_s27 + $0xb4] sm:$0xf0] }
 0xa54   : > { %v4389_v28 = vadd.f32 %v4385_v30, %v4384_v53  ;;  %v6610_v30 = vld [vmem:[%s7762_s27 + $0xec] sm:$0xf] }
 0xa55   : > { %v6322_v6 = vor.u32 %v6610_v30, %v6319_v63  ;;  %v6602_v53 = vld [vmem:[%s7762_s27 + $0xac] sm:$0xf]  ;;  %v6591_v30 = vld [vmem:[%s7762_s27 + $0x4c] sm:$0xf0]  ;;  %v6589_v63 = vld [vmem:[%s7762_s27 + $0x44] sm:$0xf] }
 0xa56   : > { %v4393_v10 = vadd.f32 %v4389_v28, %v1424_v3  ;;  %v6287_v3 = vld [vmem:[%s7762_s27 + $0xb8] sm:$0xf0]  ;;  %v6261_v28 = vld [vmem:[%s7762_s27 + $0x80] sm:$0xf] }
 0xa57   : > { %4752 = vmatpush.bf16.msra.mxu2 %v6322_v6  ;;  %v6262_v36 = vor.u32 %v6599_v58, %v6261_v28  ;;  %v6197_v28 = vld [vmem:[%s7762_s27] sm:$0xf]  ;;  %v6581_v58 = vld [vmem:[%s7762_s27 + $0x4] sm:$0xf] }
 0xa58   : > { %4400 = vadd.xlane.f32.xlu1 %v4393_v10 }
 0xa5b   : > { %4753 = vmatpush.bf16.msra.mxu2 %v6306_v59 }
 0xa84   : > { %v4395_v27 = vpop.xlane.xlu1 %4394 }
 0xa85   : > { %v4409_v35 = vmul.f32 %v9626_v47, %v4395_v27  ;;  %v6598_v27 = vld [vmem:[%s7762_s27 + $0x8c] sm:$0xf] }
 0xa87   : > { %v9629_v40 = vsub.f32 %v4390_v50, %v4409_v35  ;;  %v6294_v50 = vor.u32 %v6607_v38, %v6293_v2  ;;  %v6266_v35 = vor.u32 %v6597_v55, %v6263_v48  ;;  %v6258_v2 = vor.u32 %v6594_v13, %v6255_v57  ;;  %v6231_v38 = vld [vmem:[%s7762_s27 + $0x50] sm:$0xf0] }
 0xa88   : > { %v6234_v44 = vor.u32 %v6589_v63, %v6231_v38 }
 0xa89   : > { %v4417_v37 = vmul.f32 %v9629_v40, %v9629_v40  ;;  %4696 = vmatpush.bf16.msra.mxu0 %v6294_v50  ;;  %4717 = vmatpush.bf16.msra.mxu3 %v6266_v35  ;;  %v6590_v50 = vld [vmem:[%s7762_s27 + $0x4c] sm:$0xf] }
 0xa8a   : > { %v6242_v60 = vor.u32 %v6590_v50, %v6239_v25  ;;  %v6582_v35 = vld [vmem:[%s7762_s27 + $0xc] sm:$0xf] }
 0xa8b   : > { %4421 = vadd.xlane.f32.xlu0 %v4417_v37  ;;  %v6270_v37 = vor.u32 %v6600_v7, %v6269_v62  ;;  %v6199_v62 = vld [vmem:[%s7762_s27 + $0x10] sm:$0xf0]  ;;  %v6205_v7 = vld [vmem:[%s7762_s27 + $0x8] sm:$0xf] }
 0xa8c   : > { %v4397_v61 = vpop.xlane.xlu0 %4396 }
 0xa8d   : > { %v4410_v43 = vmul.f32 %v9626_v47, %v4397_v61  ;;  %4697 = vmatpush.bf16.msra.mxu0 %v6278_v16  ;;  %v6271_v61 = vld [vmem:[%s7762_s27 + $0x98] sm:$0xf0]  ;;  %v6586_v16 = vld [vmem:[%s7762_s27 + $0x2c] sm:$0xf] }
 0xa8f   : > { %v9634_v24 = vsub.f32 %v4391_v5, %v4410_v43  ;;  %v6302_v5 = vor.u32 %v6608_v12, %v6301_v11  ;;  %v6245_v43 = vld [vmem:[%s7762_s27 + $0x60] sm:$0xf]  ;;  %v6230_v12 = vor.u32 %v6591_v30, %v6229_v46  ;;  %v4486_v46 = vperm.slane %v9620_v20, 5 }
 0xa91   : > { %v4418_v51 = vmul.f32 %v9634_v24, %v9634_v24  ;;  %4734 = vmatpush.bf16.msrb.mxu1 %v6302_v5  ;;  %4698 = vmatpush.bf16.msra.mxu0 %v6262_v36  ;;  %v6226_v36 = vor.u32 %v6586_v16, %v6223_v14 }
 0xa93   : > { %4423 = vadd.xlane.f32.xlu2 %v4418_v51  ;;  %v6595_v51 = vld [vmem:[%s7762_s27 + $0x6c] sm:$0xf0] }
 0xa94   : > { %v6246_v45 = vor.u32 %v6595_v51, %v6245_v43  ;;  %v6202_v51 = vor.u32 %v6581_v58, %v6199_v62  ;;  %v6627_v58 = vld [vmem:[%s7764_s30 + $0x70] sm:$0xff]  ;;  %v6633_v62 = vld [vmem:[%s7764_s30 + $0xa0] sm:$0xff] }
 0xa96   : > { %4699 = vmatpush.bf16.msra.mxu0 %v6246_v45 }
 0xa9a   : > { %4700 = vmatpush.bf16.msra.mxu0 %v6230_v12 }
 0xac3   : > { %v4399_v18 = vpop.xlane.xlu2 %4398 }
 0xac4   : > { %v4411_v49 = vmul.f32 %v9626_v47, %v4399_v18 }
 0xac6   : > { %v9639_v29 = vsub.f32 %v4392_v17, %v4411_v49  ;;  %v6285_v17 = vld [vmem:[%s7762_s27 + $0xa8] sm:$0xf]  ;;  %v6274_v49 = vor.u32 %v6598_v27, %v6271_v61  ;;  %v6584_v27 = vld [vmem:[%s7762_s27 + $0x14] sm:$0xf0] }
 0xac7   : > { %v6286_v31 = vor.u32 %v6604_v33, %v6285_v17 }
 0xac8   : > { %v4419_v15 = vmul.f32 %v9639_v29, %v9639_v29 }
 0xac9   : > { %4735 = vmatpush.bf16.msrb.mxu1 %v6286_v31 }
 0xaca   : > { %4425 = vadd.xlane.f32.xlu1 %v4419_v15  ;;  %v6593_v15 = vld [vmem:[%s7762_s27 + $0x64] sm:$0xf] }
 0xacb   : > { %v4401_v8 = vpop.xlane.xlu1 %4400 }
 0xacc   : > { %v4412_v19 = vmul.f32 %v9626_v47, %v4401_v8  ;;  %v6247_v8 = vld [vmem:[%s7762_s27 + $0x70] sm:$0xf0] }
 0xacd   : > { %4736 = vmatpush.bf16.msrb.mxu1 %v6270_v37  ;;  %v6250_v9 = vor.u32 %v6593_v15, %v6247_v8  ;;  %v6207_v37 = vld [vmem:[%s7762_s27 + $0x18] sm:$0xf0] }
 0xace   : > { %v9644_v41 = vsub.f32 %v4393_v10, %v4412_v19  ;;  %v6290_v10 = vor.u32 %v6602_v53, %v6287_v3  ;;  %v6253_v19 = vld [vmem:[%s7762_s27 + $0x68] sm:$0xf]  ;;  %v6218_v53 = vor.u32 %v6585_v22, %v6215_v42  ;;  %v6222_v3 = vor.u32 %v6588_v52, %v6221_v32 }
 0xacf   : > { %v6254_v34 = vor.u32 %v6596_v1, %v6253_v19  ;;  %4718 = vmatpush.bf16.msra.mxu3 %v6250_v9  ;;  %v6210_v8 = vor.u32 %v6582_v35, %v6207_v37  ;;  %v6616_v35 = vld [vmem:[%s7764_s30 + $0x18] sm:$0xff] }
 0xad0   : > { %v4420_v56 = vmul.f32 %v9644_v41, %v9644_v41  ;;  %4754 = vmatpush.bf16.msra.mxu2 %v6290_v10  ;;  %v6583_v10 = vld [vmem:[%s7762_s27 + $0xc] sm:$0xf0]  ;;  %v6632_v37 = vld [vmem:[%s7764_s30 + $0x98] sm:$0xff] }
 0xad1   : > { %4737 = vmatpush.bf16.msrb.mxu1 %v6254_v34  ;;  %v6198_v43 = vor.u32 %v6583_v10, %v6197_v28  ;;  %v6618_v28 = vld [vmem:[%s7764_s30 + $0x28] sm:$0xff] }
 0xad2   : > { %4427 = vadd.xlane.f32.xlu0 %v4420_v56  ;;  %v6634_v10 = vld [vmem:[%s7764_s30 + $0xa8] sm:$0xff] }
 0xad3   : > { %4719 = vmatpush.bf16.msra.mxu3 %v6234_v44 }
 0xad4   : > { %4755 = vmatpush.bf16.msra.mxu2 %v6274_v49 }
 0xad7   : > { %4720 = vmatpush.bf16.msra.mxu3 %v6218_v53  ;;  %v6628_v53 = vld [vmem:[%s7764_s30 + $0x78] sm:$0xff] }
 0xad8   : > { %4756 = vmatpush.bf16.msra.mxu2 %v6258_v2 }
 0xadb   : > { %4721 = vmatpush.bf16.msra.mxu3 %v6202_v51  ;;  %v6625_v51 = vld [vmem:[%s7764_s30 + $0x60] sm:$0xff] }
 0xadc   : > { %4757 = vmatpush.bf16.msra.mxu2 %v6242_v60 }
 0xadf   : > { %5199 = vmatpush.bf16.msrb.mxu3 %v6628_v53 }
 0xae0   : > { %4758 = vmatpush.bf16.msra.mxu2 %v6226_v36  ;;  %v6617_v36 = vld [vmem:[%s7764_s30 + $0x20] sm:$0xff] }
 0xae3   : > { %5200 = vmatpush.bf16.msrb.mxu3 %v6627_v58 }
 0xae4   : > { %4759 = vmatpush.bf16.msra.mxu2 %v6210_v8  ;;  %v6631_v8 = vld [vmem:[%s7764_s30 + $0x90] sm:$0xff] }
 0xafe   : > { %v4422_v26 = vpop.xlane.xlu0 %4421 }
 0xaff   : > { %v4429_v54 = vmul.f32 %v4422_v26, %v9626_v47  ;;  %v6592_v26 = vld [vmem:[%s7762_s27 + $0x54] sm:$0xf0] }
 0xb00   : > { %v6238_v5 = vor.u32 %v6592_v26, %v6237_v23 }
 0xb01   : > { %v9669_v0 = vadd.f32 1e-12, %v4429_v54  ;;  %v6213_v54 = vld [vmem:[%s7762_s27 + $0x20] sm:$0xf] }
 0xb02   : > { %v6214_v33 = vor.u32 %v6587_v4, %v6213_v54  ;;  %4738 = vmatpush.bf16.msrb.mxu1 %v6238_v5 }
 0xb03   : > { %7023 = vrsqrt.f32 %v9669_v0  ;;  %vm4443_vm15 = vweird.f32 %v9669_v0 }
 0xb04   : > { %4701 = vmatpush.bf16.msra.mxu0 %v6214_v33  ;;  %v6619_v33 = vld [vmem:[%s7764_s30 + $0x30] sm:$0xff] }
 0xb06   : > { %v4424_v18 = vpop.xlane.xlu2 %4423  ;;  %4739 = vmatpush.bf16.msrb.mxu1 %v6222_v3  ;;  %v6644_v3 = vld [vmem:[%s7764_s30 + $0xf8] sm:$0xff] }
 0xb07   : > { %v4430_v56 = vmul.f32 %v4424_v18, %v9626_v47  ;;  %v6206_v18 = vor.u32 %v6584_v27, %v6205_v7  ;;  %5237 = vmatpush.bf16.msrb.mxu2 %v6644_v3  ;;  %v6626_v7 = vld [vmem:[%s7764_s30 + $0x68] sm:$0xff] }
 0xb08   : > { %4702 = vmatpush.bf16.msra.mxu0 %v6198_v43  ;;  %v6642_v27 = vld [vmem:[%s7764_s30 + $0xe8] sm:$0xff]  ;;  %5201 = vmatpush.bf16.msrb.mxu3 %v6626_v7 }
 0xb09   : > { %v9694_v39 = vpop.eup %7023  ;;  %v9696_v21 = vadd.f32 1e-12, %v4430_v56 }
 0xb0a   : > { %v4438_v6 = vmul.f32 %v9694_v39, %v9669_v0  ;;  %vm4444_vm14 = vweird.f32 %v9694_v39  ;;  %4740 = vmatpush.bf16.msrb.mxu1 %v6206_v18  ;;  %v4481_v0 = vperm.slane %v9620_v20, 4  ;;  %v6641_v18 = vld [vmem:[%s7764_s30 + $0xe0] sm:$0xff] }
 0xb0b   : > { %7025 = vrsqrt.f32 %v9696_v21  ;;  %vm4445_vm0 = vmor %vm4443_vm15, %vm4444_vm14  ;;  %vm4453_vm2 = vweird.f32 %v9696_v21 }
 0xb0c   : > { %v4439_v11 = vmul.f32 %v9694_v39, %v4438_v6  ;;  %5202 = vmatpush.bf16.msrb.mxu3 %v6625_v51 }
 0xb0e   : > { %v4440_v59 = vmul.f32 0.5, %v4439_v11 }
 0xb10   : > { %v4441_v17 = vsub.f32 1.5, %v4440_v59 }
 0xb11   : > { %v7026_v31 = vpop.eup %7025 }
 0xb12   : > { %v4442_v55 = vmul.f32 %v9694_v39, %v4441_v17  ;;  %v4448_v48 = vmul.f32 %v7026_v31, %v9696_v21  ;;  %vm4454_vm1 = vweird.f32 %v7026_v31  ;;  %v6636_v17 = vld [vmem:[%s7764_s30 + $0xb8] sm:$0xff] }
 0xb13   : > { %vm4455_vm3 = vmor %vm4453_vm2, %vm4454_vm1  ;;  %5218 = vmatpush.bf16.msra.mxu1 %v6636_v17 }
 0xb14   : > { %v4449_v61 = vmul.f32 %v7026_v31, %v4448_v48  ;;  %v4446_v49 = vsel %vm4445_vm0, %v9694_v39, %v4442_v55  ;;  %v6643_v55 = vld [vmem:[%s7764_s30 + $0xf0] sm:$0xff]  ;;  %v4525_v48 = vld [vmem:[%s7766_s4] sm:$0xf]  ;;  %s10363_s4 = sld [smem:[#allocation102_spill]] (!%p6451_p3) }
 0xb15   : > { %v4477_v56 = vmul.f32 %v4446_v49, %v9629_v40  ;;  %5238 = vmatpush.bf16.msrb.mxu2 %v6643_v55  ;;  %v9770_v43 = vperm.slane %v4525_v48, 2  ;;  %v6621_v55 = vld [vmem:[%s7764_s30 + $0x40] sm:$0xff] }
 0xb16   : > { %v4450_v15 = vmul.f32 0.5, %v4449_v61  ;;  %v9768_v61 = vperm.slane %v4525_v48, 0 }
 0xb17   : > { %v4482_v45 = vmul.f32 %v4481_v0, %v4477_v56 }
 0xb18   : > { %v4451_v19 = vsub.f32 1.5, %v4450_v15  ;;  %v6615_v15 = vld [vmem:[%s7764_s30 + $0x10] sm:$0xff] }
 0xb19   : > { %v9735_v9 = vadd.f32 %v4486_v46, %v4482_v45  ;;  %5239 = vmatpush.bf16.msrb.mxu2 %v6642_v27  ;;  %v9785_v45 = vperm.slane %v4525_v48, 1 }
 0xb1a   : > { %v4452_v1 = vmul.f32 %v7026_v31, %v4451_v19 }
 0xb1c   : > { %v4456_v13 = vsel %vm4455_vm3, %v7026_v31, %v4452_v1  ;;  %v6635_v31 = vld [vmem:[%s7764_s30 + $0xb0] sm:$0xff]  ;;  %v6624_v1 = vld [vmem:[%s7764_s30 + $0x58] sm:$0xff] }
 0xb1d   : > { %v4478_v57 = vmul.f32 %v4456_v13, %v9634_v24  ;;  %5219 = vmatpush.bf16.msra.mxu1 %v6635_v31  ;;  %5240 = vmatpush.bf16.msrb.mxu2 %v6641_v18  ;;  %v6640_v13 = vld [vmem:[%s7764_s30 + $0xd8] sm:$0xff] }
 0xb1e   : > { %5203 = vmatpush.bf16.msrb.mxu3 %v6624_v1 }
 0xb1f   : > { %v4483_v39 = vmul.f32 %v4481_v0, %v4478_v57 }
 0xb21   : > { %v9737_v34 = vadd.f32 %v4486_v46, %v4483_v39  ;;  %5220 = vmatpush.bf16.msra.mxu1 %v6634_v10  ;;  %v9788_v39 = vperm.slane %v4525_v48, 3  ;;  %5241 = vmatpush.bf16.msrb.mxu2 %v6640_v13  ;;  %v6637_v48 = vld [vmem:[%s7764_s30 + $0xc0] sm:$0xff] }
 0xb23   : > { %v4491_v40 = vpack.c.bf16 %v9737_v34, %v9735_v9 }
 0xb25   : > { %4703 = vmatmul.bf16.vlgmr.msra.gmra.mxu0 %v4491_v40  ;;  %4722 = vmatmul.bf16.vlgmr.msra.gmra.mxu3 %v4491_v40 }
 0xb26   : > { %4741 = vmatmul.bf16.vlgmr.msrb.gmra.mxu1 %v4491_v40  ;;  %4760 = vmatmul.bf16.vlgmr.msra.gmra.mxu2 %v4491_v40  ;;  %v6614_v40 = vld [vmem:[%s7764_s30 + $0x8] sm:$0xff] }
 0xb27   : > { %5221 = vmatpush.bf16.msra.mxu1 %v6633_v62 }
 0xb2b   : > { %5222 = vmatpush.bf16.msra.mxu1 %v6632_v37 }
 0xb2f   : > { %5223 = vmatpush.bf16.msra.mxu1 %v6631_v8 }
 0xb3d   : > { %v4426_v21 = vpop.xlane.xlu1 %4425 }
 0xb3e   : > { %v4431_v30 = vmul.f32 %v4426_v21, %v9626_v47  ;;  %v6630_v21 = vld [vmem:[%s7764_s30 + $0x88] sm:$0xff] }
 0xb3f   : > { %5224 = vmatpush.bf16.msra.mxu1 %v6630_v21 }
 0xb40   : > { %v4435_v63 = vadd.f32 1e-12, %v4431_v30 }
 0xb42   : > { %7027 = vrsqrt.f32 %v4435_v63  ;;  %vm4463_vm5 = vweird.f32 %v4435_v63 }
 0xb45   : > { %v4428_v24 = vpop.xlane.xlu0 %4427 }
 0xb46   : > { %v4432_v20 = vmul.f32 %v4428_v24, %v9626_v47 }
 0xb48   : > { %v7028_v6 = vpop.eup %7027  ;;  %v4436_v2 = vadd.f32 1e-12, %v4432_v20  ;;  %v6623_v20 = vld [vmem:[%s7764_s30 + $0x50] sm:$0xff] }
 0xb49   : > { %v4458_v38 = vmul.f32 %v7028_v6, %v4435_v63  ;;  %vm4464_vm4 = vweird.f32 %v7028_v6  ;;  %5204 = vmatpush.bf16.msrb.mxu3 %v6623_v20 }
 0xb4a   : > { %7029 = vrsqrt.f32 %v4436_v2  ;;  %vm4465_vm6 = vmor %vm4463_vm5, %vm4464_vm4  ;;  %vm4473_vm8 = vweird.f32 %v4436_v2 }
 0xb4b   : > { %v4459_v23 = vmul.f32 %v7028_v6, %v4458_v38 }
 0xb4d   : > { %v4460_v26 = vmul.f32 0.5, %v4459_v23 }
 0xb4f   : > { %v4461_v50 = vsub.f32 1.5, %v4460_v26 }
 0xb50   : > { %v7030_v25 = vpop.eup %7029 }
 0xb51   : > { %v4462_v11 = vmul.f32 %v7028_v6, %v4461_v50  ;;  %v4468_v12 = vmul.f32 %v7030_v25, %v4436_v2  ;;  %vm4474_vm7 = vweird.f32 %v7030_v25 }
 0xb52   : > { %vm4475_vm9 = vmor %vm4473_vm8, %vm4474_vm7 }
 0xb53   : > { %v4469_v54 = vmul.f32 %v7030_v25, %v4468_v12  ;;  %v4466_v44 = vsel %vm4465_vm6, %v7028_v6, %v4462_v11  ;;  %v6639_v6 = vld [vmem:[%s7764_s30 + $0xd0] sm:$0xff]  ;;  %v6613_v11 = vld [vmem:[%s7764_s30] sm:$0xff] }
 0xb54   : > { %v4479_v22 = vmul.f32 %v4466_v44, %v9639_v29  ;;  %v6629_v12 = vld [vmem:[%s7764_s30 + $0x80] sm:$0xff]  ;;  %5242 = vmatpush.bf16.msrb.mxu2 %v6639_v6 }
 0xb55   : > { %v4470_v5 = vmul.f32 0.5, %v4469_v54  ;;  %5225 = vmatpush.bf16.msra.mxu1 %v6629_v12 }
 0xb56   : > { %v4484_v32 = vmul.f32 %v4481_v0, %v4479_v22 }
 0xb57   : > { %v4471_v4 = vsub.f32 1.5, %v4470_v5 }
 0xb58   : > { %v9745_v16 = vadd.f32 %v4486_v46, %v4484_v32  ;;  %v6638_v32 = vld [vmem:[%s7764_s30 + $0xc8] sm:$0xff] }
 0xb59   : > { %v4472_v42 = vmul.f32 %v7030_v25, %v4471_v4  ;;  %5243 = vmatpush.bf16.msrb.mxu2 %v6638_v32 }
 0xb5b   : > { %v4476_v59 = vsel %vm4475_vm9, %v7030_v25, %v4472_v42 }
 0xb5c   : > { %v4480_v60 = vmul.f32 %v4476_v59, %v9644_v41  ;;  %v6620_v41 = vld [vmem:[%s7764_s30 + $0x38] sm:$0xff] }
 0xb5d   : > { %5180 = vmatpush.bf16.msrb.mxu0 %v6620_v41  ;;  %5244 = vmatpush.bf16.msrb.mxu2 %v6637_v48 }
 0xb5e   : > { %v4485_v52 = vmul.f32 %v4481_v0, %v4480_v60  ;;  %v6622_v60 = vld [vmem:[%s7764_s30 + $0x48] sm:$0xff] }
 0xb5f   : > { %5205 = vmatpush.bf16.msrb.mxu3 %v6622_v60 }
 0xb60   : > { %v9747_v14 = vadd.f32 %v4486_v46, %v4485_v52 }
 0xb61   : > { %5181 = vmatpush.bf16.msrb.mxu0 %v6619_v33 }
 0xb62   : > { %v4492_v29 = vpack.c.bf16 %v9747_v14, %v9745_v16 }
 0xb63   : > { %5206 = vmatpush.bf16.msrb.mxu3 %v6621_v55 }
 0xb64   : > { %4708 = vmatmul.bf16.gmra.mxu0 %v4492_v29  ;;  %4727 = vmatmul.bf16.gmra.mxu3 %v4492_v29 }
 0xb65   : > { %4746 = vmatmul.bf16.gmra.mxu1 %v4492_v29  ;;  %4765 = vmatmul.bf16.gmra.mxu2 %v4492_v29 }
 0xb66   : > { %5182 = vmatpush.bf16.msrb.mxu0 %v6618_v28 }
 0xb6a   : > { %5183 = vmatpush.bf16.msrb.mxu0 %v6617_v36 }
 0xb6e   : > { %5184 = vmatpush.bf16.msrb.mxu0 %v6616_v35 }
 0xb72   : > { %5185 = vmatpush.bf16.msrb.mxu0 %v6615_v15 }
 0xb76   : > { %5186 = vmatpush.bf16.msrb.mxu0 %v6614_v40 }
 0xb7a   : > { %5187 = vmatpush.bf16.msrb.mxu0 %v6613_v11 }
 0xba2   : > { %v4704_v49 = vpop.f32.mrf.mxu0 }
 0xba3   : > { %v9777_v19 = vadd.f32 %v4704_v49, %v9768_v61  ;;  %v4742_v56 = vpop.f32.mrf.mxu1 }
 0xba4   : > { %v9780_v0 = vadd.f32 %v4742_v56, %v9770_v43 }
 0xba5   : > { %v4787_v57 = vmul.f32 0.044715, %v9777_v19 }
 0xba6   : > { %v4789_v46 = vmul.f32 0.044715, %v9780_v0 }
 0xba7   : > { %v4803_v30 = vmul.f32 %v4787_v57, %v9777_v19 }
 0xba8   : > { %v4805_v63 = vmul.f32 %v4789_v46, %v9780_v0  ;;  %v4723_v24 = vpop.f32.mrf.mxu3 }
 0xba9   : > { %v4819_v2 = vmul.f32 %v4803_v30, %v9777_v19  ;;  %v9798_v38 = vadd.f32 %v4723_v24, %v9785_v45  ;;  %v4761_v23 = vpop.f32.mrf.mxu2 }
 0xbaa   : > { %v4821_v26 = vmul.f32 %v4805_v63, %v9780_v0  ;;  %v9802_v50 = vadd.f32 %v4761_v23, %v9788_v39  ;;  %v4706_v25 = vpop.f32.mrf.mxu0 }
 0xbab   : > { %v4835_v54 = vadd.f32 %v4819_v2, %v9777_v19  ;;  %v4788_v44 = vmul.f32 0.044715, %v9798_v38  ;;  %v9809_v5 = vadd.f32 %v4706_v25, %v9768_v61  ;;  %v4744_v4 = vpop.f32.mrf.mxu1 }
 0xbac   : > { %v4837_v22 = vadd.f32 %v4821_v26, %v9780_v0  ;;  %v4790_v42 = vmul.f32 0.044715, %v9802_v50  ;;  %v9814_v59 = vadd.f32 %v4744_v4, %v9770_v43 }
 0xbad   : > { %v4804_v52 = vmul.f32 %v4788_v44, %v9798_v38  ;;  %v4791_v29 = vmul.f32 0.044715, %v9809_v5  ;;  %v4851_v33 = vmul.f32 0.7978846, %v4835_v54  ;;  %v4771_v54 = vmul.f32 0.5, %v9777_v19 }
 0xbae   : > { %v4806_v41 = vmul.f32 %v4790_v42, %v9802_v50  ;;  %v4793_v17 = vmul.f32 0.044715, %v9814_v59  ;;  %v4853_v3 = vmul.f32 0.7978846, %v4837_v22  ;;  %v4775_v44 = vmul.f32 0.5, %v9809_v5 }
 0xbaf   : > { %v4820_v31 = vmul.f32 %v4804_v52, %v9798_v38  ;;  %v4807_v53 = vmul.f32 %v4791_v29, %v9809_v5  ;;  %7031 = vtanh.f32 %v4851_v33  ;;  %v4773_v42 = vmul.f32 0.5, %v9780_v0 }
 0xbb0   : > { %v4822_v28 = vmul.f32 %v4806_v41, %v9802_v50  ;;  %v4809_v10 = vmul.f32 %v4793_v17, %v9814_v59  ;;  %v4725_v58 = vpop.f32.mrf.mxu3  ;;  %7033 = vtanh.f32 %v4853_v3  ;;  %v4777_v60 = vmul.f32 0.5, %v9814_v59 }
 0xbb1   : > { %v4836_v36 = vadd.f32 %v4820_v31, %v9798_v38  ;;  %v4823_v62 = vmul.f32 %v4807_v53, %v9809_v5  ;;  %v4726_v7 = vadd.f32 %v4725_v58, %v9785_v45  ;;  %v4763_v27 = vpop.f32.mrf.mxu2  ;;  %v4774_v0 = vmul.f32 0.5, %v9802_v50 }
 0xbb2   : > { %v4838_v35 = vadd.f32 %v4822_v28, %v9802_v50  ;;  %v4825_v37 = vmul.f32 %v4809_v10, %v9814_v59  ;;  %v4764_v51 = vadd.f32 %v4763_v27, %v9788_v39 }
 0xbb3   : > { %v4839_v18 = vadd.f32 %v4823_v62, %v9809_v5  ;;  %v4792_v49 = vmul.f32 0.044715, %v4726_v7  ;;  %v4852_v56 = vmul.f32 0.7978846, %v4836_v36  ;;  %v4772_v5 = vmul.f32 0.5, %v9798_v38 }
 0xbb4   : > { %v4841_v15 = vadd.f32 %v4825_v37, %v9814_v59  ;;  %v4794_v8 = vmul.f32 0.044715, %v4764_v51  ;;  %v4854_v57 = vmul.f32 0.7978846, %v4838_v35  ;;  %v4776_v58 = vmul.f32 0.5, %v4726_v7 }
 0xbb5   : > { %v4855_v1 = vmul.f32 0.7978846, %v4839_v18  ;;  %v4808_v13 = vmul.f32 %v4792_v49, %v4726_v7  ;;  %v7032_v63 = vpop.eup %7031  ;;  %v4778_v59 = vmul.f32 0.5, %v4764_v51 }
 0xbb6   : > { %v4857_v46 = vmul.f32 0.7978846, %v4841_v15  ;;  %v4810_v40 = vmul.f32 %v4794_v8, %v4764_v51  ;;  %v7034_v20 = vpop.eup %7033  ;;  %v4883_v26 = vadd.f32 1.0, %v7032_v63 }
 0xbb7   : > { %v4824_v21 = vmul.f32 %v4808_v13, %v4726_v7  ;;  %7035 = vtanh.f32 %v4855_v1  ;;  %v4885_v11 = vadd.f32 1.0, %v7034_v20 }
 0xbb8   : > { %v4826_v30 = vmul.f32 %v4810_v40, %v4764_v51  ;;  %7037 = vtanh.f32 %v4857_v46  ;;  %v4899_v29 = vmul.f32 %v4883_v26, %v4771_v54 }
 0xbb9   : > { %v4840_v24 = vadd.f32 %v4824_v21, %v4726_v7  ;;  %7039 = vtanh.f32 %v4852_v56  ;;  %v4901_v17 = vmul.f32 %v4885_v11, %v4773_v42 }
 0xbba   : > { %v4842_v6 = vadd.f32 %v4826_v30, %v4764_v51  ;;  %7041 = vtanh.f32 %v4854_v57 }
 0xbbb   : > { %v4856_v2 = vmul.f32 0.7978846, %v4840_v24 }
 0xbbc   : > { %v4858_v23 = vmul.f32 0.7978846, %v4842_v6 }
 0xbbd   : > { %v7036_v25 = vpop.eup %7035  ;;  %7043 = vtanh.f32 %v4856_v2 }
 0xbbe   : > { %v7038_v12 = vpop.eup %7037  ;;  %v4887_v4 = vadd.f32 1.0, %v7036_v25  ;;  %7045 = vtanh.f32 %v4858_v23 }
 0xbbf   : > { %v7040_v22 = vpop.eup %7039  ;;  %v4889_v32 = vadd.f32 1.0, %v7038_v12 }
 0xbc0   : > { %v7042_v52 = vpop.eup %7041  ;;  %v4903_v41 = vmul.f32 %v4887_v4, %v4775_v44  ;;  %v4884_v53 = vadd.f32 1.0, %v7040_v22 }
 0xbc1   : > { %v4905_v33 = vmul.f32 %v4889_v32, %v4777_v60  ;;  %v4886_v19 = vadd.f32 1.0, %v7042_v52 }
 0xbc2   : > { %v4915_v31 = vpack.c.bf16 %v4903_v41, %v4899_v29  ;;  %v4900_v36 = vmul.f32 %v4884_v53, %v4772_v5 }
 0xbc3   : > { %v7044_v3 = vpop.eup %7043  ;;  %v4917_v28 = vpack.c.bf16 %v4905_v33, %v4901_v17  ;;  %v4902_v27 = vmul.f32 %v4886_v19, %v4774_v0 }
 0xbc4   : > { %v7046_v10 = vpop.eup %7045  ;;  %5188 = vmatmul.bf16.vlgmr.msrb.gmra.mxu0 %v4915_v31  ;;  %v4888_v55 = vadd.f32 1.0, %v7044_v3 }
 0xbc5   : > { %5226 = vmatmul.bf16.vlgmr.msra.gmra.mxu1 %v4917_v28  ;;  %v4890_v48 = vadd.f32 1.0, %v7046_v10 }
 0xbc6   : > { %v4904_v62 = vmul.f32 %v4888_v55, %v4776_v58 }
 0xbc7   : > { %v4906_v35 = vmul.f32 %v4890_v48, %v4778_v59 }
 0xbc8   : > { %v4916_v37 = vpack.c.bf16 %v4904_v62, %v4900_v36 }
 0xbc9   : > { %v4918_v18 = vpack.c.bf16 %v4906_v35, %v4902_v27 }
 0xbca   : > { %5207 = vmatmul.bf16.vlgmr.msrb.gmra.mxu3 %v4916_v37 }
 0xbcb   : > { %5245 = vmatmul.bf16.vlgmr.msrb.gmra.mxu2 %v4918_v18 }
 0xbe1   : > { %v4709_v49 = vpop.f32.mrf.mxu0 }
 0xbe2   : > { %v9843_v15 = vadd.f32 %v4709_v49, %v9768_v61  ;;  %v4747_v38 = vpop.f32.mrf.mxu1 }
 0xbe3   : > { %v9846_v7 = vadd.f32 %v4747_v38, %v9770_v43 }
 0xbe4   : > { %v4795_v50 = vmul.f32 0.044715, %v9843_v15 }
 0xbe5   : > { %v4797_v51 = vmul.f32 0.044715, %v9846_v7 }
 0xbe6   : > { %v4811_v8 = vmul.f32 %v4795_v50, %v9843_v15 }
 0xbe7   : > { %v4728_v56 = vpop.f32.mrf.mxu3  ;;  %v4813_v1 = vmul.f32 %v4797_v51, %v9846_v7  ;;  %v4779_v51 = vmul.f32 0.5, %v9843_v15 }
 0xbe8   : > { %v9853_v13 = vadd.f32 %v4728_v56, %v9785_v45  ;;  %v4766_v57 = vpop.f32.mrf.mxu2  ;;  %v4827_v46 = vmul.f32 %v4811_v8, %v9843_v15 }
 0xbe9   : > { %v9857_v40 = vadd.f32 %v4766_v57, %v9788_v39  ;;  %v4711_v21 = vpop.f32.mrf.mxu0  ;;  %v4829_v30 = vmul.f32 %v4813_v1, %v9846_v7  ;;  %v4781_v57 = vmul.f32 0.5, %v9846_v7 }
 0xbea   : > { %v4796_v63 = vmul.f32 0.044715, %v9853_v13  ;;  %v4712_v24 = vadd.f32 %v4711_v21, %v9768_v61  ;;  %v4749_v20 = vpop.f32.mrf.mxu1  ;;  %v4843_v6 = vadd.f32 %v4827_v46, %v9843_v15  ;;  %v4780_v15 = vmul.f32 0.5, %v9853_v13 }
 0xbeb   : > { %v4798_v2 = vmul.f32 0.044715, %v9857_v40  ;;  %v4750_v23 = vadd.f32 %v4749_v20, %v9770_v43  ;;  %v4845_v26 = vadd.f32 %v4829_v30, %v9846_v7  ;;  %v4782_v7 = vmul.f32 0.5, %v9857_v40 }
 0xbec   : > { %v4799_v25 = vmul.f32 0.044715, %v4712_v24  ;;  %v4812_v11 = vmul.f32 %v4796_v63, %v9853_v13  ;;  %v4859_v4 = vmul.f32 0.7978846, %v4843_v6  ;;  %v4783_v8 = vmul.f32 0.5, %v4712_v24 }
 0xbed   : > { %v4801_v12 = vmul.f32 0.044715, %v4750_v23  ;;  %v4814_v54 = vmul.f32 %v4798_v2, %v9857_v40  ;;  %v4861_v60 = vmul.f32 0.7978846, %v4845_v26  ;;  %v4785_v46 = vmul.f32 0.5, %v4750_v23 }
 0xbee   : > { %v4815_v44 = vmul.f32 %v4799_v25, %v4712_v24  ;;  %v4828_v22 = vmul.f32 %v4812_v11, %v9853_v13  ;;  %7047 = vtanh.f32 %v4859_v4 }
 0xbef   : > { %v4730_v61 = vpop.f32.mrf.mxu3  ;;  %v4817_v42 = vmul.f32 %v4801_v12, %v4750_v23  ;;  %v4830_v32 = vmul.f32 %v4814_v54, %v9857_v40  ;;  %7049 = vtanh.f32 %v4861_v60 }
 0xbf0   : > { %v4731_v52 = vadd.f32 %v4730_v61, %v9785_v45  ;;  %v4768_v43 = vpop.f32.mrf.mxu2  ;;  %v4831_v29 = vmul.f32 %v4815_v44, %v4712_v24  ;;  %v4844_v41 = vadd.f32 %v4828_v22, %v9853_v13 }
 0xbf1   : > { %v4769_v17 = vadd.f32 %v4768_v43, %v9788_v39  ;;  %v4833_v33 = vmul.f32 %v4817_v42, %v4750_v23  ;;  %v4846_v31 = vadd.f32 %v4830_v32, %v9857_v40 }
 0xbf2   : > { %v4800_v53 = vmul.f32 0.044715, %v4731_v52  ;;  %v4847_v3 = vadd.f32 %v4831_v29, %v4712_v24  ;;  %v4860_v58 = vmul.f32 0.7978846, %v4844_v41  ;;  %v4784_v24 = vmul.f32 0.5, %v4731_v52 }
 0xbf3   : > { %v4802_v28 = vmul.f32 0.044715, %v4769_v17  ;;  %v4849_v19 = vadd.f32 %v4833_v33, %v4750_v23  ;;  %v4862_v0 = vmul.f32 0.7978846, %v4846_v31  ;;  %v4786_v23 = vmul.f32 0.5, %v4769_v17  ;;  %v9879_v33 = vld [vmem:[%s7791_s15] sm:$0xff] }
 0xbf4   : > { %v4863_v10 = vmul.f32 0.7978846, %v4847_v3  ;;  %v4816_v5 = vmul.f32 %v4800_v53, %v4731_v52  ;;  %v7048_v39 = vpop.eup %7047  ;;  %v4987_v13 = vperm.slane %v9879_v33, 6 }
 0xbf5   : > { %v4865_v55 = vmul.f32 0.7978846, %v4849_v19  ;;  %v4818_v45 = vmul.f32 %v4802_v28, %v4769_v17  ;;  %v7050_v62 = vpop.eup %7049  ;;  %v4891_v37 = vadd.f32 1.0, %v7048_v39 }
 0xbf6   : > { %7051 = vtanh.f32 %v4863_v10  ;;  %v4832_v59 = vmul.f32 %v4816_v5, %v4731_v52  ;;  %v4893_v38 = vadd.f32 1.0, %v7050_v62 }
 0xbf7   : > { %7053 = vtanh.f32 %v4865_v55  ;;  %v4834_v48 = vmul.f32 %v4818_v45, %v4769_v17  ;;  %v4907_v63 = vmul.f32 %v4891_v37, %v4779_v51 }
 0xbf8   : > { %v4848_v36 = vadd.f32 %v4832_v59, %v4731_v52  ;;  %7055 = vtanh.f32 %v4860_v58  ;;  %v4909_v6 = vmul.f32 %v4893_v38, %v4781_v57 }
 0xbf9   : > { %v4850_v27 = vadd.f32 %v4834_v48, %v4769_v17  ;;  %7057 = vtanh.f32 %v4862_v0 }
 0xbfa   : > { %v4864_v35 = vmul.f32 0.7978846, %v4848_v36 }
 0xbfb   : > { %v4866_v18 = vmul.f32 0.7978846, %v4850_v27 }
 0xbfc   : > { %v7052_v49 = vpop.eup %7051  ;;  %7059 = vtanh.f32 %v4864_v35 }
 0xbfd   : > { %v7054_v50 = vpop.eup %7053  ;;  %v4895_v56 = vadd.f32 1.0, %v7052_v49  ;;  %7061 = vtanh.f32 %v4866_v18 }
 0xbfe   : > { %v7056_v1 = vpop.eup %7055  ;;  %v4897_v21 = vadd.f32 1.0, %v7054_v50 }
 0xbff   : > { %v7058_v30 = vpop.eup %7057  ;;  %v4911_v20 = vmul.f32 %v4895_v56, %v4783_v8  ;;  %v4892_v25 = vadd.f32 1.0, %v7056_v1 }
 0xc00   : > { %v4913_v2 = vmul.f32 %v4897_v21, %v4785_v46  ;;  %v4894_v54 = vadd.f32 1.0, %v7058_v30 }
 0xc01   : > { %v4919_v26 = vpack.c.bf16 %v4911_v20, %v4907_v63  ;;  %v4908_v61 = vmul.f32 %v4892_v25, %v4780_v15 }
 0xc02   : > { %v7060_v11 = vpop.eup %7059  ;;  %v4921_v12 = vpack.c.bf16 %v4913_v2, %v4909_v6  ;;  %v4910_v60 = vmul.f32 %v4894_v54, %v4782_v7 }
 0xc03   : > { %v7062_v44 = vpop.eup %7061  ;;  %5193 = vmatmul.bf16.gmra.mxu0 %v4919_v26  ;;  %v4896_v4 = vadd.f32 1.0, %v7060_v11 }
 0xc04   : > { %5231 = vmatmul.bf16.gmra.mxu1 %v4921_v12  ;;  %v4898_v22 = vadd.f32 1.0, %v7062_v44 }
 0xc05   : > { %v4912_v42 = vmul.f32 %v4896_v4, %v4784_v24 }
 0xc06   : > { %v4914_v32 = vmul.f32 %v4898_v22, %v4786_v23 }
 0xc07   : > { %v4920_v43 = vpack.c.bf16 %v4912_v42, %v4908_v61 }
 0xc08   : > { %v4922_v29 = vpack.c.bf16 %v4914_v32, %v4910_v60 }
 0xc09   : > { %5212 = vmatmul.bf16.gmra.mxu3 %v4920_v43 }
 0xc0a   : > { %5250 = vmatmul.bf16.gmra.mxu2 %v4922_v29 }
 0xc41   : > { %v5189_v41 = vpop.f32.mrf.mxu0 }
 0xc42   : > { %v5190_v52 = vadd.f32 %v5189_v41, %v4987_v13  ;;  %v5227_v31 = vpop.f32.mrf.mxu1 }
 0xc49   : > { %v5191_v28 = vpop.f32.mrf.mxu0 }
 0xc4a   : > { %v5192_v10 = vadd.f32 %v5191_v28, %v4987_v13  ;;  %v5229_v45 = vpop.f32.mrf.mxu1  ;;  %v6956_v28 = vld [vmem:[%s7791_s15 + $0x8] ss:$0 sm:$0xff] }
 0xc4d   : > { %v5208_v53 = vpop.f32.mrf.mxu3 }
 0xc4e   : > { %v5209_v3 = vadd.f32 %v5208_v53, %v5190_v52  ;;  %v5246_v40 = vpop.f32.mrf.mxu2 }
 0xc50   : > { %v5228_v17 = vadd.f32 %v5227_v31, %v5209_v3  ;;  %v5340_v3 = vperm.slane %v9879_v33, 7 }
 0xc52   : > { %v5247_v19 = vadd.f32 %v5246_v40, %v5228_v17 }
 0xc54   : > { %v5256_v5 = vadd.f32 %v5247_v19, %v9735_v9 }
 0xc55   : > { %v5210_v58 = vpop.f32.mrf.mxu3 }
 0xc56   : > { %v5211_v55 = vadd.f32 %v5210_v58, %v5192_v10  ;;  %5260 = vadd.xlane.f32.xlu2 %v5256_v5  ;;  %v5248_v59 = vpop.f32.mrf.mxu2 }
 0xc58   : > { %v5230_v0 = vadd.f32 %v5229_v45, %v5211_v55 }
 0xc5a   : > { %v5249_v48 = vadd.f32 %v5248_v59, %v5230_v0 }
 0xc5c   : > { %v5257_v39 = vadd.f32 %v5249_v48, %v9737_v34 }
 0xc5e   : > { %5262 = vadd.xlane.f32.xlu1 %v5257_v39 }
 0xc80   : > { %v5194_v36 = vpop.f32.mrf.mxu0 }
 0xc81   : > { %v5195_v62 = vadd.f32 %v5194_v36, %v4987_v13  ;;  %v5232_v27 = vpop.f32.mrf.mxu1 }
 0xc88   : > { %v5196_v38 = vpop.f32.mrf.mxu0 }
 0xc89   : > { %v5197_v9 = vadd.f32 %v5196_v38, %v4987_v13  ;;  %v5234_v1 = vpop.f32.mrf.mxu1 }
 0xc8c   : > { %v5213_v35 = vpop.f32.mrf.mxu3 }
 0xc8d   : > { %v5214_v37 = vadd.f32 %v5213_v35, %v5195_v62  ;;  %v5251_v18 = vpop.f32.mrf.mxu2 }
 0xc8f   : > { %v5233_v49 = vadd.f32 %v5232_v27, %v5214_v37 }
 0xc91   : > { %v5252_v50 = vadd.f32 %v5251_v18, %v5233_v49 }
 0xc93   : > { %v5258_v51 = vadd.f32 %v5252_v50, %v9745_v16 }
 0xc94   : > { %v5215_v8 = vpop.f32.mrf.mxu3 }
 0xc95   : > { %v5216_v56 = vadd.f32 %v5215_v8, %v5197_v9  ;;  %5264 = vadd.xlane.f32.xlu0 %v5258_v51  ;;  %v5253_v46 = vpop.f32.mrf.mxu2 }
 0xc97   : > { %v5235_v57 = vadd.f32 %v5234_v1, %v5216_v56 }
 0xc99   : > { %v5254_v34 = vadd.f32 %v5253_v46, %v5235_v57 }
 0xc9b   : > { %v5259_v21 = vadd.f32 %v5254_v34, %v9747_v14 }
 0xc9d   : > { %5266 = vadd.xlane.f32.xlu2 %v5259_v21 }
 0xcc9   : > { %v5261_v30 = vpop.xlane.xlu2 %5260 }
 0xcca   : > { %v5268_v63 = vmul.f32 %v5261_v30, %v9626_v47 }
 0xccc   : > { %v5272_v20 = vsub.f32 %v5256_v5, %v5268_v63 }
 0xcce   : > { %v5276_v6 = vmul.f32 %v5272_v20, %v5272_v20 }
 0xcd0   : > { %5280 = vadd.xlane.f32.xlu1 %v5276_v6 }
 0xcd1   : > { %v5263_v2 = vpop.xlane.xlu1 %5262 }
 0xcd2   : > { %v5269_v26 = vmul.f32 %v5263_v2, %v9626_v47 }
 0xcd4   : > { %v5273_v16 = vsub.f32 %v5257_v39, %v5269_v26 }
 0xcd6   : > { %v5277_v25 = vmul.f32 %v5273_v16, %v5273_v16 }
 0xcd8   : > { %5282 = vadd.xlane.f32.xlu0 %v5277_v25 }
 0xd08   : > { %v5265_v11 = vpop.xlane.xlu0 %5264 }
 0xd09   : > { %v5270_v12 = vmul.f32 %v5265_v11, %v9626_v47 }
 0xd0b   : > { %v9889_v54 = vsub.f32 %v5258_v51, %v5270_v12 }
 0xd0d   : > { %v5278_v14 = vmul.f32 %v9889_v54, %v9889_v54 }
 0xd0f   : > { %5284 = vadd.xlane.f32.xlu2 %v5278_v14 }
 0xd10   : > { %v5267_v44 = vpop.xlane.xlu2 %5266 }
 0xd11   : > { %v5271_v15 = vmul.f32 %v5267_v44, %v9626_v47 }
 0xd13   : > { %v9894_v24 = vsub.f32 %v5259_v21, %v5271_v15 }
 0xd15   : > { %v5279_v4 = vmul.f32 %v9894_v24, %v9894_v24 }
 0xd17   : > { %5286 = vadd.xlane.f32.xlu1 %v5279_v4 }
 0xd43   : > { %v5281_v7 = vpop.xlane.xlu1 %5280 }
 0xd44   : > { %v5288_v23 = vmul.f32 %v5281_v7, %v9626_v47 }
 0xd46   : > { %v5292_v22 = vadd.f32 1e-12, %v5288_v23 }
 0xd48   : > { %7063 = vrsqrt.f32 %v5292_v22  ;;  %vm5302_vm11 = vweird.f32 %v5292_v22 }
 0xd4b   : > { %v5283_v61 = vpop.xlane.xlu0 %5282 }
 0xd4c   : > { %v5289_v42 = vmul.f32 %v5283_v61, %v9626_v47 }
 0xd4e   : > { %v7064_v60 = vpop.eup %7063  ;;  %v5293_v32 = vadd.f32 1e-12, %v5289_v42 }
 0xd4f   : > { %v5297_v43 = vmul.f32 %v7064_v60, %v5292_v22  ;;  %vm5303_vm10 = vweird.f32 %v7064_v60 }
 0xd50   : > { %7065 = vrsqrt.f32 %v5293_v32  ;;  %vm5304_vm12 = vmor %vm5302_vm11, %vm5303_vm10  ;;  %vm5312_vm14 = vweird.f32 %v5293_v32 }
 0xd51   : > { %v5298_v29 = vmul.f32 %v7064_v60, %v5297_v43 }
 0xd53   : > { %v5299_v41 = vmul.f32 0.5, %v5298_v29 }
 0xd55   : > { %v5300_v13 = vsub.f32 1.5, %v5299_v41 }
 0xd56   : > { %v7066_v52 = vpop.eup %7065 }
 0xd57   : > { %v5301_v31 = vmul.f32 %v7064_v60, %v5300_v13  ;;  %v5307_v53 = vmul.f32 %v7066_v52, %v5293_v32  ;;  %vm5313_vm13 = vweird.f32 %v7066_v52 }
 0xd58   : > { %vm5314_vm15 = vmor %vm5312_vm14, %vm5313_vm13 }
 0xd59   : > { %v5305_v40 = vsel %vm5304_vm12, %v7064_v60, %v5301_v31  ;;  %v5308_v17 = vmul.f32 %v7066_v52, %v5307_v53 }
 0xd5a   : > { %v5336_v19 = vmul.f32 %v5305_v40, %v5272_v20 }
 0xd5b   : > { %v5309_v10 = vmul.f32 0.5, %v5308_v17 }
 0xd5c   : > { %v5341_v5 = vmul.f32 %v5340_v3, %v5336_v19 }
 0xd5d   : > { %v5310_v58 = vsub.f32 1.5, %v5309_v10 }
 0xd5e   : > { %v9902_v55 = vadd.f32 %v6956_v28, %v5341_v5 }
 0xd5f   : > { %v5311_v45 = vmul.f32 %v7066_v52, %v5310_v58 }
 0xd60   : > { %v5350_v0 = vpack.c.bf16 %v9902_v55, %v9902_v55 }
 0xd61   : > { %v5315_v59 = vsel %vm5314_vm15, %v7066_v52, %v5311_v45 }
 0xd62   : > { %v5337_v48 = vmul.f32 %v5315_v59, %v5273_v16 }
 0xd64   : > { %v5342_v33 = vmul.f32 %v5340_v3, %v5337_v48 }
 0xd66   : > { %v9906_v39 = vadd.f32 %v6956_v28, %v5342_v33 }
 0xd68   : > { %v5351_v36 = vpack.c.bf16 %v9906_v39, %v9906_v39  ;;  %v6674_v62 = vpack.c.bf16 %v9906_v39, %v9902_v55 }
 0xd6a   : > { %6675 = vst [vmem:[#allocation2] sm:$0xff] %v6674_v62  }
 0xd82   : > { %v5285_v27 = vpop.xlane.xlu2 %5284 }
 0xd83   : > { %v5290_v35 = vmul.f32 %v5285_v27, %v9626_v47 }
 0xd85   : > { %v5294_v37 = vadd.f32 1e-12, %v5290_v35 }
 0xd87   : > { %7067 = vrsqrt.f32 %v5294_v37  ;;  %vm5322_vm1 = vweird.f32 %v5294_v37 }
 0xd8a   : > { %v5287_v18 = vpop.xlane.xlu1 %5286 }
 0xd8b   : > { %v5291_v49 = vmul.f32 %v5287_v18, %v9626_v47 }
 0xd8d   : > { %v7068_v38 = vpop.eup %7067  ;;  %v5295_v50 = vadd.f32 1e-12, %v5291_v49 }
 0xd8e   : > { %v5317_v9 = vmul.f32 %v7068_v38, %v5294_v37  ;;  %vm5323_vm0 = vweird.f32 %v7068_v38 }
 0xd8f   : > { %7069 = vrsqrt.f32 %v5295_v50  ;;  %vm5324_vm2 = vmor %vm5322_vm1, %vm5323_vm0  ;;  %vm5332_vm4 = vweird.f32 %v5295_v50 }
 0xd90   : > { %v5318_v51 = vmul.f32 %v7068_v38, %v5317_v9 }
 0xd92   : > { %v5319_v8 = vmul.f32 0.5, %v5318_v51 }
 0xd94   : > { %v5320_v56 = vsub.f32 1.5, %v5319_v8 }
 0xd95   : > { %v7070_v1 = vpop.eup %7069 }
 0xd96   : > { %v5321_v57 = vmul.f32 %v7068_v38, %v5320_v56  ;;  %v5327_v46 = vmul.f32 %v7070_v1, %v5295_v50  ;;  %vm5333_vm3 = vweird.f32 %v7070_v1 }
 0xd97   : > { %vm5334_vm5 = vmor %vm5332_vm4, %vm5333_vm3 }
 0xd98   : > { %v5325_v34 = vsel %vm5324_vm2, %v7068_v38, %v5321_v57  ;;  %v5328_v21 = vmul.f32 %v7070_v1, %v5327_v46 }
 0xd99   : > { %v5338_v30 = vmul.f32 %v5325_v34, %v9889_v54 }
 0xd9a   : > { %v5329_v63 = vmul.f32 0.5, %v5328_v21 }
 0xd9b   : > { %v5343_v20 = vmul.f32 %v5340_v3, %v5338_v30 }
 0xd9c   : > { %v5330_v47 = vsub.f32 1.5, %v5329_v63 }
 0xd9d   : > { %v5348_v6 = vadd.f32 %v6956_v28, %v5343_v20 }
 0xd9e   : > { %v5331_v2 = vmul.f32 %v7070_v1, %v5330_v47 }
 0xd9f   : > { %v5352_v26 = vpack.c.bf16 %v5348_v6, %v5348_v6 }
 0xda0   : > { %v5335_v16 = vsel %vm5334_vm5, %v7070_v1, %v5331_v2 }
 0xda1   : > { %v5339_v25 = vmul.f32 %v5335_v16, %v9894_v24 }
 0xda3   : > { %v5344_v11 = vmul.f32 %v5340_v3, %v5339_v25 }
 0xda5   : > { %v5349_v12 = vadd.f32 %v6956_v28, %v5344_v11  ;;  %5361 = sbr.rel (%p6451_p3) target bundleno = 3824 (0xef0), region = 148 }
 0xda7   : > { %v5353_v14 = vpack.c.bf16 %v5349_v12, %v5349_v12  ;;  %v6679_v44 = vpack.c.bf16 %v5349_v12, %v5348_v6 }
 0xda9   : > { %6682 = vst [vmem:[#allocation2 + $0x8] sm:$0xff] %v6679_v44  }
 0xdaa   : > { %v6652_v54 = vld [vmem:[#allocation13 + $0x38] sm:$0xff]  ;;  %v6651_v15 = vld [vmem:[#allocation13 + $0x30] sm:$0xff]  ;;  %v6650_v23 = vld [vmem:[#allocation13 + $0x28] sm:$0xff]  ;;  %v5386_v32 = vunpack.c.l.b16 %v5350_v0  ;;  %v5387_v43 = vunpack.c.l.b16 %v5351_v36  ;;  %v5388_v29 = vunpack.c.l.b16 %v5352_v26  ;;  %v5389_v41 = vunpack.c.l.b16 %v5353_v14 }
 0xdab   : > { %5442 = vmatpush.bf16.msra.mxu0 %v6652_v54  ;;  %6691 = vmatpush.bf16.msra.mxu2 %v6652_v54  ;;  %v6660_v4 = vld [vmem:[#allocation14 + $0x38] sm:$0xff]  ;;  %v6659_v7 = vld [vmem:[#allocation14 + $0x30] sm:$0xff]  ;;  %v6658_v24 = vld [vmem:[#allocation14 + $0x28] sm:$0xff] }
 0xdac   : > { %5535 = vmatpush.bf16.msra.mxu1 %v6660_v4  ;;  %6699 = vmatpush.bf16.msra.mxu3 %v6660_v4  ;;  %v6649_v22 = vld [vmem:[#allocation13 + $0x20] sm:$0xff]  ;;  %v6648_v61 = vld [vmem:[#allocation13 + $0x18] sm:$0xff]  ;;  %v6647_v42 = vld [vmem:[#allocation13 + $0x10] sm:$0xff]  ;;  %v5390_v52 = vpack.c.b16 %v5387_v43, %v5386_v32  ;;  %v5391_v31 = vpack.c.b16 %v5389_v41, %v5388_v29 }
 0xdad   : > { %v6646_v60 = vld [vmem:[#allocation13 + $0x8] sm:$0xff]  ;;  %v6645_v13 = vld [vmem:[#allocation13] sm:$0xff]  ;;  %v6656_v3 = vld [vmem:[#allocation14 + $0x18] sm:$0xff] }
 0xdae   : > { %v6657_v53 = vld [vmem:[#allocation14 + $0x20] sm:$0xff]  ;;  %v6655_v40 = vld [vmem:[#allocation14 + $0x10] sm:$0xff]  ;;  %v6654_v17 = vld [vmem:[#allocation14 + $0x8] sm:$0xff] }
 0xdaf   : > { %5443 = vmatpush.bf16.msra.mxu0 %v6651_v15  ;;  %6692 = vmatpush.bf16.msra.mxu2 %v6651_v15  ;;  %v6653_v28 = vld [vmem:[#allocation14] sm:$0xff]  ;;  %v7073_v10 = vld [vmem:[%s10363_s4] ss:$0 sm:$0xff] }
 0xdb0   : > { %5536 = vmatpush.bf16.msra.mxu1 %v6659_v7  ;;  %6700 = vmatpush.bf16.msra.mxu3 %v6659_v7  ;;  %v7074_v37 = vld [vmem:[%s10364_s22] ss:$0 sm:$0xff] }
 0xdb3   : > { %5444 = vmatpush.bf16.msra.mxu0 %v6650_v23  ;;  %6693 = vmatpush.bf16.msra.mxu2 %v6650_v23 }
 0xdb4   : > { %5537 = vmatpush.bf16.msra.mxu1 %v6658_v24  ;;  %6701 = vmatpush.bf16.msra.mxu3 %v6658_v24 }
 0xdb7   : > { %5445 = vmatpush.bf16.msra.mxu0 %v6649_v22  ;;  %6694 = vmatpush.bf16.msra.mxu2 %v6649_v22 }
 0xdb8   : > { %5538 = vmatpush.bf16.msra.mxu1 %v6657_v53  ;;  %6702 = vmatpush.bf16.msra.mxu3 %v6657_v53 }
 0xdbb   : > { %5446 = vmatpush.bf16.msra.mxu0 %v6648_v61  ;;  %6695 = vmatpush.bf16.msra.mxu2 %v6648_v61 }
 0xdbc   : > { %5539 = vmatpush.bf16.msra.mxu1 %v6656_v3  ;;  %6703 = vmatpush.bf16.msra.mxu3 %v6656_v3 }
 0xdbf   : > { %5447 = vmatpush.bf16.msra.mxu0 %v6647_v42  ;;  %6696 = vmatpush.bf16.msra.mxu2 %v6647_v42 }
 0xdc0   : > { %5540 = vmatpush.bf16.msra.mxu1 %v6655_v40  ;;  %6704 = vmatpush.bf16.msra.mxu3 %v6655_v40 }
 0xdc3   : > { %5448 = vmatpush.bf16.msra.mxu0 %v6646_v60  ;;  %6697 = vmatpush.bf16.msra.mxu2 %v6646_v60 }
 0xdc4   : > { %5541 = vmatpush.bf16.msra.mxu1 %v6654_v17  ;;  %6705 = vmatpush.bf16.msra.mxu3 %v6654_v17 }
 0xdc7   : > { %5449 = vmatpush.bf16.msra.mxu0 %v6645_v13  ;;  %6698 = vmatpush.bf16.msra.mxu2 %v6645_v13 }
 0xdc8   : > { %5542 = vmatpush.bf16.msra.mxu1 %v6653_v28  ;;  %6706 = vmatpush.bf16.msra.mxu3 %v6653_v28 }
 0xdca   : > { %5450 = vmatmul.bf16.vlgmr.msra.gmra.mxu0 %v5390_v52  ;;  %5455 = vmatmul.bf16.vlgmr.msra.gmra.mxu2 %v5391_v31 }
 0xe47   : > { %v5451_v19 = vpop.f32.mrf.mxu0 }
 0xe48   : > { %v5452_v5 = vadd.f32 %v7073_v10, %v5451_v19 }
 0xe4a   : > { %7075 = vtanh.f32 %v5452_v5 }
 0xe4d   : > { %v5456_v58 = vpop.f32.mrf.mxu2 }
 0xe4e   : > { %v5457_v0 = vadd.f32 %v7073_v10, %v5456_v58 }
 0xe4f   : > { %v5453_v55 = vpop.f32.mrf.mxu0 }
 0xe50   : > { %v5454_v45 = vadd.f32 %v7073_v10, %v5453_v55  ;;  %v7076_v48 = vpop.eup %7075 }
 0xe52   : > { %7077 = vtanh.f32 %v5454_v45 }
 0xe53   : > { %7079 = vtanh.f32 %v5457_v0 }
 0xe55   : > { %v5458_v59 = vpop.f32.mrf.mxu2 }
 0xe56   : > { %v5459_v33 = vadd.f32 %v7073_v10, %v5458_v59 }
 0xe58   : > { %v7078_v39 = vpop.eup %7077  ;;  %7081 = vtanh.f32 %v5459_v33 }
 0xe59   : > { %v5465_v36 = vpack.c.bf16 %v7078_v39, %v7076_v48  ;;  %v7080_v62 = vpop.eup %7079 }
 0xe5b   : > { %5543 = vmatmul.bf16.vlgmr.msra.gmra.mxu1 %v5465_v36 }
 0xe5e   : > { %v7082_v27 = vpop.eup %7081 }
 0xe5f   : > { %v5466_v35 = vpack.c.bf16 %v7082_v27, %v7080_v62 }
 0xe61   : > { %5548 = vmatmul.bf16.vlgmr.msra.gmra.mxu3 %v5466_v35 }
 0xed8   : > { %v5544_v18 = vpop.f32.mrf.mxu1 }
 0xed9   : > { %v5545_v49 = vadd.f32 %v7074_v37, %v5544_v18 }
 0xedb   : > { %5554 = vst [vmem:[#allocation16] sm:$0xff] %v5545_v49 }
 0xee0   : > { %v5546_v38 = vpop.f32.mrf.mxu1 }
 0xee1   : > { %v5547_v50 = vadd.f32 %v7074_v37, %v5546_v38 }
 0xee3   : > { %5555 = vst [vmem:[#allocation16 + $0x8] sm:$0xff] %v5547_v50 }
 0xee4   : > { %v5549_v9 = vpop.f32.mrf.mxu3 }
 0xee5   : > { %v5550_v51 = vadd.f32 %v7074_v37, %v5549_v9 }
 0xee7   : > { %5556 = vst [vmem:[#allocation16 + $0x10] sm:$0xff] %v5550_v51 }
 0xeec   : > { %v5551_v8 = vpop.f32.mrf.mxu3 }
 0xeed   : > { %v5552_v56 = vadd.f32 %v7074_v37, %v5551_v8 }
 0xeef   : > { %5557 = vst [vmem:[#allocation16 + $0x18] sm:$0xff] %v5552_v56 }
 0xef0 PF: > { %p6775_p4 = scmp.eq.s32.totalorder %s7610_s29, 1  ;;  %s10365_s8 = sld [smem:[#allocation104_spill]] }
 0xef1   : > { %s7468_s6 = smov [#allocation16]   ;;  %s7469_s9 = smov 128  }
 0xef2   : > { %s5567_s12 = sshll.u32 %s7468_s6, 4  ;;  %s7470_s23 = smov 8   ;;  %s5568_s12 = int_to_ptr.vmem [resolvable:$true] %s5567_s12 }
 0xef6   : > { %s5569_s2 = sshll.u32 %s10365_s8, 4  ;;  %s5570_s2 = int_to_ptr.hbm [resolvable:$true] %s5569_s2 }
 0xef7   : > { %6734 = dma.vmem_to_hbm [thread:$0]  (%p6775_p4), %s5568_s12, 512, %s5570_s2, [#allocation5], %s7469_s9, %s7469_s9, %s7470_s23  }
 0xef8   : > { %7426 = dma.done.wait (%p6775_p4), [#allocation5], 512  }
 0xef9   : > { %7428 = vsyncadd (%p6775_p4), [#allocation5], 4294966784 }
 0xefa PF: > { %s10366_s21 = sld [smem:[#allocation25_spill]]  ;;  %s10370_s2 = smov %s7435_s25 }
 0xefb   : > { %s10367_s24 = sld [smem:[#allocation23_spill]]  ;;  %s10372_s27 = smov %s7447_s3 }
 0xefc   : > { %s10368_s26 = sld [smem:[#allocation28_spill]] }
 0xefd   : > { %s10369_s29 = sld [smem:[#allocation27_spill]] }
 0xf00   : > { %s35_s28 = sadd.s32 1, %s10366_s21  }
 0xf01   : > { %p32_p5 = scmp.ge.s32.totalorder %s35_s28, 4   ;;  %s10371_s25 = smov %s10367_s24 }
 0xf03   : > { %s10373_s3 = smov %s10369_s29  ;;  %34 = sbr.rel (!%p32_p5) target bundleno = 24 (0x18), region = 224 }
 0xf08   :  { %5586 = vsyncpa [#allocation4], 1 }
 0xf09   :  { %5588 = vsyncpa [#allocation4 + $0x1], 1 }
 0xf0a   :  { %5589 = vsyncpa [#allocation7], 1 }
 0xf0b   :  { %5590 = vsyncpa [#allocation15], 1 }
 0xf0c   :  { %5591 = vsyncpa [#allocation5], 1 }
 0xf0d   :  { %5593 = vsyncpa [#allocation5 + $0x1], 1 }

</bundles_post_ra>
